<compile_context>
chip_gen: v6e
topology: v6e:2x2x1
jax: 0.10.0
libtpu: 0.0.40
codegen_flags: <defaults>
</compile_context>

<pallas_src>
import functools

import numpy as np
import jax
import jax.numpy as jnp
from jax.experimental import pallas as pl
from jax.experimental.pallas import tpu as pltpu


# -----------------------------------------------------------------------------
# In-kernel helpers
# -----------------------------------------------------------------------------
def _silu(x):
    # x * sigmoid(x).  exp() and the approximate reciprocal both land on the
    # EUP slot, keeping the VPU free for the one-hot compares / LayerNorm.
    return x * pl.reciprocal(1.0 + jnp.exp(-x), approx=True)


def _layer_norm(y, gamma, beta, eps=1e-5):
    mu = jnp.mean(y, axis=-1, keepdims=True)
    var = jnp.mean(jnp.square(y - mu), axis=-1, keepdims=True)
    return (y - mu) * jax.lax.rsqrt(var + eps) * gamma + beta


def _bdot(a, b):
    # bf16 MXU inputs, f32 accumulate (native MXU rate on all generations).
    return jnp.dot(a.astype(jnp.bfloat16), b.astype(jnp.bfloat16),
                   preferred_element_type=jnp.float32)


# -----------------------------------------------------------------------------
# Single fused Encoder kernel
# -----------------------------------------------------------------------------
def _encoder_kernel(
    # data
    ef_ref, nfeat_ref, snd_ref, rcv_col_ref, rcv_row_ref,
    # embed_edge_fn
    ee_w1, ee_b1, ee_w2, ee_b2, ee_g, ee_bt,
    # embed_node_fn
    en_w1, en_b1, en_w2, en_b2, en_g, en_bt,
    # process-edge fn (W1 pre-split into [ef | nf_sender | nf_receiver] blocks)
    pe_w1e, pe_w1s, pe_w1r, pe_b1, pe_w2, pe_b2, pe_g, pe_bt,
    # process-node fn (W1 pre-split into [nf | aggregated-edges] blocks)
    pn_w1n, pn_w1a, pn_b1, pn_w2, pn_b2, pn_g, pn_bt,
    # node_output_fn (no LayerNorm -> no gamma/beta inputs at all)
    no_w1, no_b1, no_w2, no_b2,
    # outputs
    edge_out_ref, node_out_ref, nf_out_ref,
):
    bf16 = jnp.bfloat16
    E = ef_ref.shape[0]
    N = nfeat_ref.shape[0]
    n_out = node_out_ref.shape[0]

    def mlp(x, w1, b1, w2, b2):
        # Linear -> SiLU -> Linear (bf16 MXU inputs, f32 elementwise math).
        h = _bdot(x, w1[...]) + b1[...]
        return _bdot(_silu(h), w2[...]) + b2[...]

    # ---- embed_edge_fn : Linear -> SiLU -> Linear -> LayerNorm --------------
    ef = _layer_norm(mlp(ef_ref[...], ee_w1, ee_b1, ee_w2, ee_b2),
                     ee_g[...], ee_bt[...])

    # ---- embed_node_fn -------------------------------------------------------
    nf = _layer_norm(mlp(nfeat_ref[...], en_w1, en_b1, en_w2, en_b2),
                     en_g[...], en_bt[...])
    nf_out_ref[...] = nf
    nf_reg = nf[:n_out]                      # n_out % 8 == 0 -> free sublane view

    # ---- one-hot matrices (exact 0/1 in bf16) --------------------------------
    # Receivers only index the first n_out nodes, so both receiver one-hots are
    # built against n_out (not N) -- no wasted compares, no E*N extra buffer.
    col_n = jax.lax.broadcasted_iota(jnp.int32, (E, N), 1)
    col_o = jax.lax.broadcasted_iota(jnp.int32, (E, n_out), 1)
    row_o = jax.lax.broadcasted_iota(jnp.int32, (n_out, E), 0)
    oh_s = jnp.where(snd_ref[...] == col_n, 1.0, 0.0).astype(bf16)       # (E, N)
    oh_rg = jnp.where(rcv_col_ref[...] == col_o, 1.0, 0.0).astype(bf16)  # (E, n_out)
    oh_rs = jnp.where(row_o == rcv_row_ref[...], 1.0, 0.0).astype(bf16)  # (n_out, E)

    # ---- nf[senders] / nf[receivers] as one-hot MXU matmuls ------------------
    nf_s = _bdot(oh_s, nf)                   # (E, H)
    nf_r = _bdot(oh_rg, nf_reg)              # (E, H)

    # ---- edge update phi_e([ef, nf_s, nf_r]) via split-W1 (no concat) --------
    h = (_bdot(ef, pe_w1e[...]) + _bdot(nf_s, pe_w1s[...])
         + _bdot(nf_r, pe_w1r[...]) + pe_b1[...])
    el = _bdot(_silu(h), pe_w2[...]) + pe_b2[...]
    el = _layer_norm(el, pe_g[...], pe_bt[...])
    edge_out_ref[...] = el

    # ---- scatter-add of edge latents onto receivers: one-hot matmul ----------
    agg = _bdot(oh_rs, el)                   # (n_out, H)

    # ---- node update phi_n([nf[:n_out], agg]) via split-W1 -------------------
    h = _bdot(nf_reg, pn_w1n[...]) + _bdot(agg, pn_w1a[...]) + pn_b1[...]
    nl = _bdot(_silu(h), pn_w2[...]) + pn_b2[...]
    nl = _layer_norm(nl, pn_g[...], pn_bt[...])

    # Residual with the *embedded* node features (the PyTorch module reassigns
    # `node_features` to embed_node_fn's output before this add).
    nl = nl + nf_reg

    # ---- node_output_fn (no LayerNorm) ----------------------------------------
    node_out_ref[...] = mlp(nl, no_w1, no_b1, no_w2, no_b2)


# -----------------------------------------------------------------------------
# Wrapper
# -----------------------------------------------------------------------------
def _flatten_params(params):
    # Weight matrices go to the kernel as bf16 (MXU-native, half the VMEM);
    # biases / LayerNorm affine params stay f32 (added/scaled in f32).
    def w(x):
        return x.astype(jnp.bfloat16)

    ee, en = params["embed_edge"], params["embed_node"]
    pe, pn, no = params["proc_edge"], params["proc_node"], params["node_out"]
    return [
        w(ee["w1"]), ee["b1"], w(ee["w2"]), ee["b2"], ee["gamma"], ee["beta"],
        w(en["w1"]), en["b1"], w(en["w2"]), en["b2"], en["gamma"], en["beta"],
        w(pe["w1_e"]), w(pe["w1_s"]), w(pe["w1_r"]), pe["b1"], w(pe["w2"]),
        pe["b2"], pe["gamma"], pe["beta"],
        w(pn["w1_n"]), w(pn["w1_a"]), pn["b1"], w(pn["w2"]), pn["b2"],
        pn["gamma"], pn["beta"],
        w(no["w1"]), no["b1"], w(no["w2"]), no["b2"],
    ]


@functools.partial(jax.jit, static_argnames=("n_out",))
def encoder_forward(params, edge_idx, edge_features, node_features, n_out):
    E = edge_features.shape[0]
    N = node_features.shape[0]
    H = params["embed_node"]["w2"].shape[1]

    # Preconditions of this fully-VMEM-resident variant (see TODO in the
    # header for the tiled path):
    #  - sublane alignment so nf[:n_out] and all row blocks are free views;
    #  - senders < N and receivers < n_out (violations are silently dropped by
    #    the one-hot scatter, matching jnp's .at[].add "drop" semantics).
    assert E % 8 == 0 and N % 8 == 0 and n_out % 8 == 0, (
        "E, N, n_out must be multiples of 8 (sublane alignment); pad inputs.")

    # Index vectors in the layouts the one-hot builders need (so the kernel
    # never relayouts them).  They are int32 and tiny; the one-hot construction
    # needs a *vector* compare, hence VMEM rather than SMEM.
    snd = edge_idx[0].astype(jnp.int32).reshape(E, 1)
    rcv_col = edge_idx[1].astype(jnp.int32).reshape(E, 1)
    rcv_row = edge_idx[1].astype(jnp.int32).reshape(1, E)

    inputs = [edge_features.astype(jnp.float32),
              node_features.astype(jnp.float32),
              snd, rcv_col, rcv_row] + _flatten_params(params)

    # Explicit scoped-VMEM limit from the actual resident footprint
    # (v5e default is only 16 MiB; v7x physical VMEM is 64 MiB).
    in_bytes = sum(int(np.prod(x.shape)) * x.dtype.itemsize for x in inputs)
    out_bytes = 4 * H * (E + n_out + N)
    onehot_bytes = 2 * (E * N + 2 * E * n_out)          # bf16 one-hots
    act_bytes = 4 * H * (6 * E + 4 * N + 4 * n_out)     # f32 intermediates headroom
    vmem_limit = int(min(100 * 2 ** 20,
                         max(8 * 2 ** 20,
                             2 * (in_bytes + out_bytes + onehot_bytes + act_bytes))))

    vmem = pl.BlockSpec(memory_space=pltpu.MemorySpace.VMEM)
    out_shape = (
        jax.ShapeDtypeStruct((E, H), jnp.float32),      # edge latents
        jax.ShapeDtypeStruct((n_out, H), jnp.float32),  # node latents
        jax.ShapeDtypeStruct((N, H), jnp.float32),      # embedded node features
    )
    # Single invocation (no grid): whole graph + all weights resident in VMEM.
    return pl.pallas_call(
        _encoder_kernel,
        out_shape=out_shape,
        in_specs=[vmem] * len(inputs),
        out_specs=(vmem, vmem, vmem),
        compiler_params=pltpu.CompilerParams(vmem_limit_bytes=vmem_limit),
    )(*inputs)


# -----------------------------------------------------------------------------
# Parameter init (deterministic, mimics torch.nn.Linear default init; f32)
# -----------------------------------------------------------------------------
def _init_linear(key, fan_in, fan_out):
    kw, kb = jax.random.split(key)
    bound = 1.0 / np.sqrt(fan_in)
    w = jax.random.uniform(kw, (fan_in, fan_out), jnp.float32, -bound, bound)
    b = jax.random.uniform(kb, (1, fan_out), jnp.float32, -bound, bound)
    return w, b


def _init_ffb(key, sizes, use_ln):
    k1, k2 = jax.random.split(key)
    w1, b1 = _init_linear(k1, sizes[0], sizes[1])
    w2, b2 = _init_linear(k2, sizes[1], sizes[2])
    p = dict(w1=w1, b1=b1, w2=w2, b2=b2)
    if use_ln:
        p["gamma"] = jnp.ones((1, sizes[2]), jnp.float32)
        p["beta"] = jnp.zeros((1, sizes[2]), jnp.float32)
    return p


def init_encoder_params(key, input_dim_edge, input_dim_node, hidden_dim):
    h = hidden_dim
    ks = jax.random.split(key, 5)

    pe = _init_ffb(ks[2], [3 * h, h, h], use_ln=True)
    w1 = pe.pop("w1")                      # pre-split W1 for the concat-free kernel
    pe["w1_e"], pe["w1_s"], pe["w1_r"] = w1[:h], w1[h:2 * h], w1[2 * h:]

    pn = _init_ffb(ks[3], [2 * h, h, h], use_ln=True)
    w1 = pn.pop("w1")
    pn["w1_n"], pn["w1_a"] = w1[:h], w1[h:]

    return dict(
        embed_edge=_init_ffb(ks[0], [input_dim_edge, h, h], use_ln=True),
        embed_node=_init_ffb(ks[1], [input_dim_node, h, h], use_ln=True),
        proc_edge=pe,
        proc_node=pn,
        node_out=_init_ffb(ks[4], [h, h, h], use_ln=False),
    )


# -----------------------------------------------------------------------------
# Pure-JAX reference (PyTorch math path).  emulate_mxu_bf16=True reproduces the
# kernel's exact bf16 cast points (bf16 MXU inputs, f32 accumulate, f32
# elementwise) -> allows a tight structural comparison.  emulate_mxu_bf16=False
# computes everything in f32 with Precision.HIGHEST matmuls.
# -----------------------------------------------------------------------------
def encoder_reference(params, edge_idx, edge_features, node_features, n_out,
                      emulate_mxu_bf16=False):
    f32 = jnp.float32

    def mm(a, b):
        if emulate_mxu_bf16:
            return jnp.dot(a.astype(jnp.bfloat16), b.astype(jnp.bfloat16),
                           preferred_element_type=f32)
        return jnp.dot(a, b, preferred_element_type=f32,
                       precision=jax.lax.Precision.HIGHEST)

    def rnd(x):  # rounding applied to gather/scatter operands at the MXU boundary
        return x.astype(jnp.bfloat16).astype(f32) if emulate_mxu_bf16 else x

    def ffb(x, p, use_ln):
        h = mm(x, p["w1"]) + p["b1"]
        h = h * jax.nn.sigmoid(h)
        y = mm(h, p["w2"]) + p["b2"]
        if use_ln:
            mu = jnp.mean(y, axis=-1, keepdims=True)
            var = jnp.mean(jnp.square(y - mu), axis=-1, keepdims=True)
            y = (y - mu) * jax.lax.rsqrt(var + 1e-5) * p["gamma"] + p["beta"]
        return y

    pe = dict(params["proc_edge"])
    pe["w1"] = jnp.concatenate([pe.pop("w1_e"), pe.pop("w1_s"), pe.pop("w1_r")], axis=0)
    pn = dict(params["proc_node"])
    pn["w1"] = jnp.concatenate([pn.pop("w1_n"), pn.pop("w1_a")], axis=0)

    ef = ffb(edge_features.astype(f32), params["embed_edge"], True)
    nf = ffb(node_features.astype(f32), params["embed_node"], True)
    snd, rcv = edge_idx[0], edge_idx[1]

    nf_g = rnd(nf)
    edge_in = jnp.concatenate([ef, nf_g[snd], nf_g[rcv]], axis=-1)
    el = ffb(edge_in, pe, True)

    agg = jnp.zeros((n_out, el.shape[-1]), f32).at[rcv].add(rnd(el))
    node_in = jnp.concatenate([nf[:n_out], agg], axis=-1)
    nl = ffb(node_in, pn, True)
    nl = nl + nf[:n_out]
    nl = ffb(nl, params["node_out"], False)
    return el, nl, nf


# -----------------------------------------------------------------------------
if __name__ == "__main__":
    INPUT_DIM_EDGE = 4
    INPUT_DIM_NODE = 3
    HIDDEN = 128      # multiple of 128 -> lane-dense activations & outputs
    N_NODES = 64      # total input nodes
    N_OUT = 32        # regional (receiver) nodes -> first N_OUT nodes
    N_EDGES = 128

    root = jax.random.PRNGKey(0)
    k_par, k_ef, k_nf, k_s, k_r = jax.random.split(root, 5)

    params = init_encoder_params(k_par, INPUT_DIM_EDGE, INPUT_DIM_NODE, HIDDEN)

    edge_features = jax.random.normal(k_ef, (N_EDGES, INPUT_DIM_EDGE), jnp.float32)
    node_features = jax.random.normal(k_nf, (N_NODES, INPUT_DIM_NODE), jnp.float32)
    senders = jax.random.randint(k_s, (N_EDGES,), 0, N_NODES, jnp.int32)
    receivers = jax.random.randint(k_r, (N_EDGES,), 0, N_OUT, jnp.int32)
    edge_idx = jnp.stack([senders, receivers], axis=0)

    edge_latents, node_latents, nf_embedded = encoder_forward(
        params, edge_idx, edge_features, node_features, n_out=N_OUT)
    jax.block_until_ready((edge_latents, node_latents, nf_embedded))

    assert edge_latents.shape == (N_EDGES, HIDDEN)
    assert node_latents.shape == (N_OUT, HIDDEN)
    assert nf_embedded.shape == (N_NODES, HIDDEN)
    assert bool(jnp.all(jnp.isfinite(edge_latents)))
    assert bool(jnp.all(jnp.isfinite(node_latents)))
    assert bool(jnp.all(jnp.isfinite(nf_embedded)))

    # (1) Tight structural check against the matched-precision reference: same
    #     bf16 cast points as the kernel, so the only divergence is f32
    #     accumulation order, rare bf16 double-rounding and the EUP approximate
    #     reciprocal inside SiLU.  Any structural error (wrong gather / scatter
    #     / split-W1 / residual) is O(1) and trips this immediately.
    ref_el_b, ref_nl_b, ref_nf_b = encoder_reference(
        params, edge_idx, edge_features, node_features, N_OUT,
        emulate_mxu_bf16=True)
    for name, got, ref in (("edge", edge_latents, ref_el_b),
                           ("node", node_latents, ref_nl_b),
                           ("nf", nf_embedded, ref_nf_b)):
        err = float(jnp.max(jnp.abs(got - ref)))
        assert err < 2e-2, f"[bf16-matched ref] {name}: max abs error {err}"

    # (2) Sanity check against the exact-f32 (Precision.HIGHEST) PyTorch-math
    #     reference.  The bound covers bf16-input MXU rounding of weights and
    #     activations across five MLP blocks (LayerNorm keeps everything O(1)).
    ref_el, ref_nl, ref_nf = encoder_reference(
        params, edge_idx, edge_features, node_features, N_OUT,
        emulate_mxu_bf16=False)
    for name, got, ref in (("edge", edge_latents, ref_el),
                           ("node", node_latents, ref_nl),
                           ("nf", nf_embedded, ref_nf)):
        err = float(jnp.max(jnp.abs(got - ref)))
        assert err < 1e-1, f"[f32 ref] {name}: max abs error {err}"

    print("KERNEL_OK")
</pallas_src>

<mosaic_0001>
module attributes {stable_mosaic.version = 11 : i64} {
  func.func @_encoder_kernel(%arg0: memref<128x4xf32, #tpu.memory_space<vmem>>, %arg1: memref<64x3xf32, #tpu.memory_space<vmem>>, %arg2: memref<128x1xi32, #tpu.memory_space<vmem>>, %arg3: memref<128x1xi32, #tpu.memory_space<vmem>>, %arg4: memref<1x128xi32, #tpu.memory_space<vmem>>, %arg5: memref<4x128xbf16, #tpu.memory_space<vmem>>, %arg6: memref<1x128xf32, #tpu.memory_space<vmem>>, %arg7: memref<128x128xbf16, #tpu.memory_space<vmem>>, %arg8: memref<1x128xf32, #tpu.memory_space<vmem>>, %arg9: memref<1x128xf32, #tpu.memory_space<vmem>>, %arg10: memref<1x128xf32, #tpu.memory_space<vmem>>, %arg11: memref<3x128xbf16, #tpu.memory_space<vmem>>, %arg12: memref<1x128xf32, #tpu.memory_space<vmem>>, %arg13: memref<128x128xbf16, #tpu.memory_space<vmem>>, %arg14: memref<1x128xf32, #tpu.memory_space<vmem>>, %arg15: memref<1x128xf32, #tpu.memory_space<vmem>>, %arg16: memref<1x128xf32, #tpu.memory_space<vmem>>, %arg17: memref<128x128xbf16, #tpu.memory_space<vmem>>, %arg18: memref<128x128xbf16, #tpu.memory_space<vmem>>, %arg19: memref<128x128xbf16, #tpu.memory_space<vmem>>, %arg20: memref<1x128xf32, #tpu.memory_space<vmem>>, %arg21: memref<128x128xbf16, #tpu.memory_space<vmem>>, %arg22: memref<1x128xf32, #tpu.memory_space<vmem>>, %arg23: memref<1x128xf32, #tpu.memory_space<vmem>>, %arg24: memref<1x128xf32, #tpu.memory_space<vmem>>, %arg25: memref<128x128xbf16, #tpu.memory_space<vmem>>, %arg26: memref<128x128xbf16, #tpu.memory_space<vmem>>, %arg27: memref<1x128xf32, #tpu.memory_space<vmem>>, %arg28: memref<128x128xbf16, #tpu.memory_space<vmem>>, %arg29: memref<1x128xf32, #tpu.memory_space<vmem>>, %arg30: memref<1x128xf32, #tpu.memory_space<vmem>>, %arg31: memref<1x128xf32, #tpu.memory_space<vmem>>, %arg32: memref<128x128xbf16, #tpu.memory_space<vmem>>, %arg33: memref<1x128xf32, #tpu.memory_space<vmem>>, %arg34: memref<128x128xbf16, #tpu.memory_space<vmem>>, %arg35: memref<1x128xf32, #tpu.memory_space<vmem>>, %arg36: memref<128x128xf32, #tpu.memory_space<vmem>>, %arg37: memref<32x128xf32, #tpu.memory_space<vmem>>, %arg38: memref<64x128xf32, #tpu.memory_space<vmem>>) attributes {dimension_semantics = [], scalar_prefetch = 0 : i64, scratch_operands = 0 : i64, tpu.core_type = #tpu.core_type<tc>} {
    %c0 = arith.constant 0 : index
    %c0_0 = arith.constant 0 : index
    %0 = vector.load %arg0[%c0, %c0_0] : memref<128x4xf32, #tpu.memory_space<vmem>>, vector<128x4xf32>
    %c0_1 = arith.constant 0 : index
    %c0_2 = arith.constant 0 : index
    %1 = vector.load %arg5[%c0_1, %c0_2] : memref<4x128xbf16, #tpu.memory_space<vmem>>, vector<4x128xbf16>
    %2 = arith.truncf %0 : vector<128x4xf32> to vector<128x4xbf16>
    %cst = arith.constant dense<0.000000e+00> : vector<128x128xf32>
    %3 = tpu.matmul %2, %1, %cst {dimension_numbers = #tpu.dot_dimension_numbers<[1], [0], [0], [1], [0, 0, 1, 1], [], []>} : vector<128x4xbf16>, vector<4x128xbf16>, vector<128x128xf32> -> vector<128x128xf32>
    %c0_3 = arith.constant 0 : index
    %c0_4 = arith.constant 0 : index
    %4 = vector.load %arg6[%c0_3, %c0_4] : memref<1x128xf32, #tpu.memory_space<vmem>>, vector<1x128xf32>
    %5 = vector.broadcast %4 : vector<1x128xf32> to vector<128x128xf32>
    %6 = arith.addf %3, %5 : vector<128x128xf32>
    %cst_5 = arith.constant 0.000000e+00 : f32
    %7 = vector.broadcast %cst_5 : f32 to vector<128x128xf32>
    %8 = arith.subf %7, %6 : vector<128x128xf32>
    %9 = math.exp %8 : vector<128x128xf32>
    %cst_6 = arith.constant 1.000000e+00 : f32
    %10 = vector.broadcast %cst_6 : f32 to vector<128x128xf32>
    %11 = arith.addf %10, %9 : vector<128x128xf32>
    %12 = tpu.reciprocal %11 {approx = true} : vector<128x128xf32> -> vector<128x128xf32>
    %13 = arith.mulf %6, %12 : vector<128x128xf32>
    %c0_7 = arith.constant 0 : index
    %c0_8 = arith.constant 0 : index
    %14 = vector.load %arg7[%c0_7, %c0_8] : memref<128x128xbf16, #tpu.memory_space<vmem>>, vector<128x128xbf16>
    %15 = arith.truncf %13 : vector<128x128xf32> to vector<128x128xbf16>
    %cst_9 = arith.constant dense<0.000000e+00> : vector<128x128xf32>
    %16 = tpu.matmul %15, %14, %cst_9 {dimension_numbers = #tpu.dot_dimension_numbers<[1], [0], [0], [1], [0, 0, 1, 1], [], []>} : vector<128x128xbf16>, vector<128x128xbf16>, vector<128x128xf32> -> vector<128x128xf32>
    %c0_10 = arith.constant 0 : index
    %c0_11 = arith.constant 0 : index
    %17 = vector.load %arg8[%c0_10, %c0_11] : memref<1x128xf32, #tpu.memory_space<vmem>>, vector<1x128xf32>
    %18 = vector.broadcast %17 : vector<1x128xf32> to vector<128x128xf32>
    %19 = arith.addf %16, %18 : vector<128x128xf32>
    %c0_12 = arith.constant 0 : index
    %c0_13 = arith.constant 0 : index
    %20 = vector.load %arg9[%c0_12, %c0_13] : memref<1x128xf32, #tpu.memory_space<vmem>>, vector<1x128xf32>
    %c0_14 = arith.constant 0 : index
    %c0_15 = arith.constant 0 : index
    %21 = vector.load %arg10[%c0_14, %c0_15] : memref<1x128xf32, #tpu.memory_space<vmem>>, vector<1x128xf32>
    %cst_16 = arith.constant dense<0.000000e+00> : vector<128xf32>
    %22 = vector.multi_reduction <add>, %19, %cst_16 [1] : vector<128x128xf32> to vector<128xf32>
    %23 = vector.shape_cast %22 : vector<128xf32> to vector<128x1xf32>
    %cst_17 = arith.constant 1.280000e+02 : f32
    %24 = vector.broadcast %cst_17 : f32 to vector<128x1xf32>
    %25 = arith.divf %23, %24 : vector<128x1xf32>
    %26 = vector.broadcast %25 : vector<128x1xf32> to vector<128x128xf32>
    %27 = arith.subf %19, %26 : vector<128x128xf32>
    %28 = arith.mulf %27, %27 : vector<128x128xf32>
    %cst_18 = arith.constant dense<0.000000e+00> : vector<128xf32>
    %29 = vector.multi_reduction <add>, %28, %cst_18 [1] : vector<128x128xf32> to vector<128xf32>
    %30 = vector.shape_cast %29 : vector<128xf32> to vector<128x1xf32>
    %cst_19 = arith.constant 1.280000e+02 : f32
    %31 = vector.broadcast %cst_19 : f32 to vector<128x1xf32>
    %32 = arith.divf %30, %31 : vector<128x1xf32>
    %33 = vector.broadcast %25 : vector<128x1xf32> to vector<128x128xf32>
    %34 = arith.subf %19, %33 : vector<128x128xf32>
    %cst_20 = arith.constant 9.99999974E-6 : f32
    %35 = vector.broadcast %cst_20 : f32 to vector<128x1xf32>
    %36 = arith.addf %32, %35 : vector<128x1xf32>
    %37 = math.rsqrt %36 : vector<128x1xf32>
    %38 = vector.broadcast %37 : vector<128x1xf32> to vector<128x128xf32>
    %39 = arith.mulf %34, %38 : vector<128x128xf32>
    %40 = vector.broadcast %20 : vector<1x128xf32> to vector<128x128xf32>
    %41 = arith.mulf %39, %40 : vector<128x128xf32>
    %42 = vector.broadcast %21 : vector<1x128xf32> to vector<128x128xf32>
    %43 = arith.addf %41, %42 : vector<128x128xf32>
    %c0_21 = arith.constant 0 : index
    %c0_22 = arith.constant 0 : index
    %44 = vector.load %arg1[%c0_21, %c0_22] : memref<64x3xf32, #tpu.memory_space<vmem>>, vector<64x3xf32>
    %c0_23 = arith.constant 0 : index
    %c0_24 = arith.constant 0 : index
    %45 = vector.load %arg11[%c0_23, %c0_24] : memref<3x128xbf16, #tpu.memory_space<vmem>>, vector<3x128xbf16>
    %46 = arith.truncf %44 : vector<64x3xf32> to vector<64x3xbf16>
    %cst_25 = arith.constant dense<0.000000e+00> : vector<64x128xf32>
    %47 = tpu.matmul %46, %45, %cst_25 {dimension_numbers = #tpu.dot_dimension_numbers<[1], [0], [0], [1], [0, 0, 1, 1], [], []>} : vector<64x3xbf16>, vector<3x128xbf16>, vector<64x128xf32> -> vector<64x128xf32>
    %c0_26 = arith.constant 0 : index
    %c0_27 = arith.constant 0 : index
    %48 = vector.load %arg12[%c0_26, %c0_27] : memref<1x128xf32, #tpu.memory_space<vmem>>, vector<1x128xf32>
    %49 = vector.broadcast %48 : vector<1x128xf32> to vector<64x128xf32>
    %50 = arith.addf %47, %49 : vector<64x128xf32>
    %cst_28 = arith.constant 0.000000e+00 : f32
    %51 = vector.broadcast %cst_28 : f32 to vector<64x128xf32>
    %52 = arith.subf %51, %50 : vector<64x128xf32>
    %53 = math.exp %52 : vector<64x128xf32>
    %cst_29 = arith.constant 1.000000e+00 : f32
    %54 = vector.broadcast %cst_29 : f32 to vector<64x128xf32>
    %55 = arith.addf %54, %53 : vector<64x128xf32>
    %56 = tpu.reciprocal %55 {approx = true} : vector<64x128xf32> -> vector<64x128xf32>
    %57 = arith.mulf %50, %56 : vector<64x128xf32>
    %c0_30 = arith.constant 0 : index
    %c0_31 = arith.constant 0 : index
    %58 = vector.load %arg13[%c0_30, %c0_31] : memref<128x128xbf16, #tpu.memory_space<vmem>>, vector<128x128xbf16>
    %59 = arith.truncf %57 : vector<64x128xf32> to vector<64x128xbf16>
    %cst_32 = arith.constant dense<0.000000e+00> : vector<64x128xf32>
    %60 = tpu.matmul %59, %58, %cst_32 {dimension_numbers = #tpu.dot_dimension_numbers<[1], [0], [0], [1], [0, 0, 1, 1], [], []>} : vector<64x128xbf16>, vector<128x128xbf16>, vector<64x128xf32> -> vector<64x128xf32>
    %c0_33 = arith.constant 0 : index
    %c0_34 = arith.constant 0 : index
    %61 = vector.load %arg14[%c0_33, %c0_34] : memref<1x128xf32, #tpu.memory_space<vmem>>, vector<1x128xf32>
    %62 = vector.broadcast %61 : vector<1x128xf32> to vector<64x128xf32>
    %63 = arith.addf %60, %62 : vector<64x128xf32>
    %c0_35 = arith.constant 0 : index
    %c0_36 = arith.constant 0 : index
    %64 = vector.load %arg15[%c0_35, %c0_36] : memref<1x128xf32, #tpu.memory_space<vmem>>, vector<1x128xf32>
    %c0_37 = arith.constant 0 : index
    %c0_38 = arith.constant 0 : index
    %65 = vector.load %arg16[%c0_37, %c0_38] : memref<1x128xf32, #tpu.memory_space<vmem>>, vector<1x128xf32>
    %cst_39 = arith.constant dense<0.000000e+00> : vector<64xf32>
    %66 = vector.multi_reduction <add>, %63, %cst_39 [1] : vector<64x128xf32> to vector<64xf32>
    %67 = vector.shape_cast %66 : vector<64xf32> to vector<64x1xf32>
    %cst_40 = arith.constant 1.280000e+02 : f32
    %68 = vector.broadcast %cst_40 : f32 to vector<64x1xf32>
    %69 = arith.divf %67, %68 : vector<64x1xf32>
    %70 = vector.broadcast %69 : vector<64x1xf32> to vector<64x128xf32>
    %71 = arith.subf %63, %70 : vector<64x128xf32>
    %72 = arith.mulf %71, %71 : vector<64x128xf32>
    %cst_41 = arith.constant dense<0.000000e+00> : vector<64xf32>
    %73 = vector.multi_reduction <add>, %72, %cst_41 [1] : vector<64x128xf32> to vector<64xf32>
    %74 = vector.shape_cast %73 : vector<64xf32> to vector<64x1xf32>
    %cst_42 = arith.constant 1.280000e+02 : f32
    %75 = vector.broadcast %cst_42 : f32 to vector<64x1xf32>
    %76 = arith.divf %74, %75 : vector<64x1xf32>
    %77 = vector.broadcast %69 : vector<64x1xf32> to vector<64x128xf32>
    %78 = arith.subf %63, %77 : vector<64x128xf32>
    %cst_43 = arith.constant 9.99999974E-6 : f32
    %79 = vector.broadcast %cst_43 : f32 to vector<64x1xf32>
    %80 = arith.addf %76, %79 : vector<64x1xf32>
    %81 = math.rsqrt %80 : vector<64x1xf32>
    %82 = vector.broadcast %81 : vector<64x1xf32> to vector<64x128xf32>
    %83 = arith.mulf %78, %82 : vector<64x128xf32>
    %84 = vector.broadcast %64 : vector<1x128xf32> to vector<64x128xf32>
    %85 = arith.mulf %83, %84 : vector<64x128xf32>
    %86 = vector.broadcast %65 : vector<1x128xf32> to vector<64x128xf32>
    %87 = arith.addf %85, %86 : vector<64x128xf32>
    %c0_44 = arith.constant 0 : index
    %c0_45 = arith.constant 0 : index
    %88 = vector.load %arg38[%c0_44, %c0_45] : memref<64x128xf32, #tpu.memory_space<vmem>>, vector<64x128xf32>
    tpu.vector_store %arg38[%c0_44, %c0_45], %87 {strides = array<i32>} : memref<64x128xf32, #tpu.memory_space<vmem>>, vector<64x128xf32>,
    %89 = vector.extract_strided_slice %87 {offsets = [0, 0], sizes = [32, 128], strides = [1, 1]} : vector<64x128xf32> to vector<32x128xf32>
    %90 = tpu.iota {dimensions = array<i32: 1>} : vector<128x64xi32>
    %91 = tpu.iota {dimensions = array<i32: 1>} : vector<128x32xi32>
    %92 = tpu.iota {dimensions = array<i32: 0>} : vector<32x128xi32>
    %c0_46 = arith.constant 0 : index
    %c0_47 = arith.constant 0 : index
    %93 = vector.load %arg2[%c0_46, %c0_47] : memref<128x1xi32, #tpu.memory_space<vmem>>, vector<128x1xi32>
    %94 = vector.broadcast %93 : vector<128x1xi32> to vector<128x64xi32>
    %95 = arith.cmpi eq, %94, %90 : vector<128x64xi32>
    %cst_48 = arith.constant 1.000000e+00 : f32
    %cst_49 = arith.constant 0.000000e+00 : f32
    %96 = vector.broadcast %cst_48 : f32 to vector<128x64xf32>
    %97 = vector.broadcast %cst_49 : f32 to vector<128x64xf32>
    %98 = arith.select %95, %96, %97 : vector<128x64xi1>, vector<128x64xf32>
    %99 = arith.truncf %98 : vector<128x64xf32> to vector<128x64xbf16>
    %c0_50 = arith.constant 0 : index
    %c0_51 = arith.constant 0 : index
    %100 = vector.load %arg3[%c0_50, %c0_51] : memref<128x1xi32, #tpu.memory_space<vmem>>, vector<128x1xi32>
    %101 = vector.broadcast %100 : vector<128x1xi32> to vector<128x32xi32>
    %102 = arith.cmpi eq, %101, %91 : vector<128x32xi32>
    %cst_52 = arith.constant 1.000000e+00 : f32
    %cst_53 = arith.constant 0.000000e+00 : f32
    %103 = vector.broadcast %cst_52 : f32 to vector<128x32xf32>
    %104 = vector.broadcast %cst_53 : f32 to vector<128x32xf32>
    %105 = arith.select %102, %103, %104 : vector<128x32xi1>, vector<128x32xf32>
    %106 = arith.truncf %105 : vector<128x32xf32> to vector<128x32xbf16>
    %c0_54 = arith.constant 0 : index
    %c0_55 = arith.constant 0 : index
    %107 = vector.load %arg4[%c0_54, %c0_55] : memref<1x128xi32, #tpu.memory_space<vmem>>, vector<1x128xi32>
    %108 = vector.broadcast %107 : vector<1x128xi32> to vector<32x128xi32>
    %109 = arith.cmpi eq, %92, %108 : vector<32x128xi32>
    %cst_56 = arith.constant 1.000000e+00 : f32
    %cst_57 = arith.constant 0.000000e+00 : f32
    %110 = vector.broadcast %cst_56 : f32 to vector<32x128xf32>
    %111 = vector.broadcast %cst_57 : f32 to vector<32x128xf32>
    %112 = arith.select %109, %110, %111 : vector<32x128xi1>, vector<32x128xf32>
    %113 = arith.truncf %112 : vector<32x128xf32> to vector<32x128xbf16>
    %114 = arith.truncf %87 : vector<64x128xf32> to vector<64x128xbf16>
    %cst_58 = arith.constant dense<0.000000e+00> : vector<128x128xf32>
    %115 = tpu.matmul %99, %114, %cst_58 {dimension_numbers = #tpu.dot_dimension_numbers<[1], [0], [0], [1], [0, 0, 1, 1], [], []>} : vector<128x64xbf16>, vector<64x128xbf16>, vector<128x128xf32> -> vector<128x128xf32>
    %116 = arith.truncf %89 : vector<32x128xf32> to vector<32x128xbf16>
    %cst_59 = arith.constant dense<0.000000e+00> : vector<128x128xf32>
    %117 = tpu.matmul %106, %116, %cst_59 {dimension_numbers = #tpu.dot_dimension_numbers<[1], [0], [0], [1], [0, 0, 1, 1], [], []>} : vector<128x32xbf16>, vector<32x128xbf16>, vector<128x128xf32> -> vector<128x128xf32>
    %c0_60 = arith.constant 0 : index
    %c0_61 = arith.constant 0 : index
    %118 = vector.load %arg17[%c0_60, %c0_61] : memref<128x128xbf16, #tpu.memory_space<vmem>>, vector<128x128xbf16>
    %119 = arith.truncf %43 : vector<128x128xf32> to vector<128x128xbf16>
    %cst_62 = arith.constant dense<0.000000e+00> : vector<128x128xf32>
    %120 = tpu.matmul %119, %118, %cst_62 {dimension_numbers = #tpu.dot_dimension_numbers<[1], [0], [0], [1], [0, 0, 1, 1], [], []>} : vector<128x128xbf16>, vector<128x128xbf16>, vector<128x128xf32> -> vector<128x128xf32>
    %c0_63 = arith.constant 0 : index
    %c0_64 = arith.constant 0 : index
    %121 = vector.load %arg18[%c0_63, %c0_64] : memref<128x128xbf16, #tpu.memory_space<vmem>>, vector<128x128xbf16>
    %122 = arith.truncf %115 : vector<128x128xf32> to vector<128x128xbf16>
    %cst_65 = arith.constant dense<0.000000e+00> : vector<128x128xf32>
    %123 = tpu.matmul %122, %121, %cst_65 {dimension_numbers = #tpu.dot_dimension_numbers<[1], [0], [0], [1], [0, 0, 1, 1], [], []>} : vector<128x128xbf16>, vector<128x128xbf16>, vector<128x128xf32> -> vector<128x128xf32>
    %124 = arith.addf %120, %123 : vector<128x128xf32>
    %c0_66 = arith.constant 0 : index
    %c0_67 = arith.constant 0 : index
    %125 = vector.load %arg19[%c0_66, %c0_67] : memref<128x128xbf16, #tpu.memory_space<vmem>>, vector<128x128xbf16>
    %126 = arith.truncf %117 : vector<128x128xf32> to vector<128x128xbf16>
    %cst_68 = arith.constant dense<0.000000e+00> : vector<128x128xf32>
    %127 = tpu.matmul %126, %125, %cst_68 {dimension_numbers = #tpu.dot_dimension_numbers<[1], [0], [0], [1], [0, 0, 1, 1], [], []>} : vector<128x128xbf16>, vector<128x128xbf16>, vector<128x128xf32> -> vector<128x128xf32>
    %128 = arith.addf %124, %127 : vector<128x128xf32>
    %c0_69 = arith.constant 0 : index
    %c0_70 = arith.constant 0 : index
    %129 = vector.load %arg20[%c0_69, %c0_70] : memref<1x128xf32, #tpu.memory_space<vmem>>, vector<1x128xf32>
    %130 = vector.broadcast %129 : vector<1x128xf32> to vector<128x128xf32>
    %131 = arith.addf %128, %130 : vector<128x128xf32>
    %cst_71 = arith.constant 0.000000e+00 : f32
    %132 = vector.broadcast %cst_71 : f32 to vector<128x128xf32>
    %133 = arith.subf %132, %131 : vector<128x128xf32>
    %134 = math.exp %133 : vector<128x128xf32>
    %cst_72 = arith.constant 1.000000e+00 : f32
    %135 = vector.broadcast %cst_72 : f32 to vector<128x128xf32>
    %136 = arith.addf %135, %134 : vector<128x128xf32>
    %137 = tpu.reciprocal %136 {approx = true} : vector<128x128xf32> -> vector<128x128xf32>
    %138 = arith.mulf %131, %137 : vector<128x128xf32>
    %c0_73 = arith.constant 0 : index
    %c0_74 = arith.constant 0 : index
    %139 = vector.load %arg21[%c0_73, %c0_74] : memref<128x128xbf16, #tpu.memory_space<vmem>>, vector<128x128xbf16>
    %140 = arith.truncf %138 : vector<128x128xf32> to vector<128x128xbf16>
    %cst_75 = arith.constant dense<0.000000e+00> : vector<128x128xf32>
    %141 = tpu.matmul %140, %139, %cst_75 {dimension_numbers = #tpu.dot_dimension_numbers<[1], [0], [0], [1], [0, 0, 1, 1], [], []>} : vector<128x128xbf16>, vector<128x128xbf16>, vector<128x128xf32> -> vector<128x128xf32>
    %c0_76 = arith.constant 0 : index
    %c0_77 = arith.constant 0 : index
    %142 = vector.load %arg22[%c0_76, %c0_77] : memref<1x128xf32, #tpu.memory_space<vmem>>, vector<1x128xf32>
    %143 = vector.broadcast %142 : vector<1x128xf32> to vector<128x128xf32>
    %144 = arith.addf %141, %143 : vector<128x128xf32>
    %c0_78 = arith.constant 0 : index
    %c0_79 = arith.constant 0 : index
    %145 = vector.load %arg23[%c0_78, %c0_79] : memref<1x128xf32, #tpu.memory_space<vmem>>, vector<1x128xf32>
    %c0_80 = arith.constant 0 : index
    %c0_81 = arith.constant 0 : index
    %146 = vector.load %arg24[%c0_80, %c0_81] : memref<1x128xf32, #tpu.memory_space<vmem>>, vector<1x128xf32>
    %cst_82 = arith.constant dense<0.000000e+00> : vector<128xf32>
    %147 = vector.multi_reduction <add>, %144, %cst_82 [1] : vector<128x128xf32> to vector<128xf32>
    %148 = vector.shape_cast %147 : vector<128xf32> to vector<128x1xf32>
    %cst_83 = arith.constant 1.280000e+02 : f32
    %149 = vector.broadcast %cst_83 : f32 to vector<128x1xf32>
    %150 = arith.divf %148, %149 : vector<128x1xf32>
    %151 = vector.broadcast %150 : vector<128x1xf32> to vector<128x128xf32>
    %152 = arith.subf %144, %151 : vector<128x128xf32>
    %153 = arith.mulf %152, %152 : vector<128x128xf32>
    %cst_84 = arith.constant dense<0.000000e+00> : vector<128xf32>
    %154 = vector.multi_reduction <add>, %153, %cst_84 [1] : vector<128x128xf32> to vector<128xf32>
    %155 = vector.shape_cast %154 : vector<128xf32> to vector<128x1xf32>
    %cst_85 = arith.constant 1.280000e+02 : f32
    %156 = vector.broadcast %cst_85 : f32 to vector<128x1xf32>
    %157 = arith.divf %155, %156 : vector<128x1xf32>
    %158 = vector.broadcast %150 : vector<128x1xf32> to vector<128x128xf32>
    %159 = arith.subf %144, %158 : vector<128x128xf32>
    %cst_86 = arith.constant 9.99999974E-6 : f32
    %160 = vector.broadcast %cst_86 : f32 to vector<128x1xf32>
    %161 = arith.addf %157, %160 : vector<128x1xf32>
    %162 = math.rsqrt %161 : vector<128x1xf32>
    %163 = vector.broadcast %162 : vector<128x1xf32> to vector<128x128xf32>
    %164 = arith.mulf %159, %163 : vector<128x128xf32>
    %165 = vector.broadcast %145 : vector<1x128xf32> to vector<128x128xf32>
    %166 = arith.mulf %164, %165 : vector<128x128xf32>
    %167 = vector.broadcast %146 : vector<1x128xf32> to vector<128x128xf32>
    %168 = arith.addf %166, %167 : vector<128x128xf32>
    %c0_87 = arith.constant 0 : index
    %c0_88 = arith.constant 0 : index
    %169 = vector.load %arg36[%c0_87, %c0_88] : memref<128x128xf32, #tpu.memory_space<vmem>>, vector<128x128xf32>
    tpu.vector_store %arg36[%c0_87, %c0_88], %168 {strides = array<i32>} : memref<128x128xf32, #tpu.memory_space<vmem>>, vector<128x128xf32>,
    %170 = arith.truncf %168 : vector<128x128xf32> to vector<128x128xbf16>
    %cst_89 = arith.constant dense<0.000000e+00> : vector<32x128xf32>
    %171 = tpu.matmul %113, %170, %cst_89 {dimension_numbers = #tpu.dot_dimension_numbers<[1], [0], [0], [1], [0, 0, 1, 1], [], []>} : vector<32x128xbf16>, vector<128x128xbf16>, vector<32x128xf32> -> vector<32x128xf32>
    %c0_90 = arith.constant 0 : index
    %c0_91 = arith.constant 0 : index
    %172 = vector.load %arg25[%c0_90, %c0_91] : memref<128x128xbf16, #tpu.memory_space<vmem>>, vector<128x128xbf16>
    %173 = arith.truncf %89 : vector<32x128xf32> to vector<32x128xbf16>
    %cst_92 = arith.constant dense<0.000000e+00> : vector<32x128xf32>
    %174 = tpu.matmul %173, %172, %cst_92 {dimension_numbers = #tpu.dot_dimension_numbers<[1], [0], [0], [1], [0, 0, 1, 1], [], []>} : vector<32x128xbf16>, vector<128x128xbf16>, vector<32x128xf32> -> vector<32x128xf32>
    %c0_93 = arith.constant 0 : index
    %c0_94 = arith.constant 0 : index
    %175 = vector.load %arg26[%c0_93, %c0_94] : memref<128x128xbf16, #tpu.memory_space<vmem>>, vector<128x128xbf16>
    %176 = arith.truncf %171 : vector<32x128xf32> to vector<32x128xbf16>
    %cst_95 = arith.constant dense<0.000000e+00> : vector<32x128xf32>
    %177 = tpu.matmul %176, %175, %cst_95 {dimension_numbers = #tpu.dot_dimension_numbers<[1], [0], [0], [1], [0, 0, 1, 1], [], []>} : vector<32x128xbf16>, vector<128x128xbf16>, vector<32x128xf32> -> vector<32x128xf32>
    %178 = arith.addf %174, %177 : vector<32x128xf32>
    %c0_96 = arith.constant 0 : index
    %c0_97 = arith.constant 0 : index
    %179 = vector.load %arg27[%c0_96, %c0_97] : memref<1x128xf32, #tpu.memory_space<vmem>>, vector<1x128xf32>
    %180 = vector.broadcast %179 : vector<1x128xf32> to vector<32x128xf32>
    %181 = arith.addf %178, %180 : vector<32x128xf32>
    %cst_98 = arith.constant 0.000000e+00 : f32
    %182 = vector.broadcast %cst_98 : f32 to vector<32x128xf32>
    %183 = arith.subf %182, %181 : vector<32x128xf32>
    %184 = math.exp %183 : vector<32x128xf32>
    %cst_99 = arith.constant 1.000000e+00 : f32
    %185 = vector.broadcast %cst_99 : f32 to vector<32x128xf32>
    %186 = arith.addf %185, %184 : vector<32x128xf32>
    %187 = tpu.reciprocal %186 {approx = true} : vector<32x128xf32> -> vector<32x128xf32>
    %188 = arith.mulf %181, %187 : vector<32x128xf32>
    %c0_100 = arith.constant 0 : index
    %c0_101 = arith.constant 0 : index
    %189 = vector.load %arg28[%c0_100, %c0_101] : memref<128x128xbf16, #tpu.memory_space<vmem>>, vector<128x128xbf16>
    %190 = arith.truncf %188 : vector<32x128xf32> to vector<32x128xbf16>
    %cst_102 = arith.constant dense<0.000000e+00> : vector<32x128xf32>
    %191 = tpu.matmul %190, %189, %cst_102 {dimension_numbers = #tpu.dot_dimension_numbers<[1], [0], [0], [1], [0, 0, 1, 1], [], []>} : vector<32x128xbf16>, vector<128x128xbf16>, vector<32x128xf32> -> vector<32x128xf32>
    %c0_103 = arith.constant 0 : index
    %c0_104 = arith.constant 0 : index
    %192 = vector.load %arg29[%c0_103, %c0_104] : memref<1x128xf32, #tpu.memory_space<vmem>>, vector<1x128xf32>
    %193 = vector.broadcast %192 : vector<1x128xf32> to vector<32x128xf32>
    %194 = arith.addf %191, %193 : vector<32x128xf32>
    %c0_105 = arith.constant 0 : index
    %c0_106 = arith.constant 0 : index
    %195 = vector.load %arg30[%c0_105, %c0_106] : memref<1x128xf32, #tpu.memory_space<vmem>>, vector<1x128xf32>
    %c0_107 = arith.constant 0 : index
    %c0_108 = arith.constant 0 : index
    %196 = vector.load %arg31[%c0_107, %c0_108] : memref<1x128xf32, #tpu.memory_space<vmem>>, vector<1x128xf32>
    %cst_109 = arith.constant dense<0.000000e+00> : vector<32xf32>
    %197 = vector.multi_reduction <add>, %194, %cst_109 [1] : vector<32x128xf32> to vector<32xf32>
    %198 = vector.shape_cast %197 : vector<32xf32> to vector<32x1xf32>
    %cst_110 = arith.constant 1.280000e+02 : f32
    %199 = vector.broadcast %cst_110 : f32 to vector<32x1xf32>
    %200 = arith.divf %198, %199 : vector<32x1xf32>
    %201 = vector.broadcast %200 : vector<32x1xf32> to vector<32x128xf32>
    %202 = arith.subf %194, %201 : vector<32x128xf32>
    %203 = arith.mulf %202, %202 : vector<32x128xf32>
    %cst_111 = arith.constant dense<0.000000e+00> : vector<32xf32>
    %204 = vector.multi_reduction <add>, %203, %cst_111 [1] : vector<32x128xf32> to vector<32xf32>
    %205 = vector.shape_cast %204 : vector<32xf32> to vector<32x1xf32>
    %cst_112 = arith.constant 1.280000e+02 : f32
    %206 = vector.broadcast %cst_112 : f32 to vector<32x1xf32>
    %207 = arith.divf %205, %206 : vector<32x1xf32>
    %208 = vector.broadcast %200 : vector<32x1xf32> to vector<32x128xf32>
    %209 = arith.subf %194, %208 : vector<32x128xf32>
    %cst_113 = arith.constant 9.99999974E-6 : f32
    %210 = vector.broadcast %cst_113 : f32 to vector<32x1xf32>
    %211 = arith.addf %207, %210 : vector<32x1xf32>
    %212 = math.rsqrt %211 : vector<32x1xf32>
    %213 = vector.broadcast %212 : vector<32x1xf32> to vector<32x128xf32>
    %214 = arith.mulf %209, %213 : vector<32x128xf32>
    %215 = vector.broadcast %195 : vector<1x128xf32> to vector<32x128xf32>
    %216 = arith.mulf %214, %215 : vector<32x128xf32>
    %217 = vector.broadcast %196 : vector<1x128xf32> to vector<32x128xf32>
    %218 = arith.addf %216, %217 : vector<32x128xf32>
    %219 = arith.addf %218, %89 : vector<32x128xf32>
    %c0_114 = arith.constant 0 : index
    %c0_115 = arith.constant 0 : index
    %220 = vector.load %arg32[%c0_114, %c0_115] : memref<128x128xbf16, #tpu.memory_space<vmem>>, vector<128x128xbf16>
    %221 = arith.truncf %219 : vector<32x128xf32> to vector<32x128xbf16>
    %cst_116 = arith.constant dense<0.000000e+00> : vector<32x128xf32>
    %222 = tpu.matmul %221, %220, %cst_116 {dimension_numbers = #tpu.dot_dimension_numbers<[1], [0], [0], [1], [0, 0, 1, 1], [], []>} : vector<32x128xbf16>, vector<128x128xbf16>, vector<32x128xf32> -> vector<32x128xf32>
    %c0_117 = arith.constant 0 : index
    %c0_118 = arith.constant 0 : index
    %223 = vector.load %arg33[%c0_117, %c0_118] : memref<1x128xf32, #tpu.memory_space<vmem>>, vector<1x128xf32>
    %224 = vector.broadcast %223 : vector<1x128xf32> to vector<32x128xf32>
    %225 = arith.addf %222, %224 : vector<32x128xf32>
    %cst_119 = arith.constant 0.000000e+00 : f32
    %226 = vector.broadcast %cst_119 : f32 to vector<32x128xf32>
    %227 = arith.subf %226, %225 : vector<32x128xf32>
    %228 = math.exp %227 : vector<32x128xf32>
    %cst_120 = arith.constant 1.000000e+00 : f32
    %229 = vector.broadcast %cst_120 : f32 to vector<32x128xf32>
    %230 = arith.addf %229, %228 : vector<32x128xf32>
    %231 = tpu.reciprocal %230 {approx = true} : vector<32x128xf32> -> vector<32x128xf32>
    %232 = arith.mulf %225, %231 : vector<32x128xf32>
    %c0_121 = arith.constant 0 : index
    %c0_122 = arith.constant 0 : index
    %233 = vector.load %arg34[%c0_121, %c0_122] : memref<128x128xbf16, #tpu.memory_space<vmem>>, vector<128x128xbf16>
    %234 = arith.truncf %232 : vector<32x128xf32> to vector<32x128xbf16>
    %cst_123 = arith.constant dense<0.000000e+00> : vector<32x128xf32>
    %235 = tpu.matmul %234, %233, %cst_123 {dimension_numbers = #tpu.dot_dimension_numbers<[1], [0], [0], [1], [0, 0, 1, 1], [], []>} : vector<32x128xbf16>, vector<128x128xbf16>, vector<32x128xf32> -> vector<32x128xf32>
    %c0_124 = arith.constant 0 : index
    %c0_125 = arith.constant 0 : index
    %236 = vector.load %arg35[%c0_124, %c0_125] : memref<1x128xf32, #tpu.memory_space<vmem>>, vector<1x128xf32>
    %237 = vector.broadcast %236 : vector<1x128xf32> to vector<32x128xf32>
    %238 = arith.addf %235, %237 : vector<32x128xf32>
    %c0_126 = arith.constant 0 : index
    %c0_127 = arith.constant 0 : index
    %239 = vector.load %arg37[%c0_126, %c0_127] : memref<32x128xf32, #tpu.memory_space<vmem>>, vector<32x128xf32>
    tpu.vector_store %arg37[%c0_126, %c0_127], %238 {strides = array<i32>} : memref<32x128xf32, #tpu.memory_space<vmem>>, vector<32x128xf32>,
    return
  }
}

</mosaic_0001>

<bundles_post_ra>
// kernel: encoder_forward.1
= control target key start
LH: loop header
LB: loop body
LE: loop exit
PB: predicated region body
PF: predicated region fallthrough
CT: control target
= control target key end

     0   :  { %s4821_s6 = smov 1   ;;  %s4822_s10 = smov 2   ;;  %s6104_s0 = inlined_call_operand.smem [shape: u32[39], index: -1, kind: input, shape index: {}] }
   0x1   :  { %s4876_s5 = sld [smem:[%s6104_s0]]   ;;  %s4823_s14 = smov 3  }
   0x2   :  { %s4881_s9 = sld [smem:[%s6104_s0 + %s4821_s6]]   ;;  %s4824_s18 = smov 4  }
   0x3   :  { %s4886_s13 = sld [smem:[%s6104_s0 + %s4822_s10]]   ;;  %s4825_s22 = smov 5  }
   0x4   :  { %s4891_s17 = sld [smem:[%s6104_s0 + %s4823_s14]]   ;;  %s4826_s26 = smov 6  }
   0x5   :  { %s4896_s21 = sld [smem:[%s6104_s0 + %s4824_s18]]   ;;  %s4827_s30 = smov 7  }
   0x6   :  { %s4901_s25 = sld [smem:[%s6104_s0 + %s4825_s22]]   ;;  %s4828_s4 = smov 8  }
   0x7   :  { %s4906_s29 = sld [smem:[%s6104_s0 + %s4826_s26]]   ;;  %s4829_s10 = smov 9  }
   0x8   :  { %s4911_s3 = sld [smem:[%s6104_s0 + %s4827_s30]]   ;;  %s4830_s15 = smov 10  }
   0x9   :  { %s4916_s8 = sld [smem:[%s6104_s0 + %s4828_s4]]   ;;  %s4831_s20 = smov 11  }
   0xa   :  { %s4921_s14 = sld [smem:[%s6104_s0 + %s4829_s10]]   ;;  %s4832_s26 = smov 12  }
   0xb   :  { %6114 = sst [smem:[#allocation9_spill]] %s4896_s21  ;;  %s4833_s1 = smov 13  }
   0xc   :  { %s4926_s19 = sld [smem:[%s6104_s0 + %s4830_s15]]   ;;  %s4834_s7 = smov 14  }
   0xd   :  { %s4931_s24 = sld [smem:[%s6104_s0 + %s4831_s20]]   ;;  %s4835_s15 = smov 15  }
   0xe   :  { %s4936_s30 = sld [smem:[%s6104_s0 + %s4832_s26]]   ;;  %s4836_s22 = smov 16  }
   0xf   :  { %s4941_s6 = sld [smem:[%s6104_s0 + %s4833_s1]]   ;;  %s4837_s28 = smov 17  }
  0x10   :  { %6115 = sst [smem:[#allocation10_spill]] %s4921_s14 }
  0x11   :  { %s4946_s12 = sld [smem:[%s6104_s0 + %s4834_s7]]   ;;  %s4838_s7 = smov 18  }
  0x12   :  { %6116 = sst [smem:[#allocation11_spill]] %s4926_s19 }
  0x13   :  { %s4951_s20 = sld [smem:[%s6104_s0 + %s4835_s15]]   ;;  %s4839_s15 = smov 19  }
  0x14   :  { %s4956_s27 = sld [smem:[%s6104_s0 + %s4836_s22]]   ;;  %s4840_s22 = smov 20  }
  0x15   :  { %s4961_s4 = sld [smem:[%s6104_s0 + %s4837_s28]]   ;;  %s4841_s28 = smov 21  }
  0x16   :  { %s4966_s21 = sld [smem:[%s6104_s0 + %s4838_s7]]   ;;  %s4842_s7 = smov 22  }
  0x17   :  { %s4971_s19 = sld [smem:[%s6104_s0 + %s4839_s15]]   ;;  %s4843_s15 = smov 23  }
  0x18   :  { %s4976_s14 = sld [smem:[%s6104_s0 + %s4840_s22]]   ;;  %s4844_s22 = smov 24  }
  0x1b   :  { %6117 = sst [smem:[#allocation12_spill]] %s4961_s4 }
  0x1c   :  { %6118 = sst [smem:[#allocation13_spill]] %s4966_s21 }
  0x1d   :  { %6119 = sst [smem:[#allocation14_spill]] %s4971_s19 }
  0x1e   :  { %6120 = sst [smem:[#allocation15_spill]] %s4976_s14 }
  0x1f   :  { %s4981_s4 = sld [smem:[%s6104_s0 + %s4841_s28]]   ;;  %s4845_s28 = smov 25  }
  0x20   :  { %s4986_s21 = sld [smem:[%s6104_s0 + %s4842_s7]]   ;;  %s4846_s7 = smov 26  }
  0x21   :  { %s4991_s19 = sld [smem:[%s6104_s0 + %s4843_s15]]   ;;  %s4847_s15 = smov 27  }
  0x22   :  { %s4996_s14 = sld [smem:[%s6104_s0 + %s4844_s22]]   ;;  %s4848_s22 = smov 28  }
  0x25   :  { %6121 = sst [smem:[#allocation16_spill]] %s4981_s4 }
  0x26   :  { %6122 = sst [smem:[#allocation17_spill]] %s4986_s21 }
  0x27   :  { %6123 = sst [smem:[#allocation18_spill]] %s4991_s19 }
  0x28   :  { %6124 = sst [smem:[#allocation19_spill]] %s4996_s14 }
  0x29   :  { %s5001_s4 = sld [smem:[%s6104_s0 + %s4845_s28]]   ;;  %s4849_s28 = smov 29  }
  0x2a   :  { %s5006_s21 = sld [smem:[%s6104_s0 + %s4846_s7]]   ;;  %s4850_s7 = smov 30  }
  0x2b   :  { %s5011_s19 = sld [smem:[%s6104_s0 + %s4847_s15]]   ;;  %s4851_s15 = smov 31  }
  0x2c   :  { %s5016_s14 = sld [smem:[%s6104_s0 + %s4848_s22]]   ;;  %s4852_s22 = smov 32  }
  0x2f   :  { %6125 = sst [smem:[#allocation20_spill]] %s5001_s4 }
  0x30   :  { %6126 = sst [smem:[#allocation21_spill]] %s5006_s21 }
  0x31   :  { %6127 = sst [smem:[#allocation22_spill]] %s5011_s19 }
  0x32   :  { %6128 = sst [smem:[#allocation23_spill]] %s5016_s14 }
  0x33   :  { %s5021_s4 = sld [smem:[%s6104_s0 + %s4849_s28]]   ;;  %s4853_s28 = smov 33  }
  0x34   :  { %s5026_s21 = sld [smem:[%s6104_s0 + %s4850_s7]]   ;;  %s4854_s7 = smov 34  }
  0x35   :  { %s5031_s19 = sld [smem:[%s6104_s0 + %s4851_s15]]   ;;  %s4855_s15 = smov 35  }
  0x36   :  { %s5036_s14 = sld [smem:[%s6104_s0 + %s4852_s22]]   ;;  %s4856_s22 = smov 36  }
  0x39   :  { %6129 = sst [smem:[#allocation24_spill]] %s5021_s4 }
  0x3a   :  { %6130 = sst [smem:[#allocation25_spill]] %s5026_s21 }
  0x3b   :  { %6131 = sst [smem:[#allocation26_spill]] %s5031_s19 }
  0x3c   :  { %6132 = sst [smem:[#allocation27_spill]] %s5036_s14 }
  0x3d   :  { %s5041_s4 = sld [smem:[%s6104_s0 + %s4853_s28]]   ;;  %s4857_s28 = smov 37  }
  0x3e   :  { %s5046_s21 = sld [smem:[%s6104_s0 + %s4854_s7]]   ;;  %s4858_s7 = smov 38  }
  0x3f   :  { %s5051_s19 = sld [smem:[%s6104_s0 + %s4855_s15]]  }
  0x40   :  { %s5056_s14 = sld [smem:[%s6104_s0 + %s4856_s22]]  }
  0x43   :  { %6133 = sst [smem:[#allocation28_spill]] %s5041_s4 }
  0x44   :  { %6134 = sst [smem:[#allocation29_spill]] %s5046_s21 }
  0x45   :  { %s5061_s4 = sld [smem:[%s6104_s0 + %s4857_s28]]  }
  0x46   :  { %s5066_s21 = sld [smem:[%s6104_s0 + %s4858_s7]]  }
  0x47   :  { %83 = vsyncpa [#allocation3], 0  ;;  %v174_v0 = vld [vmem:[%s4901_s25] sm:$0x3]  ;;  %vm215_vm0 = vcmask 1041408   ;;  %vm844_vm1 = vcmask 1040384  }
  0x48   :  { %v158_v1 = vld [vmem:[%s4876_s5] sm:$0xff]  ;;  %4335 = vmatprep.subr.msk.bf16.mxu0 %vm215_vm0, %v174_v0  ;;  %v4859_v2 = vmov 65535   ;;  %v217_v4 = vsel %vm215_vm0, %v174_v0, 0  ;;  %v159_v5 = vld [vmem:[%s4876_s5 + $0x8] sm:$0xff]  ;;  %vm190_vm2 = vcmask 31744   ;;  %v160_v6 = vld [vmem:[%s4876_s5 + $0x10] sm:$0xff] }
  0x49   :  { %v845_v3 = vsel %vm844_vm1, 4294967295, %v4859_v2  ;;  %v161_v7 = vld [vmem:[%s4876_s5 + $0x18] sm:$0xff]  ;;  %3960 = vmatpush3.bf16.msra.mxu0 %v217_v4  ;;  %v175_v9 = vpack.c.bf16 %v159_v5, %v158_v1  ;;  %v819_v11 = vld [vmem:[%s4931_s24] sm:$0x3]  ;;  %v163_v13 = vld [vmem:[%s4876_s5 + $0x28] sm:$0xff]  ;;  %vm831_vm3 = vcmask 23552  }
  0x4a   :  { %v846_v8 = vsel %vm215_vm0, %v845_v3, 0  ;;  %v176_v10 = vpack.c.bf16 %v161_v7, %v160_v6  ;;  %v162_v12 = vld [vmem:[%s4876_s5 + $0x20] sm:$0xff]  ;;  %v164_v16 = vld [vmem:[%s4876_s5 + $0x30] sm:$0xff]  ;;  %v165_v17 = vld [vmem:[%s4876_s5 + $0x38] sm:$0xff] }
  0x4b   :  { %v848_v14 = vand.u32 %v846_v8, %v819_v11  ;;  %v177_v15 = vpack.c.bf16 %v163_v13, %v162_v12  ;;  %3961 = vmatprep.mubr.msk.bf16.mxu0 %vm190_vm2, %v175_v9  ;;  %v166_v18 = vld [vmem:[%s4876_s5 + $0x40] sm:$0xff]  ;;  %v167_v19 = vld [vmem:[%s4876_s5 + $0x48] sm:$0xff]  ;;  %v178_v20 = vpack.c.bf16 %v165_v17, %v164_v16  ;;  %v168_v22 = vld [vmem:[%s4876_s5 + $0x50] sm:$0xff] }
  0x4c   :  { %3962 = vmatmul.mubr.msk.bf16.vlgmr.msra.gmra.mxu0 %vm190_vm2, %v176_v10  ;;  %v179_v21 = vpack.c.bf16 %v167_v19, %v166_v18  ;;  %v169_v23 = vld [vmem:[%s4876_s5 + $0x58] sm:$0xff]  ;;  %v170_v24 = vld [vmem:[%s4876_s5 + $0x60] sm:$0xff]  ;;  %v171_v25 = vld [vmem:[%s4876_s5 + $0x68] sm:$0xff] }
  0x4d   :  { %4009 = vmatprep.subr.bf16.mxu0 %v848_v14  ;;  %3965 = vmatprep.mubr.msk.bf16.mxu0 %vm190_vm2, %v177_v15  ;;  %v180_v26 = vpack.c.bf16 %v169_v23, %v168_v22  ;;  %v181_v27 = vpack.c.bf16 %v171_v25, %v170_v24  ;;  %v172_v28 = vld [vmem:[%s4876_s5 + $0x70] sm:$0xff]  ;;  %v173_v29 = vld [vmem:[%s4876_s5 + $0x78] sm:$0xff]  ;;  %v811_v30 = vld [vmem:[%s4881_s9] sm:$0xff] }
  0x4e   :  { %4010 = vmatpush3.bf16.msra.mxu0 %v848_v14  ;;  %v812_v31 = vld [vmem:[%s4881_s9 + $0x8] sm:$0xff]  ;;  %v182_v32 = vpack.c.bf16 %v173_v29, %v172_v28  ;;  %v813_v34 = vld [vmem:[%s4881_s9 + $0x10] sm:$0xff]  ;;  %v814_v35 = vld [vmem:[%s4881_s9 + $0x18] sm:$0xff] }
  0x4f   :  { %v820_v33 = vpack.c.bf16 %v812_v31, %v811_v30  ;;  %v815_v36 = vld [vmem:[%s4881_s9 + $0x20] sm:$0xff]  ;;  %v816_v37 = vld [vmem:[%s4881_s9 + $0x28] sm:$0xff]  ;;  %v821_v38 = vpack.c.bf16 %v814_v35, %v813_v34  ;;  %v817_v40 = vld [vmem:[%s4881_s9 + $0x30] sm:$0xff] }
  0x50   :  { %v822_v39 = vpack.c.bf16 %v816_v37, %v815_v36  ;;  %v818_v41 = vld [vmem:[%s4881_s9 + $0x38] sm:$0xff] }
  0x51   :  { %v823_v42 = vpack.c.bf16 %v818_v41, %v817_v40 }
  0x54   :  { %3966 = vmatmul.mubr.msk.bf16.gmra.mxu0 %vm190_vm2, %v178_v20 }
  0x55   :  { %3969 = vmatprep.mubr.msk.bf16.mxu0 %vm190_vm2, %v179_v21 }
  0x5c   :  { %3970 = vmatmul.mubr.msk.bf16.gmra.mxu0 %vm190_vm2, %v180_v26 }
  0x5d   :  { %3973 = vmatprep.mubr.msk.bf16.mxu0 %vm190_vm2, %v181_v27 }
  0x64   :  { %3974 = vmatmul.mubr.msk.bf16.gmra.mxu0 %vm190_vm2, %v182_v32 }
  0x65   :  { %4011 = vmatprep.mubr.msk.bf16.mxu0 %vm831_vm3, %v820_v33 }
  0x6c   :  { %4012 = vmatmul.mubr.msk.bf16.vlgmr.msra.gmra.mxu0 %vm831_vm3, %v821_v38 }
  0x6d   :  { %4015 = vmatprep.mubr.msk.bf16.mxu0 %vm831_vm3, %v822_v39 }
  0x74   :  { %4016 = vmatmul.mubr.msk.bf16.gmra.mxu0 %vm831_vm3, %v823_v42 }
  0x75   :  { %84 = vsyncpa [#allocation5], 0  ;;  %v4385_v43 = vld [vmem:[%s4911_s3 + $0x38] sm:$0xff]   ;;  %v4386_v44 = vld [vmem:[%s4911_s3 + $0x30] sm:$0xff]   ;;  %vm1463_vm6 = vcmask 523264   ;;  %vm1585_vm1 = vcmask 261120  }
  0x76   :  { %3977 = vmatprep.subr.bf16.mxu1 %v4385_v43  ;;  %v4387_v45 = vld [vmem:[%s4911_s3 + $0x28] sm:$0xff]   ;;  %v4388_v46 = vld [vmem:[%s4911_s3 + $0x20] sm:$0xff]   ;;  %v4389_v47 = vld [vmem:[%s4911_s3 + $0x18] sm:$0xff]   ;;  %s6135_s0 = sld [smem:[#allocation13_spill]]  ;;  %s4863_s28 = smov [#allocation2]  }
  0x77   :  { %3978 = vmatpush3.bf16.msra.mxu1 %v4385_v43  ;;  %v4390_v48 = vld [vmem:[%s4911_s3 + $0x10] sm:$0xff]   ;;  %v4391_v49 = vld [vmem:[%s4911_s3 + $0x8] sm:$0xff]   ;;  %v4392_v50 = vld [vmem:[%s4911_s3] sm:$0xff]   ;;  %s6136_s5 = sld [smem:[#allocation14_spill]]  ;;  %s3552_s1 = sshll.u32 %s4863_s28, 4  ;;  %s3553_s1 = int_to_ptr.vmem [resolvable:$true] %s3552_s1 }
  0x78   :  { %3979 = vmatprep.subr.bf16.mxu1 %v4386_v44  ;;  %v5115_v51 = vld [vmem:[%s4941_s6 + $0x38] sm:$0xff]   ;;  %v5119_v52 = vld [vmem:[%s4906_s29] ss:$0 sm:$0xff]  ;;  %s6137_s9 = sld [smem:[#allocation12_spill]]  ;;  %s4757_s2 = scalar_lea.vmem %s3553_s1, 2048 }
  0x79   :  { %s6140_s25 = sld [smem:[#allocation16_spill]]  ;;  %p4758_p0 = scmp.ne.s32.totalorder %s3553_s1, %s4757_s2 }
  0x7a   :  { %s6141_s29 = sld [smem:[#allocation15_spill]]  ;;  %p4762_p1 = scmp.lt.s32.totalorder %s3553_s1, %s3553_s1 }
  0x7b   :  { %3980 = vmatpush3.bf16.msra.mxu1 %v4386_v44  ;;  %s6142_s3 = sld [smem:[#allocation17_spill]]  ;;  %p4763_p2 = scmp.lt.s32.totalorder %s4757_s2, %s4757_s2 }
  0x7c   :  { %3981 = vmatprep.subr.bf16.mxu1 %v4387_v45  ;;  %s6144_s24 = sld [smem:[#allocation21_spill]] }
  0x7d   :  { %s6152_s15 = sld [smem:[#allocation24_spill]]  ;;  %p4764_p3 = por %p4763_p2, %p4762_p1 }
  0x7e   :  { %s6153_s16 = sld [smem:[#allocation27_spill]] }
  0x7f   :  { %3982 = vmatpush3.bf16.msra.mxu1 %v4387_v45  ;;  %s6154_s18 = sld [smem:[#allocation25_spill]]  ;;  %p4765_p4 = pnand %p4764_p3, %p4758_p0 }
  0x80   :  { %3983 = vmatprep.subr.bf16.mxu1 %v4388_v46  ;;  %s6155_s22 = sld [smem:[#allocation26_spill]] }
  0x81   :  { %s6156_s23 = sld [smem:[#allocation29_spill]] }
  0x82   :  { %s6157_s26 = sld [smem:[#allocation28_spill]] }
  0x83   :  { %3984 = vmatpush3.bf16.msra.mxu1 %v4388_v46 }
  0x84   :  { %3985 = vmatprep.subr.bf16.mxu1 %v4389_v47 }
  0x87   :  { %3986 = vmatpush3.bf16.msra.mxu1 %v4389_v47 }
  0x88   :  { %3987 = vmatprep.subr.bf16.mxu1 %v4390_v48 }
  0x8b   :  { %3988 = vmatpush3.bf16.msra.mxu1 %v4390_v48 }
  0x8c   :  { %3989 = vmatprep.subr.bf16.mxu1 %v4391_v49 }
  0x8f   :  { %3990 = vmatpush3.bf16.msra.mxu1 %v4391_v49 }
  0x90   :  { %3991 = vmatprep.subr.bf16.mxu1 %v4392_v50 }
  0x93   :  { %3992 = vmatpush3.bf16.msra.mxu1 %v4392_v50 }
  0x94   :  { %4019 = vmatprep.subr.bf16.mxu1 %v5115_v51 }
 0x10c   :  { %v3963_v53 = vpop.f32.mrf.mxu0 }
 0x10d   :  { %v5122_v54 = vadd.f32 %v3963_v53, %v5119_v52 }
 0x10e   :  { %v253_v55 = vpop.f32.mrf.mxu0 }
 0x10f   :  { %v318_v56 = vsub.f32 0.0, %v5122_v54  ;;  %v5126_v57 = vadd.f32 %v5119_v52, %v253_v55 }
 0x110   :  { %v3964_v58 = vpop.f32.mrf.mxu0 }
 0x111   :  { %v336_v59 = vmul.f32 1.442695, %v318_v56  ;;  %v316_v60 = vsub.f32 0.0, %v5126_v57  ;;  %v5130_v61 = vadd.f32 %v3964_v58, %v5119_v52 }
 0x112   :  { %v256_v62 = vpop.f32.mrf.mxu0 }
 0x113   :  { %4473 = vpow2.f32 %v336_v59  ;;  %v332_v63 = vmul.f32 1.442695, %v316_v60  ;;  %v319_v0 = vsub.f32 0.0, %v5130_v61  ;;  %v5134_v1 = vadd.f32 %v5119_v52, %v256_v62 }
 0x114   :  { %v3967_v2 = vpop.f32.mrf.mxu0 }
 0x115   :  { %4475 = vpow2.f32 %v332_v63  ;;  %v338_v3 = vmul.f32 1.442695, %v319_v0  ;;  %v317_v4 = vsub.f32 0.0, %v5134_v1  ;;  %v5138_v5 = vadd.f32 %v3967_v2, %v5119_v52 }
 0x116   :  { %v269_v6 = vpop.f32.mrf.mxu0 }
 0x117   :  { %4477 = vpow2.f32 %v338_v3  ;;  %v334_v7 = vmul.f32 1.442695, %v317_v4  ;;  %v322_v8 = vsub.f32 0.0, %v5138_v5  ;;  %v5142_v9 = vadd.f32 %v5119_v52, %v269_v6  ;;  %v5185_v3 = vld [vmem:[%s4936_s30] ss:$0 sm:$0xff]  ;;  %s6147_s30 = sld [smem:[#allocation18_spill]] }
 0x118   :  { %v3968_v10 = vpop.f32.mrf.mxu0 }
 0x119   :  { %4479 = vpow2.f32 %v334_v7  ;;  %v344_v11 = vmul.f32 1.442695, %v322_v8  ;;  %v320_v12 = vsub.f32 0.0, %v5142_v9  ;;  %v5146_v13 = vadd.f32 %v3968_v10, %v5119_v52 }
 0x11a   :  { %v272_v14 = vpop.f32.mrf.mxu0 }
 0x11b   :  { %4481 = vpow2.f32 %v344_v11  ;;  %v340_v15 = vmul.f32 1.442695, %v320_v12  ;;  %v323_v16 = vsub.f32 0.0, %v5146_v13  ;;  %v5150_v17 = vadd.f32 %v5119_v52, %v272_v14 }
 0x11c   :  { %v3971_v18 = vpop.f32.mrf.mxu0 }
 0x11d   :  { %4483 = vpow2.f32 %v340_v15  ;;  %v346_v19 = vmul.f32 1.442695, %v323_v16  ;;  %v321_v20 = vsub.f32 0.0, %v5150_v17  ;;  %v5154_v21 = vadd.f32 %v3971_v18, %v5119_v52 }
 0x11e   :  { %v285_v22 = vpop.f32.mrf.mxu0 }
 0x11f   :  { %4485 = vpow2.f32 %v346_v19  ;;  %v342_v23 = vmul.f32 1.442695, %v321_v20  ;;  %v326_v24 = vsub.f32 0.0, %v5154_v21  ;;  %v5158_v25 = vadd.f32 %v5119_v52, %v285_v22 }
 0x120   :  { %v4474_v26 = vpop.eup %4473  ;;  %v3972_v27 = vpop.f32.mrf.mxu0 }
 0x121   :  { %v366_v28 = vadd.f32 1.0, %v4474_v26  ;;  %4487 = vpow2.f32 %v342_v23  ;;  %v352_v29 = vmul.f32 1.442695, %v326_v24  ;;  %v324_v30 = vsub.f32 0.0, %v5158_v25 }
 0x122   :  { %v4476_v31 = vpop.eup %4475  ;;  %v5162_v32 = vadd.f32 %v3972_v27, %v5119_v52  ;;  %v288_v33 = vpop.f32.mrf.mxu0 }
 0x123   :  { %4489 = vrcp.f32 %v366_v28  ;;  %v364_v34 = vadd.f32 1.0, %v4476_v31  ;;  %v348_v35 = vmul.f32 1.442695, %v324_v30  ;;  %v5165_v36 = vadd.f32 %v5119_v52, %v288_v33 }
 0x124   :  { %v4478_v37 = vpop.eup %4477  ;;  %4491 = vpow2.f32 %v352_v29  ;;  %v327_v38 = vsub.f32 0.0, %v5162_v32  ;;  %v3975_v39 = vpop.f32.mrf.mxu0 }
 0x125   :  { %4493 = vrcp.f32 %v364_v34  ;;  %v367_v40 = vadd.f32 1.0, %v4478_v37  ;;  %v325_v41 = vsub.f32 0.0, %v5165_v36  ;;  %v5170_v42 = vadd.f32 %v3975_v39, %v5119_v52 }
 0x126   :  { %v4480_v43 = vpop.eup %4479  ;;  %4495 = vpow2.f32 %v348_v35  ;;  %v354_v44 = vmul.f32 1.442695, %v327_v38  ;;  %v301_v45 = vpop.f32.mrf.mxu0 }
 0x127   :  { %4497 = vrcp.f32 %v367_v40  ;;  %v365_v46 = vadd.f32 1.0, %v4480_v43  ;;  %v350_v47 = vmul.f32 1.442695, %v325_v41  ;;  %v330_v48 = vsub.f32 0.0, %v5170_v42 }
 0x128   :  { %v4482_v49 = vpop.eup %4481  ;;  %4499 = vpow2.f32 %v354_v44  ;;  %v5174_v50 = vadd.f32 %v5119_v52, %v301_v45  ;;  %v3976_v53 = vpop.f32.mrf.mxu0 }
 0x129   :  { %4501 = vrcp.f32 %v365_v46  ;;  %v370_v55 = vadd.f32 1.0, %v4482_v49  ;;  %v360_v56 = vmul.f32 1.442695, %v330_v48  ;;  %v5177_v58 = vadd.f32 %v3976_v53, %v5119_v52 }
 0x12a   :  { %v4484_v59 = vpop.eup %4483  ;;  %4503 = vpow2.f32 %v350_v47  ;;  %v328_v60 = vsub.f32 0.0, %v5174_v50  ;;  %v304_v62 = vpop.f32.mrf.mxu0 }
 0x12b   :  { %4505 = vrcp.f32 %v370_v55  ;;  %v368_v63 = vadd.f32 1.0, %v4484_v59  ;;  %v331_v0 = vsub.f32 0.0, %v5177_v58  ;;  %v5182_v2 = vadd.f32 %v5119_v52, %v304_v62 }
 0x12c   :  { %v4486_v4 = vpop.eup %4485  ;;  %4507 = vpow2.f32 %v360_v56  ;;  %v356_v6 = vmul.f32 1.442695, %v328_v60  ;;  %v4013_v7 = vpop.f32.mrf.mxu0 }
 0x12d   :  { %4509 = vrcp.f32 %v368_v63  ;;  %v371_v8 = vadd.f32 1.0, %v4486_v4  ;;  %v362_v10 = vmul.f32 1.442695, %v331_v0  ;;  %v329_v11 = vsub.f32 0.0, %v5182_v2 }
 0x12e   :  { %v4488_v12 = vpop.eup %4487  ;;  %4511 = vpow2.f32 %v356_v6  ;;  %v5189_v14 = vadd.f32 %v4013_v7, %v5185_v3  ;;  %v884_v15 = vpop.f32.mrf.mxu0 }
 0x12f   :  { %4513 = vrcp.f32 %v371_v8  ;;  %v369_v52 = vadd.f32 1.0, %v4488_v12  ;;  %v358_v16 = vmul.f32 1.442695, %v329_v11  ;;  %v5192_v18 = vadd.f32 %v5185_v3, %v884_v15 }
 0x130   :  { %v4490_v19 = vpop.eup %4489  ;;  %4515 = vpow2.f32 %v362_v10  ;;  %v917_v20 = vsub.f32 0.0, %v5189_v14  ;;  %v4014_v22 = vpop.f32.mrf.mxu0 }
 0x131   :  { %v4492_v23 = vpop.eup %4491  ;;  %4517 = vrcp.f32 %v369_v52  ;;  %v915_v24 = vsub.f32 0.0, %v5192_v18  ;;  %v5197_v26 = vadd.f32 %v4014_v22, %v5185_v3  ;;  %v398_v4 = vmul.f32 %v4490_v19, %v5122_v54 }
 0x132   :  { %v4494_v27 = vpop.eup %4493  ;;  %v374_v28 = vadd.f32 1.0, %v4492_v23  ;;  %4519 = vpow2.f32 %v358_v16  ;;  %v927_v29 = vmul.f32 1.442695, %v917_v20  ;;  %v887_v30 = vpop.f32.mrf.mxu0  ;;  %v4394_v20 = vld [vmem:[%s4941_s6 + $0x30] sm:$0xff]  }
 0x133   :  { %v4496_v31 = vpop.eup %4495  ;;  %v923_v33 = vmul.f32 1.442695, %v915_v24  ;;  %v918_v34 = vsub.f32 0.0, %v5197_v26  ;;  %v5201_v35 = vadd.f32 %v5185_v3, %v887_v30  ;;  %v396_v63 = vmul.f32 %v4494_v27, %v5126_v57 }
 0x134   :  { %v4498_v37 = vpop.eup %4497  ;;  %4521 = vrcp.f32 %v374_v28  ;;  %v372_v38 = vadd.f32 1.0, %v4496_v31  ;;  %v4017_v39 = vpop.f32.mrf.mxu0 }
 0x135   :  { %v4500_v40 = vpop.eup %4499  ;;  %4523 = vpow2.f32 %v927_v29  ;;  %v929_v41 = vmul.f32 1.442695, %v918_v34  ;;  %v916_v43 = vsub.f32 0.0, %v5201_v35  ;;  %v399_v45 = vmul.f32 %v4498_v37, %v5130_v61  ;;  %v4395_v34 = vld [vmem:[%s4941_s6 + $0x28] sm:$0xff]  }
 0x136   :  { %v4502_v44 = vpop.eup %4501  ;;  %4525 = vrcp.f32 %v372_v38  ;;  %v375_v46 = vadd.f32 1.0, %v4500_v40  ;;  %v5206_v47 = vadd.f32 %v4017_v39, %v5185_v3  ;;  %v900_v48 = vpop.f32.mrf.mxu0 }
 0x137   :  { %v4504_v49 = vpop.eup %4503  ;;  %4527 = vpow2.f32 %v923_v33  ;;  %v925_v53 = vmul.f32 1.442695, %v916_v43  ;;  %v5209_v55 = vadd.f32 %v5185_v3, %v900_v48  ;;  %v397_v56 = vmul.f32 %v4502_v44, %v5134_v1 }
 0x138   :  { %v4506_v59 = vpop.eup %4505  ;;  %4529 = vrcp.f32 %v375_v46  ;;  %v373_v60 = vadd.f32 1.0, %v4504_v49  ;;  %v921_v62 = vsub.f32 0.0, %v5206_v47  ;;  %v4018_v61 = vpop.f32.mrf.mxu0  ;;  %v429_v16 = vpack.c.bf16 %v399_v45, %v398_v4 }
 0x139   :  { %v4508_v0 = vpop.eup %4507  ;;  %4531 = vpow2.f32 %v929_v41  ;;  %v919_v6 = vsub.f32 0.0, %v5209_v55  ;;  %v5217_v7 = vadd.f32 %v4018_v61, %v5185_v3  ;;  %v428_v12 = vpack.c.bf16 %v397_v56, %v396_v63  ;;  %v4397_v56 = vld [vmem:[%s4941_s6 + $0x18] sm:$0xff]  }
 0x13a   :  { %v4510_v8 = vpop.eup %4509  ;;  %4533 = vrcp.f32 %v373_v60  ;;  %v378_v1 = vadd.f32 1.0, %v4508_v0  ;;  %v935_v10 = vmul.f32 1.442695, %v921_v62  ;;  %v903_v11 = vpop.f32.mrf.mxu0  ;;  %v402_v40 = vmul.f32 %v4506_v59, %v5138_v5 }
 0x13b   :  { %v4512_v15 = vpop.eup %4511  ;;  %4535 = vpow2.f32 %v925_v53  ;;  %v931_v52 = vmul.f32 1.442695, %v919_v6  ;;  %v922_v57 = vsub.f32 0.0, %v5217_v7  ;;  %v5222_v22 = vadd.f32 %v5185_v3, %v903_v11  ;;  %3993 = vmatprep.mubr.bf16.mxu1 %v428_v12 }
 0x13c   :  { %v4514_v54 = vpop.eup %4513  ;;  %4537 = vrcp.f32 %v378_v1  ;;  %v376_v19 = vadd.f32 1.0, %v4512_v15  ;;  %3994 = vmatmul.mubr.bf16.vlgmr.msra.gmra.mxu1 %v429_v16  ;;  %v400_v31 = vmul.f32 %v4510_v8, %v5142_v9  ;;  %v4398_v1 = vld [vmem:[%s4941_s6 + $0x10] sm:$0xff]  }
 0x13d   :  { %v4516_v23 = vpop.eup %4515  ;;  %4539 = vpow2.f32 %v935_v10  ;;  %v937_v24 = vmul.f32 1.442695, %v922_v57  ;;  %v920_v29 = vsub.f32 0.0, %v5222_v22  ;;  %4020 = vmatpush3.bf16.msra.mxu1 %v5115_v51  ;;  %v403_v33 = vmul.f32 %v4514_v54, %v5146_v13  ;;  %v4399_v57 = vld [vmem:[%s4941_s6 + $0x8] sm:$0xff]  }
 0x13e   :  { %v4518_v27 = vpop.eup %4517  ;;  %4541 = vrcp.f32 %v376_v19  ;;  %v379_v28 = vadd.f32 1.0, %v4516_v23  ;;  %4021 = vmatprep.subr.bf16.mxu1 %v4394_v20 }
 0x13f   :  { %v4520_v30 = vpop.eup %4519  ;;  %v401_v3 = vmul.f32 %v4518_v27, %v5150_v17  ;;  %4543 = vpow2.f32 %v931_v52  ;;  %v933_v38 = vmul.f32 1.442695, %v920_v29  ;;  %v431_v13 = vpack.c.bf16 %v403_v33, %v402_v40  ;;  %v4396_v17 = vld [vmem:[%s4941_s6 + $0x20] sm:$0xff]  }
 0x140   :  { %4545 = vrcp.f32 %v379_v28  ;;  %v377_v37 = vadd.f32 1.0, %v4520_v30 }
 0x141   :  { %v4522_v39 = vpop.eup %4521  ;;  %4547 = vpow2.f32 %v937_v24  ;;  %v430_v41 = vpack.c.bf16 %v401_v3, %v400_v31  ;;  %4022 = vmatpush3.bf16.msra.mxu1 %v4394_v20 }
 0x142   :  { %v4524_v51 = vpop.eup %4523  ;;  %4549 = vrcp.f32 %v377_v37  ;;  %4023 = vmatprep.subr.bf16.mxu1 %v4395_v34  ;;  %v406_v63 = vmul.f32 %v4522_v39, %v5154_v21 }
 0x143   :  { %v4526_v9 = vpop.eup %4525  ;;  %4551 = vpow2.f32 %v933_v38  ;;  %3997 = vmatprep.mubr.bf16.mxu1 %v430_v41  ;;  %v941_v48 = vadd.f32 1.0, %v4524_v51 }
 0x144   :  { %v4528_v43 = vpop.eup %4527  ;;  %3998 = vmatmul.mubr.bf16.gmra.mxu1 %v431_v13  ;;  %v404_v60 = vmul.f32 %v4526_v9, %v5158_v25  ;;  %v5255_v13 = vld [vmem:[%s4916_s8] ss:$0 sm:$0xff]  ;;  %s6143_s8 = sld [smem:[#allocation9_spill]] }
 0x145   :  { %v4530_v44 = vpop.eup %4529  ;;  %v939_v45 = vadd.f32 1.0, %v4528_v43  ;;  %4024 = vmatpush3.bf16.msra.mxu1 %v4395_v34 }
 0x146   :  { %v4532_v46 = vpop.eup %4531  ;;  %v407_v49 = vmul.f32 %v4530_v44, %v5162_v32  ;;  %4025 = vmatprep.subr.bf16.mxu1 %v4396_v17 }
 0x147   :  { %v4534_v5 = vpop.eup %4533  ;;  %v942_v53 = vadd.f32 1.0, %v4532_v46  ;;  %4553 = vrcp.f32 %v939_v45 }
 0x148   :  { %v4536_v59 = vpop.eup %4535  ;;  %v405_v62 = vmul.f32 %v4534_v5, %v5165_v36  ;;  %v433_v8 = vpack.c.bf16 %v407_v49, %v406_v63 }
 0x149   :  { %v4538_v61 = vpop.eup %4537  ;;  %4555 = vrcp.f32 %v942_v53  ;;  %v940_v0 = vadd.f32 1.0, %v4536_v59  ;;  %4026 = vmatpush3.bf16.msra.mxu1 %v4396_v17 }
 0x14a   :  { %v4540_v4 = vpop.eup %4539  ;;  %4557 = vrcp.f32 %v941_v48  ;;  %v432_v6 = vpack.c.bf16 %v405_v62, %v404_v60  ;;  %4027 = vmatprep.subr.bf16.mxu1 %v4397_v56  ;;  %v410_v19 = vmul.f32 %v4538_v61, %v5170_v42 }
 0x14b   :  { %v4542_v32 = vpop.eup %4541  ;;  %4559 = vrcp.f32 %v940_v0  ;;  %v945_v12 = vadd.f32 1.0, %v4540_v4 }
 0x14c   :  { %v4544_v10 = vpop.eup %4543  ;;  %4001 = vmatprep.mubr.bf16.mxu1 %v432_v6  ;;  %v408_v20 = vmul.f32 %v4542_v32, %v5174_v50 }
 0x14d   :  { %v4546_v25 = vpop.eup %4545  ;;  %v943_v36 = vadd.f32 1.0, %v4544_v10  ;;  %4002 = vmatmul.mubr.bf16.gmra.mxu1 %v433_v8 }
 0x14e   :  { %v4548_v11 = vpop.eup %4547  ;;  %4028 = vmatpush3.bf16.msra.mxu1 %v4397_v56  ;;  %v411_v15 = vmul.f32 %v4546_v25, %v5177_v58  ;;  %v4400_v58 = vld [vmem:[%s4941_s6] sm:$0xff]   ;;  %s6148_s6 = sld [smem:[#allocation19_spill]] }
 0x14f   :  { %v4550_v21 = vpop.eup %4549  ;;  %v946_v52 = vadd.f32 1.0, %v4548_v11  ;;  %4029 = vmatprep.subr.bf16.mxu1 %v4398_v1  ;;  %4561 = vrcp.f32 %v943_v36  ;;  %v3657_v36 = vld [vmem:[%s4946_s12] ss:$0 sm:$0xff]  ;;  %s6149_s12 = sld [smem:[#allocation20_spill]] }
 0x150   :  { %v4552_v16 = vpop.eup %4551  ;;  %v409_v54 = vmul.f32 %v4550_v21, %v5182_v2  ;;  %v435_v27 = vpack.c.bf16 %v411_v15, %v410_v19 }
 0x151   :  { %4563 = vrcp.f32 %v946_v52  ;;  %v944_v23 = vadd.f32 1.0, %v4552_v16 }
 0x152   :  { %4565 = vrcp.f32 %v945_v12  ;;  %4030 = vmatpush3.bf16.msra.mxu1 %v4398_v1  ;;  %v434_v24 = vpack.c.bf16 %v409_v54, %v408_v20 }
 0x153   :  { %4567 = vrcp.f32 %v944_v23  ;;  %4031 = vmatprep.subr.bf16.mxu1 %v4399_v57 }
 0x154   :  { %4005 = vmatprep.mubr.bf16.mxu1 %v434_v24  ;;  %v4554_v28 = vpop.eup %4553 }
 0x155   :  { %4006 = vmatmul.mubr.bf16.gmra.mxu1 %v435_v27  ;;  %v955_v42 = vmul.f32 %v4554_v28, %v5192_v18  ;;  %v4860_v27 = vmov 0  }
 0x156   :  { %v4556_v29 = vpop.eup %4555  ;;  %4032 = vmatpush3.bf16.msra.mxu1 %v4399_v57  ;;  %4384 = vset.pattern.permute.xlu1 %v4860_v27 }
 0x157   :  { %v4558_v50 = vpop.eup %4557  ;;  %4033 = vmatprep.subr.bf16.mxu1 %v4400_v58  ;;  %v958_v30 = vmul.f32 %v4556_v29, %v5197_v26  ;;  %4383 = vset.pattern.permute.xlu0 %v4860_v27 }
 0x158   :  { %v4560_v2 = vpop.eup %4559  ;;  %v957_v33 = vmul.f32 %v4558_v50, %v5189_v14 }
 0x159   :  { %v956_v31 = vmul.f32 %v4560_v2, %v5201_v35 }
 0x15a   :  { %4034 = vmatpush3.bf16.msra.mxu1 %v4400_v58  ;;  %v980_v34 = vpack.c.bf16 %v958_v30, %v957_v33 }
 0x15b   :  { %v979_v3 = vpack.c.bf16 %v956_v31, %v955_v42 }
 0x15c   :  { %v4562_v37 = vpop.eup %4561 }
 0x15d   :  { %4035 = vmatprep.mubr.bf16.mxu1 %v979_v3  ;;  %v959_v26 = vmul.f32 %v4562_v37, %v5209_v55 }
 0x15e   :  { %v4564_v38 = vpop.eup %4563  ;;  %4036 = vmatmul.mubr.bf16.vlgmr.msra.gmra.mxu1 %v980_v34 }
 0x15f   :  { %v4566_v39 = vpop.eup %4565  ;;  %v962_v41 = vmul.f32 %v4564_v38, %v5217_v7 }
 0x160   :  { %v4568_v40 = vpop.eup %4567  ;;  %v961_v35 = vmul.f32 %v4566_v39, %v5206_v47 }
 0x161   :  { %v960_v18 = vmul.f32 %v4568_v40, %v5222_v22 }
 0x162   :  { %v982_v14 = vpack.c.bf16 %v962_v41, %v961_v35 }
 0x163   :  { %v981_v51 = vpack.c.bf16 %v960_v18, %v959_v26 }
 0x165   :  { %4039 = vmatprep.mubr.bf16.mxu1 %v981_v51 }
 0x166   :  { %4040 = vmatmul.mubr.bf16.gmra.mxu1 %v982_v14 }
 0x1fc   :  { %v5252_v9 = vpop.f32.mrf.mxu1 }
 0x1fe   :  { %v525_v17 = vpop.f32.mrf.mxu1 }
 0x1ff   :  { %v5258_v43 = vadd.f32 %v5255_v13, %v525_v17 }
 0x200   :  { %v3996_v44 = vpop.f32.mrf.mxu1 }
 0x201   :  { %v5261_v7 = vadd.f32 %v3996_v44, %v5255_v13 }
 0x202   :  { %v5263_v55 = vpop.f32.mrf.mxu1 }
 0x204   :  { %v5265_v22 = vpop.f32.mrf.mxu1 }
 0x206   :  { %v5267_v47 = vpop.f32.mrf.mxu1 }
 0x208   :  { %v4000_v45 = vpop.f32.mrf.mxu1 }
 0x209   :  { %v5270_v46 = vadd.f32 %v4000_v45, %v5255_v13 }
 0x20a   :  { %v544_v48 = vpop.f32.mrf.mxu1 }
 0x20b   :  { %v5273_v5 = vadd.f32 %v5255_v13, %v544_v48 }
 0x20d   :  { %v5275_v49 = vpop.f32.mrf.mxu1 }
 0x20f   :  { %v5277_v53 = vpop.f32.mrf.mxu1 }
 0x211   :  { %v4004_v56 = vpop.f32.mrf.mxu1 }
 0x212   :  { %v5280_v59 = vadd.f32 %v4004_v56, %v5255_v13 }
 0x213   :  { %v560_v60 = vpop.f32.mrf.mxu1 }
 0x214   :  { %v5283_v62 = vadd.f32 %v5255_v13, %v560_v60  ;;  %v1237_v60 = vld [vmem:[%s4886_s13 + $0x8] sm:$0xff] }
 0x215   :  { %v5285_v61 = vpop.f32.mrf.mxu1 }
 0x217   :  { %v5287_v63 = vpop.f32.mrf.mxu1 }
 0x219   :  { %v4008_v0 = vpop.f32.mrf.mxu1 }
 0x21a   :  { %v5290_v4 = vadd.f32 %v4008_v0, %v5255_v13  ;;  %v1236_v0 = vld [vmem:[%s4886_s13] sm:$0xff] }
 0x21b   :  { %v576_v6 = vpop.f32.mrf.mxu1 }
 0x21c   :  { %v5293_v32 = vadd.f32 %v5255_v13, %v576_v6  ;;  %v1238_v6 = vld [vmem:[%s4886_s13 + $0x10] sm:$0xff] }
 0x21e   :  { %v4037_v8 = vpop.f32.mrf.mxu1 }
 0x21f   :  { %v1081_v54 = vadd.f32 %v4037_v8, %v3657_v36  ;;  %v1245_v8 = vld [vmem:[%s4886_s13 + $0x48] sm:$0xff] }
 0x220   :  { %v1072_v1 = vpop.f32.mrf.mxu1 }
 0x221   :  { %v1073_v23 = vadd.f32 %v3657_v36, %v1072_v1  ;;  %v1247_v1 = vld [vmem:[%s4886_s13 + $0x58] sm:$0xff] }
 0x222   :  { %v4038_v10 = vpop.f32.mrf.mxu1 }
 0x223   :  { %v1084_v16 = vadd.f32 %v4038_v10, %v3657_v36  ;;  %v1249_v10 = vld [vmem:[%s4886_s13 + $0x68] sm:$0xff] }
 0x224   :  { %v1075_v25 = vpop.f32.mrf.mxu1 }
 0x225   :  { %v1076_v24 = vadd.f32 %v3657_v36, %v1075_v25  ;;  %v1251_v25 = vld [vmem:[%s4886_s13 + $0x78] sm:$0xff] }
 0x226   :  { %v4041_v11 = vpop.f32.mrf.mxu1 }
 0x227   :  { %v1097_v12 = vadd.f32 %v4041_v11, %v3657_v36  ;;  %v1343_v11 = vld [vmem:[%s4891_s17 + $0x18] sm:$0xff] }
 0x228   :  { %v1088_v21 = vpop.f32.mrf.mxu1 }
 0x229   :  { %v1089_v15 = vadd.f32 %v3657_v36, %v1088_v21  ;;  %1117 = vadd.xlane.f32.xlu0 %v1097_v12 }
 0x22a   :  { %v4042_v52 = vpop.f32.mrf.mxu1 }
 0x22b   :  { %v5296_v57 = vadd.f32 %v4042_v52, %v3657_v36  ;;  %1113 = vadd.xlane.f32.xlu1 %v1089_v15 }
 0x22c   :  { %v1091_v20 = vpop.f32.mrf.mxu1 }
 0x22d   :  { %1119 = vadd.xlane.f32.xlu0 %v5296_v57  ;;  %v5299_v19 = vadd.f32 %v3657_v36, %v1091_v20  ;;  %v1341_v36 = vld [vmem:[%s4891_s17 + $0x8] sm:$0xff] }
 0x22e   :  { %v1349_v20 = vld [vmem:[%s4891_s17 + $0x48] sm:$0xff] }
 0x22f   :  { %1111 = vadd.xlane.f32.xlu1 %v1084_v16 }
 0x231   :  { %1109 = vadd.xlane.f32.xlu0 %v1081_v54 }
 0x233   :  { %1115 = vadd.xlane.f32.xlu1 %v5299_v19 }
 0x235   :  { %1105 = vadd.xlane.f32.xlu0 %v1073_v23 }
 0x237   :  { %1107 = vadd.xlane.f32.xlu1 %v1076_v24 }
 0x2b2   :  { %v1118_v58 = vpop.xlane.xlu0 %1117 }
 0x2b3   :  { %v1127_v28 = vmul.f32 0.0078125, %v1118_v58  ;;  %v1355_v58 = vld [vmem:[%s4891_s17 + $0x78] sm:$0xff] }
 0x2b4   :  { %v1114_v29 = vpop.xlane.xlu1 %1113 }
 0x2b5   :  { %v1125_v50 = vmul.f32 0.0078125, %v1114_v29  ;;  %v5302_v2 = vsub.f32 %v1097_v12, %v1127_v28  ;;  %v1345_v12 = vld [vmem:[%s4891_s17 + $0x28] sm:$0xff]  ;;  %v1239_v28 = vld [vmem:[%s4886_s13 + $0x18] sm:$0xff] }
 0x2b6   :  { %v1120_v30 = vpop.xlane.xlu0 %1119  ;;  %v1241_v29 = vld [vmem:[%s4886_s13 + $0x28] sm:$0xff] }
 0x2b7   :  { %v1143_v42 = vmul.f32 %v5302_v2, %v5302_v2  ;;  %v5306_v31 = vsub.f32 %v1089_v15, %v1125_v50  ;;  %v1128_v21 = vmul.f32 0.0078125, %v1120_v30  ;;  %v1347_v15 = vld [vmem:[%s4891_s17 + $0x38] sm:$0xff]  ;;  %v1242_v50 = vld [vmem:[%s4886_s13 + $0x30] sm:$0xff] }
 0x2b8   :  { %v1112_v33 = vpop.xlane.xlu1 %1111  ;;  %v1243_v30 = vld [vmem:[%s4886_s13 + $0x38] sm:$0xff] }
 0x2b9   :  { %v1124_v3 = vmul.f32 0.0078125, %v1112_v33  ;;  %1157 = vadd.xlane.f32.xlu0 %v1143_v42  ;;  %v1141_v38 = vmul.f32 %v5306_v31, %v5306_v31  ;;  %v1244_v42 = vld [vmem:[%s4886_s13 + $0x40] sm:$0xff]  ;;  %v5359_v33 = vadd.f32 %v5255_v13, %v5263_v55  ;;  %v1250_v55 = vld [vmem:[%s4886_s13 + $0x70] sm:$0xff] }
 0x2ba   :  { %v1110_v34 = vpop.xlane.xlu0 %1109 }
 0x2bb   :  { %v1123_v37 = vmul.f32 0.0078125, %v1110_v34  ;;  %v5310_v39 = vsub.f32 %v1084_v16, %v1124_v3  ;;  %v5338_v16 = vsub.f32 %v5296_v57, %v1128_v21  ;;  %v1353_v57 = vld [vmem:[%s4891_s17 + $0x68] sm:$0xff]  ;;  %v1246_v3 = vld [vmem:[%s4886_s13 + $0x50] sm:$0xff]  ;;  %v5365_v34 = vadd.f32 %v5252_v9, %v5255_v13  ;;  %v1340_v9 = vld [vmem:[%s4891_s17] sm:$0xff] }
 0x2bc   :  { %v1116_v40 = vpop.xlane.xlu1 %1115 }
 0x2bd   :  { %1153 = vadd.xlane.f32.xlu0 %v1141_v38  ;;  %v1140_v41 = vmul.f32 %v5310_v39, %v5310_v39  ;;  %v5314_v26 = vsub.f32 %v1081_v54, %v1123_v37  ;;  %v1126_v52 = vmul.f32 0.0078125, %v1116_v40  ;;  %v1144_v54 = vmul.f32 %v5338_v16, %v5338_v16  ;;  %v1248_v37 = vld [vmem:[%s4886_s13 + $0x60] sm:$0xff] }
 0x2be   :  { %v1106_v18 = vpop.xlane.xlu0 %1105  ;;  %v5371_v38 = vadd.f32 %v5255_v13, %v5267_v47  ;;  %v5377_v40 = vadd.f32 %v5265_v22, %v5255_v13  ;;  %v1342_v47 = vld [vmem:[%s4891_s17 + $0x10] sm:$0xff]  ;;  %v1344_v22 = vld [vmem:[%s4891_s17 + $0x20] sm:$0xff] }
 0x2bf   :  { %v1121_v35 = vmul.f32 0.0078125, %v1106_v18  ;;  %1151 = vadd.xlane.f32.xlu1 %v1140_v41  ;;  %v1139_v51 = vmul.f32 %v5314_v26, %v5314_v26  ;;  %v5383_v41 = vadd.f32 %v5255_v13, %v5277_v53  ;;  %v5389_v18 = vadd.f32 %v5275_v49, %v5255_v13 }
 0x2c0   :  { %v1108_v14 = vpop.xlane.xlu1 %1107 }
 0x2c1   :  { %v1122_v17 = vmul.f32 0.0078125, %v1108_v14  ;;  %1149 = vadd.xlane.f32.xlu0 %v1139_v51  ;;  %v5318_v44 = vsub.f32 %v1073_v23, %v1121_v35  ;;  %v5344_v23 = vsub.f32 %v5299_v19, %v1126_v52  ;;  %v1240_v19 = vld [vmem:[%s4886_s13 + $0x20] sm:$0xff]  ;;  %v5395_v35 = vadd.f32 %v5255_v13, %v5287_v63  ;;  %v1346_v51 = vld [vmem:[%s4891_s17 + $0x30] sm:$0xff]  ;;  %s6138_s13 = sld [smem:[#allocation10_spill]] }
 0x2c3   :  { %v1137_v45 = vmul.f32 %v5318_v44, %v5318_v44  ;;  %v5322_v48 = vsub.f32 %v1076_v24, %v1122_v17  ;;  %v1351_v24 = vld [vmem:[%s4891_s17 + $0x58] sm:$0xff]  ;;  %v1142_v27 = vmul.f32 %v5344_v23, %v5344_v23  ;;  %v5401_v17 = vadd.f32 %v5285_v61, %v5255_v13 }
 0x2c5   :  { %1145 = vadd.xlane.f32.xlu0 %v1137_v45  ;;  %v1138_v56 = vmul.f32 %v5322_v48, %v5322_v48 }
 0x2c7   :  { %1147 = vadd.xlane.f32.xlu1 %v1138_v56  ;;  %v1348_v56 = vld [vmem:[%s4891_s17 + $0x40] sm:$0xff] }
 0x2d8   :  { %1256 = vperm.xlu1 %4384, %v1237_v60  }
 0x2db   :  { %1253 = vperm.xlu0 %4383, %v1236_v0  }
 0x2dc   :  { %1259 = vperm.xlu1 %4384, %v1238_v6  }
 0x2df   :  { %1280 = vperm.xlu0 %4383, %v1245_v8  }
 0x2e3   :  { %1286 = vperm.xlu0 %4383, %v1247_v1   ;;  %v1350_v1 = vld [vmem:[%s4891_s17 + $0x50] sm:$0xff] }
 0x2e7   :  { %1292 = vperm.xlu0 %4383, %v1249_v10  }
 0x2eb   :  { %1298 = vperm.xlu0 %4383, %v1251_v25   ;;  %v1229_v25 = vlaneseq }
 0x2ef   :  { %1360 = vperm.xlu0 %4383, %v1341_v36  }
 0x2f3   :  { %1366 = vperm.xlu0 %4383, %v1343_v11   ;;  %v1352_v11 = vld [vmem:[%s4891_s17 + $0x60] sm:$0xff] }
 0x2f7   :  { %1372 = vperm.xlu0 %4383, %v1345_v12  }
 0x2fb   :  { %1378 = vperm.xlu0 %4383, %v1347_v15  }
 0x2ff   :  { %1384 = vperm.xlu0 %4383, %v1349_v20   ;;  %v5408_v20 = vand.u32 127, %v1229_v25 }
 0x300   :  { %1159 = vadd.xlane.f32.xlu1 %v1144_v54  ;;  %v1354_v54 = vld [vmem:[%s4891_s17 + $0x70] sm:$0xff]  ;;  %s6139_s17 = sld [smem:[#allocation11_spill]] }
 0x303   :  { %1390 = vperm.xlu0 %4383, %v1351_v24  }
 0x304   :  { %1155 = vadd.xlane.f32.xlu1 %v1142_v27 }
 0x307   :  { %1396 = vperm.xlu0 %4383, %v1353_v57  }
 0x30b   :  { %1402 = vperm.xlu0 %4383, %v1355_v58   ;;  %v5412_v58 = vld [vmem:[%s4951_s20] ss:$0 sm:$0xff]  ;;  %s6150_s20 = sld [smem:[#allocation23_spill]] }
 0x315   :  { %1262 = vperm.xlu1 %4384, %v1239_v28  }
 0x319   :  { %1265 = vperm.xlu1 %4384, %v1240_v19  }
 0x31d   :  { %1268 = vperm.xlu1 %4384, %v1241_v29   ;;  %v5417_v29 = vld [vmem:[%s4956_s27] ss:$0 sm:$0xff]  ;;  %s6151_s27 = sld [smem:[#allocation22_spill]] }
 0x321   :  { %1271 = vperm.xlu1 %4384, %v1242_v50  }
 0x325   :  { %1274 = vperm.xlu1 %4384, %v1243_v30  }
 0x329   :  { %1277 = vperm.xlu1 %4384, %v1244_v42   ;;  %v4861_v42 = vmov 0.0  }
 0x32a   :  { %592 = vadd.xlane.f32.xlu0 %v5359_v33 }
 0x32d   :  { %1283 = vperm.xlu1 %4384, %v1246_v3  }
 0x32e   :  { %594 = vadd.xlane.f32.xlu0 %v5365_v34 }
 0x331   :  { %1289 = vperm.xlu1 %4384, %v1248_v37  }
 0x332   :  { %598 = vadd.xlane.f32.xlu0 %v5371_v38 }
 0x335   :  { %1295 = vperm.xlu1 %4384, %v1250_v55  }
 0x336   :  { %602 = vadd.xlane.f32.xlu0 %v5377_v40 }
 0x339   :  { %1357 = vperm.xlu1 %4384, %v1340_v9  }
 0x33a   :  { %606 = vadd.xlane.f32.xlu0 %v5383_v41 }
 0x33d   :  { %1363 = vperm.xlu1 %4384, %v1342_v47  }
 0x33e   :  { %610 = vadd.xlane.f32.xlu0 %v5389_v18 }
 0x341   :  { %1369 = vperm.xlu1 %4384, %v1344_v22  }
 0x342   :  { %v1158_v53 = vpop.xlane.xlu0 %1157  ;;  %614 = vadd.xlane.f32.xlu0 %v5395_v35 }
 0x343   :  { %v1167_v14 = vmul.f32 0.0078125, %v1158_v53 }
 0x345   :  { %v1175_v49 = vadd.f32 1e-05, %v1167_v14  ;;  %1375 = vperm.xlu1 %4384, %v1346_v51  }
 0x346   :  { %v1154_v45 = vpop.xlane.xlu0 %1153  ;;  %618 = vadd.xlane.f32.xlu0 %v5401_v17 }
 0x347   :  { %4569 = vrsqrt.f32 %v1175_v49  ;;  %v1165_v63 = vmul.f32 0.0078125, %v1154_v45 }
 0x348   :  { %v1152_v60 = vpop.xlane.xlu1 %1151 }
 0x349   :  { %v1173_v0 = vadd.f32 1e-05, %v1165_v63  ;;  %v1164_v6 = vmul.f32 0.0078125, %v1152_v60  ;;  %1381 = vperm.xlu1 %4384, %v1348_v56  }
 0x34a   :  { %v1150_v8 = vpop.xlane.xlu0 %1149 }
 0x34b   :  { %4571 = vrsqrt.f32 %v1173_v0  ;;  %v1172_v10 = vadd.f32 1e-05, %v1164_v6  ;;  %v1163_v13 = vmul.f32 0.0078125, %v1150_v8 }
 0x34d   :  { %4573 = vrsqrt.f32 %v1172_v10  ;;  %v1171_v61 = vadd.f32 1e-05, %v1163_v13  ;;  %1387 = vperm.xlu1 %4384, %v1350_v1  }
 0x34e   :  { %v1146_v36 = vpop.xlane.xlu0 %1145 }
 0x34f   :  { %4575 = vrsqrt.f32 %v1171_v61  ;;  %v1161_v12 = vmul.f32 0.0078125, %v1146_v36 }
 0x350   :  { %v1148_v21 = vpop.xlane.xlu1 %1147 }
 0x351   :  { %v1169_v15 = vadd.f32 1e-05, %v1161_v12  ;;  %v1162_v52 = vmul.f32 0.0078125, %v1148_v21  ;;  %1393 = vperm.xlu1 %4384, %v1352_v11  }
 0x353   :  { %4577 = vrsqrt.f32 %v1169_v15  ;;  %v1170_v24 = vadd.f32 1e-05, %v1162_v52 }
 0x354   :  { %v4570_v27 = vpop.eup %4569  ;;  %v1257_v57 = vpop.permute.xlu1 %1256 }
 0x355   :  { %4579 = vrsqrt.f32 %v1170_v24  ;;  %vm1301_vm4 = vcmp.eq.s32.totalorder %v1257_v57, %v5408_v20  ;;  %1399 = vperm.xlu1 %4384, %v1354_v54   ;;  %v1191_v28 = vmul.f32 %v4570_v27, %v5302_v2 }
 0x356   :  { %v1254_v19 = vpop.permute.xlu0 %1253  ;;  %v1317_v3 = vsel %vm1301_vm4, 1.0, %v4861_v42 }
 0x357   :  { %vm1300_vm5 = vcmp.eq.s32.totalorder %v1254_v19, %v5408_v20  ;;  %v1205_v50 = vmul.f32 %v5412_v58, %v1191_v28 }
 0x358   :  { %v4572_v30 = vpop.eup %4571  ;;  %v1316_v37 = vsel %vm1300_vm5, 1.0, %v4861_v42  ;;  %v1260_v12 = vpop.permute.xlu1 %1259 }
 0x359   :  { %v1332_v55 = vpack.c.bf16 %v1317_v3, %v1316_v37  ;;  %v5424_v9 = vadd.f32 %v5417_v29, %v1205_v50  ;;  %v1189_v2 = vmul.f32 %v4572_v30, %v5306_v31  ;;  %vm1302_vm9 = vcmp.eq.s32.totalorder %v1260_v12, %v5408_v20 }
 0x35a   :  { %v4574_v47 = vpop.eup %4573 }
 0x35b   :  { %v1188_v22 = vmul.f32 %v4574_v47, %v5310_v39  ;;  %4051 = vmatprep.mubr.msk.bf16.mxu0 %vm1463_vm6, %v1332_v55  ;;  %1227 = vst [vmem:[#allocation6 + $0x30] sm:$0xff] %v5424_v9  ;;  %v1203_v53 = vmul.f32 %v5412_v58, %v1189_v2 }
 0x35c   :  { %v4576_v51 = vpop.eup %4575 }
 0x35d   :  { %v1187_v14 = vmul.f32 %v4576_v51, %v5314_v26  ;;  %v1202_v49 = vmul.f32 %v5412_v58, %v1188_v22  ;;  %v5434_v45 = vadd.f32 %v5417_v29, %v1203_v53 }
 0x35f   :  { %v1201_v56 = vmul.f32 %v5412_v58, %v1187_v14  ;;  %v1216_v31 = vadd.f32 %v5417_v29, %v1202_v49  ;;  %1225 = vst [vmem:[#allocation6 + $0x20] sm:$0xff] %v5434_v45 }
 0x360   :  { %v4578_v39 = vpop.eup %4577 }
 0x361   :  { %v1185_v63 = vmul.f32 %v4578_v39, %v5318_v44  ;;  %v1215_v60 = vadd.f32 %v5417_v29, %v1201_v56  ;;  %1224 = vst [vmem:[#allocation6 + $0x18] sm:$0xff] %v1216_v31 }
 0x362   :  { %v4580_v0 = vpop.eup %4579 }
 0x363   :  { %v1186_v26 = vmul.f32 %v4580_v0, %v5322_v48  ;;  %1223 = vst [vmem:[#allocation6 + $0x10] sm:$0xff] %v1215_v60  ;;  %v5442_v6 = vpack.c.bf16 %v1216_v31, %v1215_v60  ;;  %v1199_v8 = vmul.f32 %v5412_v58, %v1185_v63  ;;  %v5454_v48 = vpop.permute.xlu0 %1280 }
 0x364   :  { %vm1309_vm11 = vcmp.eq.s32.totalorder %v5454_v48, %v5408_v20 }
 0x365   :  { %4067 = vmatprep.subr.bf16.mxu1 %v5442_v6  ;;  %v1200_v1 = vmul.f32 %v5412_v58, %v1186_v26  ;;  %v1213_v10 = vadd.f32 %v5417_v29, %v1199_v8  ;;  %v1318_v8 = vsel %vm1302_vm9, 1.0, %v4861_v42  ;;  %v1325_v48 = vsel %vm1309_vm11, 1.0, %v4861_v42 }
 0x366   :  { %4068 = vmatpush3.bf16.msra.mxu1 %v5442_v6 }
 0x367   :  { %v1214_v44 = vadd.f32 %v5417_v29, %v1200_v1  ;;  %1221 = vst [vmem:[#allocation6] sm:$0xff] %v1213_v10  ;;  %v5456_v61 = vpop.permute.xlu0 %1286 }
 0x369   :  { %1222 = vst [vmem:[#allocation6 + $0x8] sm:$0xff] %v1214_v44  ;;  %v5450_v13 = vpack.c.bf16 %v1214_v44, %v1213_v10 }
 0x36b   :  { %4069 = vmatprep.subr.bf16.mxu1 %v5450_v13  ;;  %v5459_v36 = vpop.permute.xlu0 %1292 }
 0x36c   :  { %4070 = vmatpush3.bf16.msra.mxu1 %v5450_v13 }
 0x36f   :  { %v5462_v11 = vpop.permute.xlu0 %1298 }
 0x373   :  { %v5466_v21 = vpop.permute.xlu0 %1360 }
 0x374   :  { %vm1405_vm12 = vcmp.eq.s32.totalorder %v5466_v21, %v5408_v20 }
 0x375   :  { %v1421_v21 = vsel %vm1405_vm12, 1.0, %v4861_v42 }
 0x377   :  { %v5469_v54 = vpop.permute.xlu0 %1366 }
 0x378   :  { %vm1407_vm2 = vcmp.eq.s32.totalorder %v5469_v54, %v5408_v20 }
 0x379   :  { %590 = vadd.xlane.f32.xlu1 %v5258_v43 }
 0x37b   :  { %v5472_v50 = vpop.permute.xlu0 %1372 }
 0x37c   :  { %vm1409_vm4 = vcmp.eq.s32.totalorder %v5472_v50, %v5408_v20 }
 0x37d   :  { %596 = vadd.xlane.f32.xlu1 %v5261_v7  ;;  %v1425_v50 = vsel %vm1409_vm4, 1.0, %v4861_v42 }
 0x37f   :  { %v5476_v3 = vpop.permute.xlu0 %1378 }
 0x380   :  { %vm1411_vm11 = vcmp.eq.s32.totalorder %v5476_v3, %v5408_v20 }
 0x381   :  { %600 = vadd.xlane.f32.xlu1 %v5273_v5 }
 0x383   :  { %v5479_v47 = vpop.permute.xlu0 %1384 }
 0x385   :  { %604 = vadd.xlane.f32.xlu1 %v5270_v46 }
 0x387   :  { %v5486_v63 = vpop.permute.xlu0 %1390 }
 0x389   :  { %v1160_v15 = vpop.xlane.xlu1 %1159  ;;  %608 = vadd.xlane.f32.xlu1 %v5283_v62 }
 0x38a   :  { %v1168_v52 = vmul.f32 0.0078125, %v1160_v15 }
 0x38b   :  { %v5490_v26 = vpop.permute.xlu0 %1396 }
 0x38c   :  { %v1176_v24 = vadd.f32 1e-05, %v1168_v52  ;;  %vm1417_vm4 = vcmp.eq.s32.totalorder %v5490_v26, %v5408_v20 }
 0x38d   :  { %v1156_v27 = vpop.xlane.xlu1 %1155  ;;  %612 = vadd.xlane.f32.xlu1 %v5280_v59 }
 0x38e   :  { %4581 = vrsqrt.f32 %v1176_v24  ;;  %v1166_v57 = vmul.f32 0.0078125, %v1156_v27 }
 0x390   :  { %v1174_v28 = vadd.f32 1e-05, %v1166_v57 }
 0x391   :  { %v1263_v19 = vpop.permute.xlu1 %1262  ;;  %616 = vadd.xlane.f32.xlu1 %v5293_v32 }
 0x392   :  { %4583 = vrsqrt.f32 %v1174_v28  ;;  %vm1303_vm7 = vcmp.eq.s32.totalorder %v1263_v19, %v5408_v20 }
 0x395   :  { %v1266_v30 = vpop.permute.xlu1 %1265  ;;  %620 = vadd.xlane.f32.xlu1 %v5290_v4 }
 0x396   :  { %vm1304_vm10 = vcmp.eq.s32.totalorder %v1266_v30, %v5408_v20 }
 0x397   :  { %v1320_v44 = vsel %vm1304_vm10, 1.0, %v4861_v42  ;;  %vm1313_vm10 = vcmp.eq.s32.totalorder %v5459_v36, %v5408_v20  ;;  %v1427_v36 = vsel %vm1411_vm11, 1.0, %v4861_v42 }
 0x399   :  { %v1269_v37 = vpop.permute.xlu1 %1268 }
 0x39a   :  { %vm1305_vm8 = vcmp.eq.s32.totalorder %v1269_v37, %v5408_v20 }
 0x39b   :  { %v4582_v55 = vpop.eup %4581 }
 0x39c   :  { %v1192_v2 = vmul.f32 %v4582_v55, %v5338_v16 }
 0x39d   :  { %v1272_v22 = vpop.permute.xlu1 %1271 }
 0x39e   :  { %v1206_v53 = vmul.f32 %v5412_v58, %v1192_v2  ;;  %vm1306_vm15 = vcmp.eq.s32.totalorder %v1272_v22, %v5408_v20  ;;  %v1423_v22 = vsel %vm1407_vm2, 1.0, %v4861_v42  ;;  %vm1415_vm2 = vcmp.eq.s32.totalorder %v5486_v63, %v5408_v20 }
 0x39f   :  { %v4584_v51 = vpop.eup %4583  ;;  %v1322_v37 = vsel %vm1306_vm15, 1.0, %v4861_v42  ;;  %vm1315_vm15 = vcmp.eq.s32.totalorder %v5462_v11, %v5408_v20 }
 0x3a0   :  { %v1220_v14 = vadd.f32 %v5417_v29, %v1206_v53  ;;  %v1190_v49 = vmul.f32 %v4584_v51, %v5344_v23 }
 0x3a1   :  { %v1275_v56 = vpop.permute.xlu1 %1274 }
 0x3a2   :  { %1228 = vst [vmem:[#allocation6 + $0x38] sm:$0xff] %v1220_v14  ;;  %v1462_v31 = vpack.c.bf16 %v1220_v14, %v5424_v9  ;;  %v1204_v39 = vmul.f32 %v5412_v58, %v1190_v49  ;;  %v5500_v9 = vpop.permute.xlu0 %1402  ;;  %vm1307_vm13 = vcmp.eq.s32.totalorder %v1275_v56, %v5408_v20 }
 0x3a3   :  { %v1323_v57 = vsel %vm1307_vm13, 1.0, %v4861_v42  ;;  %vm1413_vm13 = vcmp.eq.s32.totalorder %v5479_v47, %v5408_v20 }
 0x3a4   :  { %4043 = vmatprep.subr.bf16.mxu0 %v1462_v31  ;;  %v1218_v16 = vadd.f32 %v5417_v29, %v1204_v39  ;;  %v1319_v29 = vsel %vm1303_vm7, 1.0, %v4861_v42  ;;  %v1335_v2 = vpack.c.bf16 %v1323_v57, %v1322_v37  ;;  %v1433_v57 = vsel %vm1417_vm4, 1.0, %v4861_v42 }
 0x3a5   :  { %v1278_v60 = vpop.permute.xlu1 %1277  ;;  %4044 = vmatpush3.bf16.msra.mxu0 %v1462_v31  ;;  %v1333_v10 = vpack.c.bf16 %v1319_v29, %v1318_v8 }
 0x3a6   :  { %1226 = vst [vmem:[#allocation6 + $0x28] sm:$0xff] %v1218_v16  ;;  %v1461_v0 = vpack.c.bf16 %v1218_v16, %v5434_v45  ;;  %v1321_v45 = vsel %vm1305_vm8, 1.0, %v4861_v42  ;;  %vm1308_vm14 = vcmp.eq.s32.totalorder %v1278_v60, %v5408_v20  ;;  %vm1311_vm8 = vcmp.eq.s32.totalorder %v5456_v61, %v5408_v20 }
 0x3a7   :  { %v1334_v12 = vpack.c.bf16 %v1321_v45, %v1320_v44  ;;  %v1324_v19 = vsel %vm1308_vm14, 1.0, %v4861_v42  ;;  %v1327_v61 = vsel %vm1311_vm8, 1.0, %v4861_v42  ;;  %v1329_v60 = vsel %vm1313_vm10, 1.0, %v4861_v42  ;;  %v4402_v44 = vld [vmem:[%s6135_s0 + $0x30] sm:$0xff]  }
 0x3a8   :  { %4045 = vmatprep.subr.bf16.mxu0 %v1461_v0  ;;  %v1336_v53 = vpack.c.bf16 %v1325_v48, %v1324_v19  ;;  %v1429_v45 = vsel %vm1413_vm13, 1.0, %v4861_v42  ;;  %v4403_v48 = vld [vmem:[%s6135_s0 + $0x28] sm:$0xff]   ;;  %v4404_v19 = vld [vmem:[%s6135_s0 + $0x20] sm:$0xff]  }
 0x3a9   :  { %v1284_v23 = vpop.permute.xlu1 %1283  ;;  %4046 = vmatpush3.bf16.msra.mxu0 %v1461_v0 }
 0x3aa   :  { %4047 = vmatprep.subr.bf16.mxu0 %v5442_v6  ;;  %vm1310_vm5 = vcmp.eq.s32.totalorder %v1284_v23, %v5408_v20 }
 0x3ab   :  { %v1326_v49 = vsel %vm1310_vm5, 1.0, %v4861_v42 }
 0x3ac   :  { %v1337_v0 = vpack.c.bf16 %v1327_v61, %v1326_v49 }
 0x3ad   :  { %v1290_v58 = vpop.permute.xlu1 %1289  ;;  %4048 = vmatpush3.bf16.msra.mxu0 %v5442_v6 }
 0x3ae   :  { %4049 = vmatprep.subr.bf16.mxu0 %v5450_v13  ;;  %vm1312_vm7 = vcmp.eq.s32.totalorder %v1290_v58, %v5408_v20 }
 0x3af   :  { %v1328_v31 = vsel %vm1312_vm7, 1.0, %v4861_v42  ;;  %vm1419_vm7 = vcmp.eq.s32.totalorder %v5500_v9, %v5408_v20  ;;  %v4406_v9 = vld [vmem:[%s6135_s0 + $0x10] sm:$0xff]  }
 0x3b0   :  { %v1338_v23 = vpack.c.bf16 %v1329_v60, %v1328_v31 }
 0x3b1   :  { %v5504_v1 = vpop.permute.xlu1 %1295  ;;  %4050 = vmatpush3.bf16.msra.mxu0 %v5450_v13 }
 0x3b2   :  { %vm1314_vm14 = vcmp.eq.s32.totalorder %v5504_v1, %v5408_v20 }
 0x3b3   :  { %v593_v15 = vpop.xlane.xlu0 %592  ;;  %v1330_v47 = vsel %vm1314_vm14, 1.0, %v4861_v42 }
 0x3b4   :  { %v624_v52 = vmul.f32 0.0078125, %v593_v15  ;;  %4052 = vmatmul.mubr.msk.bf16.vlgmr.msra.gmra.mxu0 %vm1463_vm6, %v1333_v10  ;;  %v4401_v10 = vld [vmem:[%s6135_s0 + $0x38] sm:$0xff]  }
 0x3b5   :  { %v1358_v24 = vpop.permute.xlu1 %1357  ;;  %4055 = vmatprep.mubr.msk.bf16.mxu0 %vm1463_vm6, %v1334_v12  ;;  %v1331_v12 = vsel %vm1315_vm15, 1.0, %v4861_v42  ;;  %4087 = vmatprep.subr.bf16.mxu0 %v4401_v10 }
 0x3b6   :  { %v5518_v27 = vsub.f32 %v5359_v33, %v624_v52  ;;  %vm1404_vm0 = vcmp.eq.s32.totalorder %v1358_v24, %v5408_v20  ;;  %v1339_v15 = vpack.c.bf16 %v1331_v12, %v1330_v47  ;;  %v1431_v52 = vsel %vm1415_vm2, 1.0, %v4861_v42  ;;  %4088 = vmatpush3.bf16.msra.mxu0 %v4401_v10  ;;  %v4414_v12 = vld [vmem:[%s6137_s9 + $0x38] sm:$0xff]  }
 0x3b7   :  { %v1420_v28 = vsel %vm1404_vm0, 1.0, %v4861_v42  ;;  %4089 = vmatprep.subr.bf16.mxu0 %v4402_v44  ;;  %4119 = vmatprep.subr.bf16.mxu1 %v4414_v12 }
 0x3b8   :  { %v1436_v30 = vpack.c.bf16 %v1421_v21, %v1420_v28  ;;  %v656_v33 = vmul.f32 %v5518_v27, %v5518_v27 }
 0x3b9   :  { %v1364_v55 = vpop.permute.xlu1 %1363 }
 0x3ba   :  { %vm1406_vm3 = vcmp.eq.s32.totalorder %v1364_v55, %v5408_v20  ;;  %4071 = vmatprep.mubr.msk.bf16.mxu1 %vm1585_vm1, %v1436_v30  ;;  %673 = vadd.xlane.f32.xlu1 %v656_v33  ;;  %v1435_v33 = vsel %vm1419_vm7, 1.0, %v4861_v42 }
 0x3bb   :  { %v1422_v54 = vsel %vm1406_vm3, 1.0, %v4861_v42  ;;  %4090 = vmatpush3.bf16.msra.mxu0 %v4402_v44 }
 0x3bc   :  { %v1437_v51 = vpack.c.bf16 %v1423_v22, %v1422_v54  ;;  %4056 = vmatmul.mubr.msk.bf16.gmra.mxu0 %vm1463_vm6, %v1335_v2  ;;  %4091 = vmatprep.subr.bf16.mxu0 %v4403_v48  ;;  %v4405_v2 = vld [vmem:[%s6135_s0 + $0x18] sm:$0xff]   ;;  %v4407_v22 = vld [vmem:[%s6135_s0 + $0x8] sm:$0xff]  }
 0x3bd   :  { %v1370_v14 = vpop.permute.xlu1 %1369  ;;  %4059 = vmatprep.mubr.msk.bf16.mxu0 %vm1463_vm6, %v1336_v53  ;;  %v4408_v53 = vld [vmem:[%s6135_s0] sm:$0xff]   ;;  %v5602_v54 = vld [vmem:[%s6136_s5 + $0x38] sm:$0xff]  }
 0x3be   :  { %vm1408_vm9 = vcmp.eq.s32.totalorder %v1370_v14, %v5408_v20  ;;  %4072 = vmatmul.mubr.msk.bf16.vlgmr.msra.gmra.mxu1 %vm1585_vm1, %v1437_v51 }
 0x3bf   :  { %v1424_v56 = vsel %vm1408_vm9, 1.0, %v4861_v42  ;;  %4092 = vmatpush3.bf16.msra.mxu0 %v4403_v48  ;;  %4120 = vmatpush3.bf16.msra.mxu1 %v4414_v12 }
 0x3c0   :  { %v1438_v39 = vpack.c.bf16 %v1425_v50, %v1424_v56  ;;  %4093 = vmatprep.subr.bf16.mxu0 %v4404_v19 }
 0x3c1   :  { %v1376_v16 = vpop.permute.xlu1 %1375 }
 0x3c2   :  { %vm1410_vm12 = vcmp.eq.s32.totalorder %v1376_v16, %v5408_v20  ;;  %4075 = vmatprep.mubr.msk.bf16.mxu1 %vm1585_vm1, %v1438_v39 }
 0x3c3   :  { %v1426_v58 = vsel %vm1410_vm12, 1.0, %v4861_v42  ;;  %4094 = vmatpush3.bf16.msra.mxu0 %v4404_v19 }
 0x3c4   :  { %v1439_v3 = vpack.c.bf16 %v1427_v36, %v1426_v58  ;;  %4060 = vmatmul.mubr.msk.bf16.gmra.mxu0 %vm1463_vm6, %v1337_v0  ;;  %4095 = vmatprep.subr.bf16.mxu0 %v4405_v2 }
 0x3c5   :  { %v1382_v29 = vpop.permute.xlu1 %1381  ;;  %4063 = vmatprep.mubr.msk.bf16.mxu0 %vm1463_vm6, %v1338_v23 }
 0x3c6   :  { %vm1412_vm0 = vcmp.eq.s32.totalorder %v1382_v29, %v5408_v20  ;;  %4076 = vmatmul.mubr.msk.bf16.gmra.mxu1 %vm1585_vm1, %v1439_v3 }
 0x3c7   :  { %v1428_v8 = vsel %vm1412_vm0, 1.0, %v4861_v42  ;;  %4096 = vmatpush3.bf16.msra.mxu0 %v4405_v2 }
 0x3c8   :  { %v1440_v1 = vpack.c.bf16 %v1429_v45, %v1428_v8  ;;  %4097 = vmatprep.subr.bf16.mxu0 %v4406_v9 }
 0x3c9   :  { %v1388_v11 = vpop.permute.xlu1 %1387 }
 0x3ca   :  { %vm1414_vm3 = vcmp.eq.s32.totalorder %v1388_v11, %v5408_v20  ;;  %4079 = vmatprep.mubr.msk.bf16.mxu1 %vm1585_vm1, %v1440_v1 }
 0x3cb   :  { %v1430_v24 = vsel %vm1414_vm3, 1.0, %v4861_v42  ;;  %4098 = vmatpush3.bf16.msra.mxu0 %v4406_v9 }
 0x3cc   :  { %v1441_v63 = vpack.c.bf16 %v1431_v52, %v1430_v24  ;;  %4064 = vmatmul.mubr.msk.bf16.gmra.mxu0 %vm1463_vm6, %v1339_v15  ;;  %4099 = vmatprep.subr.bf16.mxu0 %v4407_v22 }
 0x3cd   :  { %v1394_v21 = vpop.permute.xlu1 %1393 }
 0x3ce   :  { %vm1416_vm5 = vcmp.eq.s32.totalorder %v1394_v21, %v5408_v20  ;;  %4080 = vmatmul.mubr.msk.bf16.gmra.mxu1 %vm1585_vm1, %v1441_v63 }
 0x3cf   :  { %v1432_v28 = vsel %vm1416_vm5, 1.0, %v4861_v42  ;;  %4100 = vmatpush3.bf16.msra.mxu0 %v4407_v22 }
 0x3d0   :  { %v1442_v26 = vpack.c.bf16 %v1433_v57, %v1432_v28  ;;  %4101 = vmatprep.subr.bf16.mxu0 %v4408_v53 }
 0x3d1   :  { %v1400_v30 = vpop.permute.xlu1 %1399 }
 0x3d2   :  { %vm1418_vm6 = vcmp.eq.s32.totalorder %v1400_v30, %v5408_v20  ;;  %4083 = vmatprep.mubr.msk.bf16.mxu1 %vm1585_vm1, %v1442_v26  ;;  %v595_v20 = vpop.xlane.xlu0 %594 }
 0x3d3   :  { %v1434_v37 = vsel %vm1418_vm6, 1.0, %v4861_v42  ;;  %4102 = vmatpush3.bf16.msra.mxu0 %v4408_v53  ;;  %v625_v50 = vmul.f32 0.0078125, %v595_v20  ;;  %v4420_v53 = vld [vmem:[%s6137_s9 + $0x20] sm:$0xff]  }
 0x3d4   :  { %v1443_v55 = vpack.c.bf16 %v1435_v33, %v1434_v37  ;;  %4151 = vmatprep.subr.bf16.mxu0 %v5602_v54 }
 0x3d5   :  { %v5609_v16 = vsub.f32 %v5365_v34, %v625_v50 }
 0x3d6   :  { %4084 = vmatmul.mubr.msk.bf16.gmra.mxu1 %vm1585_vm1, %v1443_v55  ;;  %v599_v42 = vpop.xlane.xlu0 %598 }
 0x3d7   :  { %v627_v31 = vmul.f32 0.0078125, %v599_v42  ;;  %v657_v29 = vmul.f32 %v5609_v16, %v5609_v16 }
 0x3d9   :  { %v5617_v23 = vsub.f32 %v5371_v38, %v627_v31 }
 0x3da   :  { %v603_v51 = vpop.xlane.xlu0 %602 }
 0x3db   :  { %v629_v58 = vmul.f32 0.0078125, %v603_v51  ;;  %v659_v38 = vmul.f32 %v5617_v23, %v5617_v23 }
 0x3dd   :  { %v5629_v8 = vsub.f32 %v5377_v40, %v629_v58 }
 0x3de   :  { %v607_v39 = vpop.xlane.xlu0 %606 }
 0x3df   :  { %v631_v1 = vmul.f32 0.0078125, %v607_v39  ;;  %v661_v63 = vmul.f32 %v5629_v8, %v5629_v8  ;;  %v4422_v39 = vld [vmem:[%s6137_s9 + $0x10] sm:$0xff]  }
 0x3e1   :  { %v5638_v24 = vsub.f32 %v5383_v41, %v631_v1 }
 0x3e2   :  { %v611_v45 = vpop.xlane.xlu0 %610 }
 0x3e3   :  { %v663_v19 = vmul.f32 %v5638_v24, %v5638_v24 }
 0x3e6   :  { %v615_v15 = vpop.xlane.xlu0 %614 }
 0x3e7   :  { %v635_v28 = vmul.f32 0.0078125, %v615_v15 }
 0x3e9   :  { %v5662_v2 = vsub.f32 %v5395_v35, %v635_v28 }
 0x3ea   :  { %v619_v33 = vpop.xlane.xlu0 %618 }
 0x3eb   :  { %v637_v9 = vmul.f32 0.0078125, %v619_v33 }
 0x3ed   :  { %v5671_v51 = vsub.f32 %v5401_v17, %v637_v9 }
 0x3ef   :  { %v669_v17 = vmul.f32 %v5671_v51, %v5671_v51 }
 0x402   :  { %v591_v14 = vpop.xlane.xlu1 %590 }
 0x403   :  { %v623_v49 = vmul.f32 0.0078125, %v591_v14  ;;  %v667_v14 = vmul.f32 %v5662_v2, %v5662_v2 }
 0x405   :  { %v5606_v56 = vsub.f32 %v5258_v43, %v623_v49  ;;  %v4421_v49 = vld [vmem:[%s6137_s9 + $0x18] sm:$0xff]  }
 0x406   :  { %v597_v61 = vpop.xlane.xlu1 %596 }
 0x407   :  { %v626_v60 = vmul.f32 0.0078125, %v597_v61  ;;  %v655_v0 = vmul.f32 %v5606_v56, %v5606_v56  ;;  %v4423_v61 = vld [vmem:[%s6137_s9 + $0x8] sm:$0xff]  }
 0x409   :  { %v5614_v36 = vsub.f32 %v5261_v7, %v626_v60  ;;  %671 = vadd.xlane.f32.xlu0 %v655_v0 }
 0x40a   :  { %v601_v43 = vpop.xlane.xlu1 %600 }
 0x40b   :  { %v628_v3 = vmul.f32 0.0078125, %v601_v43  ;;  %v658_v34 = vmul.f32 %v5614_v36, %v5614_v36 }
 0x40d   :  { %v5624_v47 = vsub.f32 %v5273_v5, %v628_v3  ;;  %675 = vadd.xlane.f32.xlu0 %v657_v29  ;;  %677 = vadd.xlane.f32.xlu1 %v658_v34  ;;  %v633_v5 = vmul.f32 0.0078125, %v611_v45  ;;  %v4410_v45 = vld [vmem:[%s6136_s5 + $0x30] sm:$0xff]  }
 0x40e   :  { %v605_v7 = vpop.xlane.xlu1 %604 }
 0x40f   :  { %v630_v10 = vmul.f32 0.0078125, %v605_v7  ;;  %v660_v44 = vmul.f32 %v5624_v47, %v5624_v47  ;;  %v5649_v57 = vsub.f32 %v5389_v18, %v633_v5 }
 0x411   :  { %v5635_v11 = vsub.f32 %v5270_v46, %v630_v10  ;;  %679 = vadd.xlane.f32.xlu0 %v659_v38  ;;  %681 = vadd.xlane.f32.xlu1 %v660_v44  ;;  %v4416_v46 = vld [vmem:[%s6137_s9 + $0x30] sm:$0xff]   ;;  %v665_v55 = vmul.f32 %v5649_v57, %v5649_v57  ;;  %v4411_v44 = vld [vmem:[%s6136_s5 + $0x28] sm:$0xff]  }
 0x412   :  { %v609_v52 = vpop.xlane.xlu1 %608  ;;  %4121 = vmatprep.subr.bf16.mxu1 %v4416_v46 }
 0x413   :  { %v632_v40 = vmul.f32 0.0078125, %v609_v52  ;;  %v662_v48 = vmul.f32 %v5635_v11, %v5635_v11  ;;  %4122 = vmatpush3.bf16.msra.mxu1 %v4416_v46 }
 0x415   :  { %v5646_v21 = vsub.f32 %v5283_v62, %v632_v40  ;;  %683 = vadd.xlane.f32.xlu0 %v661_v63  ;;  %685 = vadd.xlane.f32.xlu1 %v662_v48  ;;  %v4418_v62 = vld [vmem:[%s6137_s9 + $0x28] sm:$0xff]   ;;  %v4412_v48 = vld [vmem:[%s6136_s5 + $0x20] sm:$0xff]  }
 0x416   :  { %v613_v41 = vpop.xlane.xlu1 %612  ;;  %4123 = vmatprep.subr.bf16.mxu1 %v4418_v62 }
 0x417   :  { %v634_v26 = vmul.f32 0.0078125, %v613_v41  ;;  %v664_v30 = vmul.f32 %v5646_v21, %v5646_v21  ;;  %4124 = vmatpush3.bf16.msra.mxu1 %v4418_v62 }
 0x418   :  { %4125 = vmatprep.subr.bf16.mxu1 %v4420_v53 }
 0x419   :  { %v5657_v37 = vsub.f32 %v5280_v59, %v634_v26  ;;  %687 = vadd.xlane.f32.xlu0 %v663_v19  ;;  %689 = vadd.xlane.f32.xlu1 %v664_v30  ;;  %v4413_v19 = vld [vmem:[%s6136_s5 + $0x18] sm:$0xff]  }
 0x41a   :  { %v617_v18 = vpop.xlane.xlu1 %616 }
 0x41b   :  { %v636_v20 = vmul.f32 0.0078125, %v617_v18  ;;  %v666_v22 = vmul.f32 %v5657_v37, %v5657_v37  ;;  %4126 = vmatpush3.bf16.msra.mxu1 %v4420_v53 }
 0x41c   :  { %4127 = vmatprep.subr.bf16.mxu1 %v4421_v49 }
 0x41d   :  { %v5668_v59 = vsub.f32 %v5293_v32, %v636_v20  ;;  %691 = vadd.xlane.f32.xlu0 %v665_v55  ;;  %693 = vadd.xlane.f32.xlu1 %v666_v22  ;;  %v4415_v22 = vld [vmem:[%s6136_s5 + $0x10] sm:$0xff]  }
 0x41e   :  { %v621_v42 = vpop.xlane.xlu1 %620 }
 0x41f   :  { %v638_v35 = vmul.f32 0.0078125, %v621_v42  ;;  %v668_v50 = vmul.f32 %v5668_v59, %v5668_v59  ;;  %4128 = vmatpush3.bf16.msra.mxu1 %v4421_v49 }
 0x420   :  { %4129 = vmatprep.subr.bf16.mxu1 %v4422_v39 }
 0x421   :  { %v5679_v32 = vsub.f32 %v5290_v4, %v638_v35  ;;  %695 = vadd.xlane.f32.xlu0 %v667_v14  ;;  %697 = vadd.xlane.f32.xlu1 %v668_v50  ;;  %v4424_v4 = vld [vmem:[%s6137_s9] sm:$0xff]   ;;  %v4417_v50 = vld [vmem:[%s6136_s5 + $0x8] sm:$0xff]  }
 0x423   :  { %v670_v31 = vmul.f32 %v5679_v32, %v5679_v32  ;;  %4130 = vmatpush3.bf16.msra.mxu1 %v4422_v39 }
 0x424   :  { %4131 = vmatprep.subr.bf16.mxu1 %v4423_v61 }
 0x425   :  { %699 = vadd.xlane.f32.xlu0 %v669_v17  ;;  %701 = vadd.xlane.f32.xlu1 %v670_v31 }
 0x427   :  { %4132 = vmatpush3.bf16.msra.mxu1 %v4423_v61 }
 0x428   :  { %4133 = vmatprep.subr.bf16.mxu1 %v4424_v4 }
 0x42b   :  { %4134 = vmatpush3.bf16.msra.mxu1 %v4424_v4 }
 0x474   :  { %v4053_v60 = vpop.f32.mrf.mxu0 }
 0x476   :  { %v1522_v0 = vpop.f32.mrf.mxu0 }
 0x478   :  { %v4054_v43 = vpop.f32.mrf.mxu0 }
 0x479   :  { %v1748_v29 = vpack.c.bf16 %v4054_v43, %v4053_v60  ;;  %v4419_v60 = vld [vmem:[%s6136_s5] sm:$0xff]  }
 0x47a   :  { %v1525_v58 = vpop.f32.mrf.mxu0 }
 0x47b   :  { %v1747_v3 = vpack.c.bf16 %v1525_v58, %v1522_v0 }
 0x47c   :  { %v4057_v34 = vpop.f32.mrf.mxu0 }
 0x47d   :  { %4103 = vmatprep.mubr.bf16.mxu0 %v1747_v3 }
 0x47e   :  { %v1538_v7 = vpop.f32.mrf.mxu0  ;;  %v5689_v38 = vpop.f32.mrf.mxu1  ;;  %4104 = vmatmul.mubr.bf16.vlgmr.msra.gmra.mxu0 %v1748_v29 }
 0x47f   :  { %4152 = vmatpush3.bf16.msra.mxu0 %v5602_v54  ;;  %v674_v54 = vpop.xlane.xlu1 %673 }
 0x480   :  { %v4058_v1 = vpop.f32.mrf.mxu0  ;;  %v1644_v10 = vpop.f32.mrf.mxu1  ;;  %4153 = vmatprep.subr.bf16.mxu0 %v4410_v45  ;;  %v704_v30 = vmul.f32 0.0078125, %v674_v54 }
 0x481   :  { %v1750_v52 = vpack.c.bf16 %v4058_v1, %v4057_v34 }
 0x482   :  { %v1541_v12 = vpop.f32.mrf.mxu0  ;;  %v5693_v5 = vpop.f32.mrf.mxu1  ;;  %v720_v53 = vadd.f32 1e-05, %v704_v30 }
 0x483   :  { %v1749_v15 = vpack.c.bf16 %v1541_v12, %v1538_v7  ;;  %4154 = vmatpush3.bf16.msra.mxu0 %v4410_v45 }
 0x484   :  { %v4061_v40 = vpop.f32.mrf.mxu0  ;;  %v1647_v63 = vpop.f32.mrf.mxu1  ;;  %4155 = vmatprep.subr.bf16.mxu0 %v4411_v44  ;;  %4585 = vrsqrt.f32 %v720_v53  ;;  %v5719_v53 = vld [vmem:[%s6138_s13] ss:$0 sm:$0xff] }
 0x485   :  { %4107 = vmatprep.mubr.bf16.mxu0 %v1749_v15  ;;  %v2061_v0 = vpack.c.bf16 %v1647_v63, %v1644_v10 }
 0x486   :  { %v1554_v46 = vpop.f32.mrf.mxu0  ;;  %v5696_v41 = vpop.f32.mrf.mxu1  ;;  %4108 = vmatmul.mubr.bf16.gmra.mxu0 %v1750_v52  ;;  %v2062_v52 = vpack.c.bf16 %v5693_v5, %v5689_v38 }
 0x487   :  { %4156 = vmatpush3.bf16.msra.mxu0 %v4411_v44 }
 0x488   :  { %v4062_v28 = vpop.f32.mrf.mxu0  ;;  %v5698_v26 = vpop.f32.mrf.mxu1  ;;  %4157 = vmatprep.subr.bf16.mxu0 %v4412_v48 }
 0x489   :  { %v1752_v55 = vpack.c.bf16 %v4062_v28, %v4061_v40 }
 0x48a   :  { %v1557_v33 = vpop.f32.mrf.mxu0  ;;  %v5701_v62 = vpop.f32.mrf.mxu1 }
 0x48b   :  { %v1751_v18 = vpack.c.bf16 %v1557_v33, %v1554_v46  ;;  %4158 = vmatpush3.bf16.msra.mxu0 %v4412_v48 }
 0x48c   :  { %v4065_v9 = vpop.f32.mrf.mxu0  ;;  %v1663_v20 = vpop.f32.mrf.mxu1  ;;  %4159 = vmatprep.subr.bf16.mxu0 %v4413_v19 }
 0x48d   :  { %4111 = vmatprep.mubr.bf16.mxu0 %v1751_v18  ;;  %v2063_v63 = vpack.c.bf16 %v1663_v20, %v5698_v26 }
 0x48e   :  { %v1570_v42 = vpop.f32.mrf.mxu0  ;;  %v5704_v35 = vpop.f32.mrf.mxu1  ;;  %4112 = vmatmul.mubr.bf16.gmra.mxu0 %v1752_v55 }
 0x48f   :  { %4160 = vmatpush3.bf16.msra.mxu0 %v4413_v19 }
 0x490   :  { %v4066_v14 = vpop.f32.mrf.mxu0  ;;  %4161 = vmatprep.subr.bf16.mxu0 %v4415_v22  ;;  %v5707_v49 = vpop.f32.mrf.mxu1 }
 0x491   :  { %v1754_v61 = vpack.c.bf16 %v4066_v14, %v4065_v9  ;;  %v4586_v19 = vpop.eup %4585 }
 0x492   :  { %v1573_v17 = vpop.f32.mrf.mxu0  ;;  %v672_v39 = vpop.xlane.xlu0 %671  ;;  %v752_v26 = vmul.f32 %v4586_v19, %v5518_v27 }
 0x493   :  { %v1753_v31 = vpack.c.bf16 %v1573_v17, %v1570_v42  ;;  %4162 = vmatpush3.bf16.msra.mxu0 %v4415_v22  ;;  %v703_v4 = vmul.f32 0.0078125, %v672_v39  ;;  %v5710_v43 = vpop.f32.mrf.mxu1  ;;  %v2064_v42 = vpack.c.bf16 %v5701_v62, %v5696_v41  ;;  %v5729_v41 = vld [vmem:[%s6139_s17] ss:$0 sm:$0xff] }
 0x494   :  { %4163 = vmatprep.subr.bf16.mxu0 %v4417_v50 }
 0x495   :  { %4115 = vmatprep.mubr.bf16.mxu0 %v1753_v31  ;;  %v719_v58 = vadd.f32 1e-05, %v703_v4  ;;  %v1679_v1 = vpop.f32.mrf.mxu1 }
 0x496   :  { %4116 = vmatmul.mubr.bf16.gmra.mxu0 %v1754_v61  ;;  %v678_v3 = vpop.xlane.xlu1 %677  ;;  %v676_v29 = vpop.xlane.xlu0 %675  ;;  %v2065_v17 = vpack.c.bf16 %v1679_v1, %v5707_v49 }
 0x497   :  { %v706_v34 = vmul.f32 0.0078125, %v678_v3  ;;  %4164 = vmatpush3.bf16.msra.mxu0 %v4417_v50  ;;  %4167 = vmatprep.mubr.bf16.mxu0 %v2061_v0  ;;  %4587 = vrsqrt.f32 %v719_v58  ;;  %v705_v45 = vmul.f32 0.0078125, %v676_v29  ;;  %v5715_v46 = vpop.f32.mrf.mxu1 }
 0x498   :  { %4165 = vmatprep.subr.bf16.mxu0 %v4419_v60 }
 0x499   :  { %v722_v7 = vadd.f32 1e-05, %v706_v34  ;;  %v721_v44 = vadd.f32 1e-05, %v705_v45  ;;  %v1692_v38 = vpop.f32.mrf.mxu1 }
 0x49a   :  { %v682_v12 = vpop.xlane.xlu1 %681  ;;  %v680_v15 = vpop.xlane.xlu0 %679 }
 0x49b   :  { %4589 = vrsqrt.f32 %v722_v7  ;;  %v708_v10 = vmul.f32 0.0078125, %v682_v12  ;;  %4166 = vmatpush3.bf16.msra.mxu0 %v4419_v60  ;;  %v707_v40 = vmul.f32 0.0078125, %v680_v15  ;;  %v5724_v39 = vpop.f32.mrf.mxu1  ;;  %v774_v60 = vmul.f32 %v5719_v53, %v752_v26 }
 0x49c   :  { %4591 = vrsqrt.f32 %v721_v44 }
 0x49d   :  { %v724_v48 = vadd.f32 1e-05, %v708_v10  ;;  %v723_v54 = vadd.f32 1e-05, %v707_v40  ;;  %v796_v15 = vadd.f32 %v5729_v41, %v774_v60  ;;  %v2066_v10 = vpack.c.bf16 %v5710_v43, %v5704_v35 }
 0x49e   :  { %4168 = vmatmul.mubr.bf16.vlgmr.msra.gmra.mxu0 %v2062_v52  ;;  %v686_v28 = vpop.xlane.xlu1 %685  ;;  %v684_v30 = vpop.xlane.xlu0 %683 }
 0x49f   :  { %4593 = vrsqrt.f32 %v724_v48  ;;  %v710_v33 = vmul.f32 0.0078125, %v686_v28  ;;  %4171 = vmatprep.mubr.bf16.mxu0 %v2063_v63  ;;  %v709_v18 = vmul.f32 0.0078125, %v684_v30 }
 0x4a0   :  { %4595 = vrsqrt.f32 %v723_v54 }
 0x4a1   :  { %v726_v55 = vadd.f32 1e-05, %v710_v33  ;;  %v725_v5 = vadd.f32 1e-05, %v709_v18 }
 0x4a2   :  { %v690_v9 = vpop.xlane.xlu1 %689  ;;  %v688_v20 = vpop.xlane.xlu0 %687 }
 0x4a3   :  { %4597 = vrsqrt.f32 %v726_v55  ;;  %v712_v22 = vmul.f32 0.0078125, %v690_v9  ;;  %v711_v14 = vmul.f32 0.0078125, %v688_v20 }
 0x4a4   :  { %4599 = vrsqrt.f32 %v725_v5  ;;  %v4588_v50 = vpop.eup %4587 }
 0x4a5   :  { %v728_v31 = vadd.f32 1e-05, %v712_v22  ;;  %v727_v61 = vadd.f32 1e-05, %v711_v14  ;;  %v751_v4 = vmul.f32 %v4588_v50, %v5606_v56  ;;  %v1695_v56 = vpop.f32.mrf.mxu1 }
 0x4a6   :  { %4172 = vmatmul.mubr.bf16.gmra.mxu0 %v2064_v42  ;;  %v694_v27 = vpop.xlane.xlu1 %693  ;;  %v692_v0 = vpop.xlane.xlu0 %691  ;;  %v2067_v19 = vpack.c.bf16 %v1695_v56, %v1692_v38 }
 0x4a7   :  { %4601 = vrsqrt.f32 %v728_v31  ;;  %v714_v58 = vmul.f32 0.0078125, %v694_v27  ;;  %4175 = vmatprep.mubr.bf16.mxu0 %v2065_v17  ;;  %v713_v3 = vmul.f32 0.0078125, %v692_v0  ;;  %v773_v49 = vmul.f32 %v5719_v53, %v751_v4 }
 0x4a8   :  { %v4590_v62 = vpop.eup %4589  ;;  %4603 = vrsqrt.f32 %v727_v61  ;;  %v2068_v0 = vpack.c.bf16 %v5724_v39, %v5715_v46 }
 0x4a9   :  { %v4592_v29 = vpop.eup %4591  ;;  %v754_v34 = vmul.f32 %v4590_v62, %v5614_v36  ;;  %v730_v45 = vadd.f32 1e-05, %v714_v58  ;;  %v729_v1 = vadd.f32 1e-05, %v713_v3  ;;  %v795_v12 = vadd.f32 %v5729_v41, %v773_v49 }
 0x4aa   :  { %v753_v7 = vmul.f32 %v4592_v29, %v5609_v16  ;;  %v698_v44 = vpop.xlane.xlu1 %697  ;;  %v696_v52 = vpop.xlane.xlu0 %695 }
 0x4ab   :  { %4605 = vrsqrt.f32 %v730_v45  ;;  %v716_v40 = vmul.f32 0.0078125, %v698_v44  ;;  %v776_v63 = vmul.f32 %v5719_v53, %v754_v34  ;;  %v715_v36 = vmul.f32 0.0078125, %v696_v52 }
 0x4ac   :  { %v4594_v48 = vpop.eup %4593  ;;  %4607 = vrsqrt.f32 %v729_v1  ;;  %v1723_v54 = vpack.c.bf16 %v796_v15, %v795_v12  ;;  %v775_v16 = vmul.f32 %v5719_v53, %v753_v7 }
 0x4ad   :  { %v4596_v28 = vpop.eup %4595  ;;  %v732_v30 = vadd.f32 1e-05, %v716_v40  ;;  %v798_v33 = vadd.f32 %v5729_v41, %v776_v63  ;;  %v756_v18 = vmul.f32 %v4594_v48, %v5624_v47  ;;  %v731_v55 = vadd.f32 1e-05, %v715_v36 }
 0x4ae   :  { %4135 = vmatprep.mubr.bf16.mxu1 %v1723_v54  ;;  %4176 = vmatmul.mubr.bf16.gmra.mxu0 %v2066_v10  ;;  %v702_v35 = vpop.xlane.xlu1 %701  ;;  %v797_v43 = vadd.f32 %v5729_v41, %v775_v16  ;;  %v755_v5 = vmul.f32 %v4596_v28, %v5617_v23  ;;  %v700_v9 = vpop.xlane.xlu0 %699 }
 0x4af   :  { %4609 = vrsqrt.f32 %v732_v30  ;;  %v718_v26 = vmul.f32 0.0078125, %v702_v35  ;;  %4179 = vmatprep.mubr.bf16.mxu0 %v2067_v19  ;;  %v778_v20 = vmul.f32 %v5719_v53, %v756_v18  ;;  %v717_v22 = vmul.f32 0.0078125, %v700_v9  ;;  %v4427_v9 = vld [vmem:[%s6140_s25 + $0x28] sm:$0xff]  }
 0x4b0   :  { %v4598_v38 = vpop.eup %4597  ;;  %4611 = vrsqrt.f32 %v731_v55  ;;  %v1724_v42 = vpack.c.bf16 %v798_v33, %v797_v43  ;;  %v777_v47 = vmul.f32 %v5719_v53, %v755_v5 }
 0x4b1   :  { %v4600_v14 = vpop.eup %4599  ;;  %v734_v50 = vadd.f32 1e-05, %v718_v26  ;;  %v800_v17 = vadd.f32 %v5729_v41, %v778_v20  ;;  %v758_v31 = vmul.f32 %v4598_v38, %v5635_v11  ;;  %v733_v61 = vadd.f32 1e-05, %v717_v22  ;;  %v4429_v26 = vld [vmem:[%s6140_s25 + $0x18] sm:$0xff]   ;;  %v4431_v20 = vld [vmem:[%s6140_s25 + $0x8] sm:$0xff]  }
 0x4b2   :  { %4136 = vmatmul.mubr.bf16.vlgmr.msra.gmra.mxu1 %v1724_v42  ;;  %v799_v23 = vadd.f32 %v5729_v41, %v777_v47  ;;  %v757_v27 = vmul.f32 %v4600_v14, %v5629_v8  ;;  %v4432_v38 = vld [vmem:[%s6140_s25] sm:$0xff]  }
 0x4b3   :  { %4613 = vrsqrt.f32 %v734_v50  ;;  %v780_v4 = vmul.f32 %v5719_v53, %v758_v31 }
 0x4b4   :  { %v4602_v60 = vpop.eup %4601  ;;  %4615 = vrsqrt.f32 %v733_v61  ;;  %v1725_v58 = vpack.c.bf16 %v800_v17, %v799_v23  ;;  %v779_v62 = vmul.f32 %v5719_v53, %v757_v27 }
 0x4b5   :  { %v4604_v3 = vpop.eup %4603  ;;  %v802_v11 = vadd.f32 %v5729_v41, %v780_v4  ;;  %v760_v49 = vmul.f32 %v4602_v60, %v5646_v21 }
 0x4b6   :  { %4139 = vmatprep.mubr.bf16.mxu1 %v1725_v58  ;;  %4180 = vmatmul.mubr.bf16.gmra.mxu0 %v2068_v0  ;;  %v801_v8 = vadd.f32 %v5729_v41, %v779_v62  ;;  %v759_v29 = vmul.f32 %v4604_v3, %v5638_v24 }
 0x4b7   :  { %v782_v34 = vmul.f32 %v5719_v53, %v760_v49 }
 0x4b8   :  { %v4606_v45 = vpop.eup %4605  ;;  %v1726_v7 = vpack.c.bf16 %v802_v11, %v801_v8  ;;  %v781_v46 = vmul.f32 %v5719_v53, %v759_v29 }
 0x4b9   :  { %v4608_v39 = vpop.eup %4607  ;;  %v804_v56 = vadd.f32 %v5729_v41, %v782_v34  ;;  %v762_v1 = vmul.f32 %v4606_v45, %v5657_v37 }
 0x4ba   :  { %4140 = vmatmul.mubr.bf16.gmra.mxu1 %v1726_v7  ;;  %v803_v21 = vadd.f32 %v5729_v41, %v781_v46  ;;  %v761_v44 = vmul.f32 %v4608_v39, %v5649_v57 }
 0x4bb   :  { %v784_v12 = vmul.f32 %v5719_v53, %v762_v1  ;;  %v5805_v1 = vld [vmem:[%s6141_s29] ss:$0 sm:$0xff] }
 0x4bc   :  { %v4610_v15 = vpop.eup %4609  ;;  %v1727_v24 = vpack.c.bf16 %v804_v56, %v803_v21  ;;  %v783_v10 = vmul.f32 %v5719_v53, %v761_v44 }
 0x4bd   :  { %v4612_v52 = vpop.eup %4611  ;;  %v806_v40 = vadd.f32 %v5729_v41, %v784_v12  ;;  %v764_v63 = vmul.f32 %v4610_v15, %v5668_v59 }
 0x4be   :  { %4143 = vmatprep.mubr.bf16.mxu1 %v1727_v24  ;;  %v805_v48 = vadd.f32 %v5729_v41, %v783_v10  ;;  %v763_v37 = vmul.f32 %v4612_v52, %v5662_v2 }
 0x4bf   :  { %v786_v36 = vmul.f32 %v5719_v53, %v764_v63 }
 0x4c0   :  { %v4614_v54 = vpop.eup %4613  ;;  %v1728_v57 = vpack.c.bf16 %v806_v40, %v805_v48  ;;  %v785_v16 = vmul.f32 %v5719_v53, %v763_v37 }
 0x4c1   :  { %v4616_v28 = vpop.eup %4615  ;;  %v808_v19 = vadd.f32 %v5729_v41, %v786_v36  ;;  %v766_v30 = vmul.f32 %v4614_v54, %v5679_v32  ;;  %v4425_v32 = vld [vmem:[%s6140_s25 + $0x38] sm:$0xff]  }
 0x4c2   :  { %4144 = vmatmul.mubr.bf16.gmra.mxu1 %v1728_v57  ;;  %v807_v59 = vadd.f32 %v5729_v41, %v785_v16  ;;  %v765_v33 = vmul.f32 %v4616_v28, %v5671_v51  ;;  %4183 = vmatprep.subr.bf16.mxu1 %v4425_v32  ;;  %v4426_v51 = vld [vmem:[%s6140_s25 + $0x30] sm:$0xff]  }
 0x4c3   :  { %v788_v2 = vmul.f32 %v5719_v53, %v766_v30  ;;  %4184 = vmatpush3.bf16.msra.mxu1 %v4425_v32 }
 0x4c4   :  { %v1729_v18 = vpack.c.bf16 %v808_v19, %v807_v59  ;;  %v787_v55 = vmul.f32 %v5719_v53, %v765_v33  ;;  %4185 = vmatprep.subr.bf16.mxu1 %v4426_v51  ;;  %v4428_v53 = vld [vmem:[%s6140_s25 + $0x20] sm:$0xff]  }
 0x4c5   :  { %v810_v35 = vadd.f32 %v5729_v41, %v788_v2 }
 0x4c6   :  { %4147 = vmatprep.mubr.bf16.mxu1 %v1729_v18  ;;  %v809_v43 = vadd.f32 %v5729_v41, %v787_v55  ;;  %v4430_v41 = vld [vmem:[%s6140_s25 + $0x10] sm:$0xff]  }
 0x4c7   :  { %4186 = vmatpush3.bf16.msra.mxu1 %v4426_v51 }
 0x4c8   :  { %v1730_v5 = vpack.c.bf16 %v810_v35, %v809_v43  ;;  %4187 = vmatprep.subr.bf16.mxu1 %v4427_v9 }
 0x4ca   :  { %4148 = vmatmul.mubr.bf16.gmra.mxu1 %v1730_v5 }
 0x4cb   :  { %4188 = vmatpush3.bf16.msra.mxu1 %v4427_v9 }
 0x4cc   :  { %4189 = vmatprep.subr.bf16.mxu1 %v4428_v53 }
 0x4cf   :  { %4190 = vmatpush3.bf16.msra.mxu1 %v4428_v53 }
 0x4d0   :  { %4191 = vmatprep.subr.bf16.mxu1 %v4429_v26 }
 0x4d3   :  { %4192 = vmatpush3.bf16.msra.mxu1 %v4429_v26 }
 0x4d4   :  { %4193 = vmatprep.subr.bf16.mxu1 %v4430_v41 }
 0x4d7   :  { %4194 = vmatpush3.bf16.msra.mxu1 %v4430_v41 }
 0x4d8   :  { %4195 = vmatprep.subr.bf16.mxu1 %v4431_v20 }
 0x4db   :  { %4196 = vmatpush3.bf16.msra.mxu1 %v4431_v20 }
 0x4dc   :  { %4197 = vmatprep.subr.bf16.mxu1 %v4432_v38 }
 0x4df   :  { %4198 = vmatpush3.bf16.msra.mxu1 %v4432_v38 }
 0x53e   :  { %v4105_v22 = vpop.f32.mrf.mxu0 }
 0x540   :  { %v1837_v42 = vpop.f32.mrf.mxu0 }
 0x542   :  { %v4106_v47 = vpop.f32.mrf.mxu0 }
 0x544   :  { %v1840_v14 = vpop.f32.mrf.mxu0 }
 0x546   :  { %v4109_v50 = vpop.f32.mrf.mxu0 }
 0x548   :  { %v1853_v17 = vpop.f32.mrf.mxu0 }
 0x54a   :  { %v4110_v31 = vpop.f32.mrf.mxu0 }
 0x54c   :  { %v1856_v61 = vpop.f32.mrf.mxu0 }
 0x54e   :  { %v5788_v23 = vpop.f32.mrf.mxu0 }
 0x550   :  { %v5790_v27 = vpop.f32.mrf.mxu0 }
 0x552   :  { %v5792_v4 = vpop.f32.mrf.mxu0 }
 0x554   :  { %v5794_v60 = vpop.f32.mrf.mxu0 }
 0x556   :  { %v5796_v0 = vpop.f32.mrf.mxu0 }
 0x558   :  { %v5798_v58 = vpop.f32.mrf.mxu0 }
 0x55a   :  { %v5800_v62 = vpop.f32.mrf.mxu0 }
 0x55c   :  { %v5802_v3 = vpop.f32.mrf.mxu0 }
 0x55e   :  { %v4169_v11 = vpop.f32.mrf.mxu0 }
 0x560   :  { %v2151_v49 = vpop.f32.mrf.mxu0 }
 0x562   :  { %v4170_v8 = vpop.f32.mrf.mxu0 }
 0x564   :  { %v2154_v29 = vpop.f32.mrf.mxu0 }
 0x566   :  { %v4173_v34 = vpop.f32.mrf.mxu0 }
 0x568   :  { %v2167_v45 = vpop.f32.mrf.mxu0 }
 0x56a   :  { %v4174_v7 = vpop.f32.mrf.mxu0 }
 0x56c   :  { %v2170_v39 = vpop.f32.mrf.mxu0 }
 0x56e   :  { %v4177_v24 = vpop.f32.mrf.mxu0 }
 0x570   :  { %v2183_v16 = vpop.f32.mrf.mxu0 }
 0x572   :  { %v4137_v46 = vpop.f32.mrf.mxu1  ;;  %v4178_v51 = vpop.f32.mrf.mxu0 }
 0x573   :  { %v1991_v56 = vadd.f32 %v4137_v46, %v4105_v22 }
 0x574   :  { %v1982_v21 = vpop.f32.mrf.mxu1 }
 0x575   :  { %v2216_v44 = vadd.f32 %v4169_v11, %v1991_v56  ;;  %v1983_v12 = vadd.f32 %v1982_v21, %v1837_v42  ;;  %v2186_v11 = vpop.f32.mrf.mxu0 }
 0x576   :  { %v4138_v15 = vpop.f32.mrf.mxu1 }
 0x577   :  { %v5808_v10 = vadd.f32 %v5805_v1, %v2216_v44  ;;  %v2214_v52 = vadd.f32 %v2151_v49, %v1983_v12  ;;  %v1994_v40 = vadd.f32 %v4138_v15, %v4106_v47  ;;  %v4181_v12 = vpop.f32.mrf.mxu0 }
 0x578   :  { %v1985_v63 = vpop.f32.mrf.mxu1 }
 0x579   :  { %v2255_v48 = vsub.f32 0.0, %v5808_v10  ;;  %v5812_v37 = vadd.f32 %v5805_v1, %v2214_v52  ;;  %v2217_v36 = vadd.f32 %v4170_v8, %v1994_v40  ;;  %v1986_v54 = vadd.f32 %v1985_v63, %v1840_v14 }
 0x57a   :  { %v4141_v57 = vpop.f32.mrf.mxu1 }
 0x57b   :  { %v2273_v28 = vmul.f32 1.442695, %v2255_v48  ;;  %v2253_v19 = vsub.f32 0.0, %v5812_v37  ;;  %v5816_v30 = vadd.f32 %v5805_v1, %v2217_v36  ;;  %v2215_v59 = vadd.f32 %v2154_v29, %v1986_v54 }
 0x57c   :  { %v2007_v33 = vadd.f32 %v4141_v57, %v4109_v50  ;;  %v1998_v2 = vpop.f32.mrf.mxu1 }
 0x57d   :  { %4617 = vpow2.f32 %v2273_v28  ;;  %v2269_v18 = vmul.f32 1.442695, %v2253_v19  ;;  %v2256_v55 = vsub.f32 0.0, %v5816_v30  ;;  %v5820_v35 = vadd.f32 %v5805_v1, %v2215_v59  ;;  %v2199_v59 = vpop.f32.mrf.mxu0 }
 0x57e   :  { %v2220_v43 = vadd.f32 %v4173_v34, %v2007_v33  ;;  %v1999_v5 = vadd.f32 %v1998_v2, %v1853_v17  ;;  %v4142_v32 = vpop.f32.mrf.mxu1 }
 0x57f   :  { %4619 = vpow2.f32 %v2269_v18  ;;  %v2275_v9 = vmul.f32 1.442695, %v2256_v55  ;;  %v2254_v53 = vsub.f32 0.0, %v5820_v35  ;;  %v2010_v26 = vadd.f32 %v4142_v32, %v4110_v31 }
 0x580   :  { %v5824_v41 = vadd.f32 %v5805_v1, %v2220_v43  ;;  %v2218_v20 = vadd.f32 %v2167_v45, %v1999_v5  ;;  %v2001_v38 = vpop.f32.mrf.mxu1 }
 0x581   :  { %4621 = vpow2.f32 %v2275_v9  ;;  %v2271_v22 = vmul.f32 1.442695, %v2254_v53  ;;  %v2221_v42 = vadd.f32 %v4174_v7, %v2010_v26  ;;  %v2002_v47 = vadd.f32 %v2001_v38, %v1856_v61 }
 0x582   :  { %v2259_v14 = vsub.f32 0.0, %v5824_v41  ;;  %v5828_v50 = vadd.f32 %v5805_v1, %v2218_v20  ;;  %v4145_v17 = vpop.f32.mrf.mxu1 }
 0x583   :  { %4623 = vpow2.f32 %v2271_v22  ;;  %v5831_v49 = vadd.f32 %v5805_v1, %v2221_v42  ;;  %v2219_v31 = vadd.f32 %v2170_v39, %v2002_v47  ;;  %v2023_v8 = vadd.f32 %v4145_v17, %v5788_v23  ;;  %v4182_v22 = vpop.f32.mrf.mxu0 }
 0x584   :  { %v2281_v29 = vmul.f32 1.442695, %v2259_v14  ;;  %v2257_v34 = vsub.f32 0.0, %v5828_v50  ;;  %v2014_v45 = vpop.f32.mrf.mxu1 }
 0x585   :  { %v2260_v61 = vsub.f32 0.0, %v5831_v49  ;;  %v5837_v7 = vadd.f32 %v5805_v1, %v2219_v31  ;;  %v2224_v46 = vadd.f32 %v4177_v24, %v2023_v8  ;;  %v2015_v56 = vadd.f32 %v2014_v45, %v5790_v27 }
 0x586   :  { %4625 = vpow2.f32 %v2281_v29  ;;  %v2277_v21 = vmul.f32 1.442695, %v2257_v34  ;;  %v4146_v44 = vpop.f32.mrf.mxu1 }
 0x587   :  { %v2283_v15 = vmul.f32 1.442695, %v2260_v61  ;;  %v2258_v39 = vsub.f32 0.0, %v5837_v7  ;;  %v5842_v23 = vadd.f32 %v5805_v1, %v2224_v46  ;;  %v2222_v52 = vadd.f32 %v2183_v16, %v2015_v56  ;;  %v2202_v46 = vpop.f32.mrf.mxu0 }
 0x588   :  { %4627 = vpow2.f32 %v2277_v21  ;;  %v2026_v40 = vadd.f32 %v4146_v44, %v5792_v4  ;;  %v2017_v63 = vpop.f32.mrf.mxu1 }
 0x589   :  { %4629 = vpow2.f32 %v2283_v15  ;;  %v2279_v48 = vmul.f32 1.442695, %v2258_v39  ;;  %v2263_v24 = vsub.f32 0.0, %v5842_v23  ;;  %v5847_v27 = vadd.f32 %v5805_v1, %v2222_v52 }
 0x58a   :  { %v4618_v36 = vpop.eup %4617  ;;  %v2225_v54 = vadd.f32 %v4178_v51, %v2026_v40  ;;  %v2018_v57 = vadd.f32 %v2017_v63, %v5794_v60  ;;  %v4149_v28 = vpop.f32.mrf.mxu1 }
 0x58b   :  { %v2303_v19 = vadd.f32 1.0, %v4618_v36  ;;  %4631 = vpow2.f32 %v2279_v48  ;;  %v2289_v16 = vmul.f32 1.442695, %v2263_v24  ;;  %v2261_v33 = vsub.f32 0.0, %v5847_v27 }
 0x58c   :  { %v4620_v4 = vpop.eup %4619  ;;  %v5852_v2 = vadd.f32 %v5805_v1, %v2225_v54  ;;  %v2223_v18 = vadd.f32 %v2186_v11, %v2018_v57  ;;  %v2039_v55 = vadd.f32 %v4149_v28, %v5796_v0  ;;  %v2030_v43 = vpop.f32.mrf.mxu1 }
 0x58d   :  { %4633 = vrcp.f32 %v2303_v19  ;;  %v2301_v5 = vadd.f32 1.0, %v4620_v4  ;;  %v2285_v32 = vmul.f32 1.442695, %v2261_v33  ;;  %v2031_v60 = vadd.f32 %v2030_v43, %v5798_v58 }
 0x58e   :  { %v4622_v51 = vpop.eup %4621  ;;  %4635 = vpow2.f32 %v2289_v16  ;;  %v2264_v9 = vsub.f32 0.0, %v5852_v2  ;;  %v5858_v53 = vadd.f32 %v5805_v1, %v2223_v18  ;;  %v2228_v26 = vadd.f32 %v4181_v12, %v2039_v55  ;;  %v4150_v20 = vpop.f32.mrf.mxu1 }
 0x58f   :  { %4637 = vrcp.f32 %v2301_v5  ;;  %v2304_v38 = vadd.f32 1.0, %v4622_v51  ;;  %v2226_v42 = vadd.f32 %v2199_v59, %v2031_v60  ;;  %v2042_v0 = vadd.f32 %v4150_v20, %v5800_v62 }
 0x590   :  { %v4624_v47 = vpop.eup %4623  ;;  %4639 = vpow2.f32 %v2285_v32  ;;  %v2291_v14 = vmul.f32 1.442695, %v2264_v9  ;;  %v2262_v58 = vsub.f32 0.0, %v5858_v53  ;;  %v5863_v17 = vadd.f32 %v5805_v1, %v2228_v26  ;;  %v2033_v11 = vpop.f32.mrf.mxu1 }
 0x591   :  { %4641 = vrcp.f32 %v2304_v38  ;;  %v2302_v31 = vadd.f32 1.0, %v4624_v47  ;;  %v5866_v8 = vadd.f32 %v5805_v1, %v2226_v42  ;;  %v2229_v29 = vadd.f32 %v4182_v22, %v2042_v0 }
 0x592   :  { %4643 = vpow2.f32 %v2291_v14  ;;  %v2287_v34 = vmul.f32 1.442695, %v2262_v58  ;;  %v2267_v45 = vsub.f32 0.0, %v5863_v17  ;;  %v2034_v62 = vadd.f32 %v2033_v11, %v5802_v3 }
 0x593   :  { %v4626_v61 = vpop.eup %4625  ;;  %4645 = vrcp.f32 %v2302_v31  ;;  %v2265_v56 = vsub.f32 0.0, %v5866_v8  ;;  %v5872_v21 = vadd.f32 %v5805_v1, %v2229_v29 }
 0x594   :  { %v2307_v44 = vadd.f32 1.0, %v4626_v61  ;;  %4647 = vpow2.f32 %v2287_v34  ;;  %v2297_v12 = vmul.f32 1.442695, %v2267_v45  ;;  %v2227_v15 = vadd.f32 %v2202_v46, %v2034_v62 }
 0x595   :  { %v4628_v39 = vpop.eup %4627  ;;  %v2268_v52 = vsub.f32 0.0, %v5872_v21  ;;  %v2293_v48 = vmul.f32 1.442695, %v2265_v56 }
 0x596   :  { %v4630_v40 = vpop.eup %4629  ;;  %4649 = vrcp.f32 %v2307_v44  ;;  %v2305_v63 = vadd.f32 1.0, %v4628_v39  ;;  %v5876_v3 = vadd.f32 %v5805_v1, %v2227_v15 }
 0x597   :  { %v2308_v24 = vadd.f32 1.0, %v4630_v40  ;;  %4651 = vpow2.f32 %v2297_v12  ;;  %v2299_v54 = vmul.f32 1.442695, %v2268_v52 }
 0x598   :  { %v4632_v36 = vpop.eup %4631  ;;  %4653 = vrcp.f32 %v2305_v63  ;;  %v2266_v57 = vsub.f32 0.0, %v5876_v3 }
 0x599   :  { %4655 = vrcp.f32 %v2308_v24  ;;  %v2306_v28 = vadd.f32 1.0, %v4632_v36 }
 0x59a   :  { %v4634_v19 = vpop.eup %4633  ;;  %4657 = vpow2.f32 %v2293_v48  ;;  %v2295_v59 = vmul.f32 1.442695, %v2266_v57 }
 0x59b   :  { %v4636_v16 = vpop.eup %4635  ;;  %4659 = vrcp.f32 %v2306_v28  ;;  %v2335_v20 = vmul.f32 %v4634_v19, %v5808_v10 }
 0x59c   :  { %v4638_v33 = vpop.eup %4637  ;;  %4661 = vpow2.f32 %v2299_v54  ;;  %v2311_v43 = vadd.f32 1.0, %v4636_v16 }
 0x59d   :  { %v4640_v4 = vpop.eup %4639  ;;  %4663 = vpow2.f32 %v2295_v59  ;;  %v2333_v9 = vmul.f32 %v4638_v33, %v5812_v37 }
 0x59e   :  { %v4642_v1 = vpop.eup %4641  ;;  %v2309_v18 = vadd.f32 1.0, %v4640_v4 }
 0x59f   :  { %v4644_v55 = vpop.eup %4643  ;;  %v2336_v32 = vmul.f32 %v4642_v1, %v5816_v30 }
 0x5a0   :  { %v4646_v5 = vpop.eup %4645  ;;  %v2312_v60 = vadd.f32 1.0, %v4644_v55  ;;  %4665 = vrcp.f32 %v2309_v18 }
 0x5a1   :  { %v4648_v51 = vpop.eup %4647  ;;  %v2334_v26 = vmul.f32 %v4646_v5, %v5820_v35  ;;  %v2366_v47 = vpack.c.bf16 %v2336_v32, %v2335_v20 }
 0x5a2   :  { %4667 = vrcp.f32 %v2312_v60  ;;  %v2310_v38 = vadd.f32 1.0, %v4648_v51 }
 0x5a3   :  { %v4650_v22 = vpop.eup %4649  ;;  %4669 = vrcp.f32 %v2311_v43  ;;  %v2365_v42 = vpack.c.bf16 %v2334_v26, %v2333_v9 }
 0x5a4   :  { %v4652_v0 = vpop.eup %4651  ;;  %4671 = vrcp.f32 %v2310_v38  ;;  %v2339_v61 = vmul.f32 %v4650_v22, %v5824_v41 }
 0x5a5   :  { %v4654_v14 = vpop.eup %4653  ;;  %4199 = vmatprep.mubr.bf16.mxu1 %v2365_v42  ;;  %v2315_v58 = vadd.f32 1.0, %v4652_v0 }
 0x5a6   :  { %v4656_v30 = vpop.eup %4655  ;;  %4200 = vmatmul.mubr.bf16.vlgmr.msra.gmra.mxu1 %v2366_v47  ;;  %v2337_v10 = vmul.f32 %v4654_v14, %v5828_v50 }
 0x5a7   :  { %v4658_v11 = vpop.eup %4657  ;;  %v2340_v35 = vmul.f32 %v4656_v30, %v5831_v49  ;;  %4673 = vrcp.f32 %v2315_v58 }
 0x5a8   :  { %v4660_v31 = vpop.eup %4659  ;;  %v2313_v37 = vadd.f32 1.0, %v4658_v11 }
 0x5a9   :  { %v4662_v29 = vpop.eup %4661  ;;  %v2338_v34 = vmul.f32 %v4660_v31, %v5837_v7  ;;  %v2368_v44 = vpack.c.bf16 %v2340_v35, %v2339_v61 }
 0x5aa   :  { %v4664_v45 = vpop.eup %4663  ;;  %v2316_v62 = vadd.f32 1.0, %v4662_v29  ;;  %4675 = vrcp.f32 %v2313_v37 }
 0x5ab   :  { %v2314_v46 = vadd.f32 1.0, %v4664_v45  ;;  %v2367_v56 = vpack.c.bf16 %v2338_v34, %v2337_v10 }
 0x5ac   :  { %4677 = vrcp.f32 %v2316_v62 }
 0x5ad   :  { %4679 = vrcp.f32 %v2314_v46  ;;  %4203 = vmatprep.mubr.bf16.mxu1 %v2367_v56  ;;  %v4666_v12 = vpop.eup %4665 }
 0x5ae   :  { %4204 = vmatmul.mubr.bf16.gmra.mxu1 %v2368_v44  ;;  %v2341_v7 = vmul.f32 %v4666_v12, %v5847_v27 }
 0x5af   :  { %v4668_v49 = vpop.eup %4667 }
 0x5b0   :  { %v4670_v15 = vpop.eup %4669  ;;  %v2344_v50 = vmul.f32 %v4668_v49, %v5852_v2 }
 0x5b1   :  { %v4672_v39 = vpop.eup %4671  ;;  %v2343_v41 = vmul.f32 %v4670_v15, %v5842_v23 }
 0x5b2   :  { %v2342_v52 = vmul.f32 %v4672_v39, %v5858_v53 }
 0x5b3   :  { %v2370_v63 = vpack.c.bf16 %v2344_v50, %v2343_v41 }
 0x5b4   :  { %v2369_v40 = vpack.c.bf16 %v2342_v52, %v2341_v7  ;;  %v4674_v48 = vpop.eup %4673 }
 0x5b5   :  { %v2347_v27 = vmul.f32 %v4674_v48, %v5863_v17 }
 0x5b6   :  { %4207 = vmatprep.mubr.bf16.mxu1 %v2369_v40 }
 0x5b7   :  { %4208 = vmatmul.mubr.bf16.gmra.mxu1 %v2370_v63  ;;  %v4676_v24 = vpop.eup %4675 }
 0x5b8   :  { %v2345_v28 = vmul.f32 %v4676_v24, %v5866_v8 }
 0x5b9   :  { %v4678_v36 = vpop.eup %4677 }
 0x5ba   :  { %v4680_v54 = vpop.eup %4679  ;;  %v2348_v57 = vmul.f32 %v4678_v36, %v5872_v21 }
 0x5bb   :  { %v2346_v2 = vmul.f32 %v4680_v54, %v5876_v3  ;;  %v3710_v3 = vld [vmem:[%s6142_s3] ss:$0 sm:$0xff] }
 0x5bc   :  { %v2372_v53 = vpack.c.bf16 %v2348_v57, %v2347_v27 }
 0x5bd   :  { %v2371_v19 = vpack.c.bf16 %v2346_v2, %v2345_v28 }
 0x5bf   :  { %4211 = vmatprep.mubr.bf16.mxu1 %v2371_v19 }
 0x5c0   :  { %4212 = vmatmul.mubr.bf16.gmra.mxu1 %v2372_v53 }
 0x666   :  { %v4201_v23 = vpop.f32.mrf.mxu1 }
 0x667   :  { %v5896_v11 = vadd.f32 %v4201_v23, %v3710_v3 }
 0x668   :  { %v2462_v59 = vpop.f32.mrf.mxu1 }
 0x669   :  { %v5902_v37 = vadd.f32 %v3710_v3, %v2462_v59 }
 0x66a   :  { %v4202_v16 = vpop.f32.mrf.mxu1 }
 0x66b   :  { %v5904_v35 = vadd.f32 %v4202_v16, %v3710_v3 }
 0x66c   :  { %v2465_v33 = vpop.f32.mrf.mxu1 }
 0x66d   :  { %v5908_v29 = vadd.f32 %v3710_v3, %v2465_v33 }
 0x66e   :  { %v4205_v4 = vpop.f32.mrf.mxu1 }
 0x66f   :  { %v2487_v47 = vadd.f32 %v4205_v4, %v3710_v3 }
 0x670   :  { %v2478_v1 = vpop.f32.mrf.mxu1 }
 0x671   :  { %v2479_v30 = vadd.f32 %v3710_v3, %v2478_v1 }
 0x672   :  { %v4206_v18 = vpop.f32.mrf.mxu1 }
 0x673   :  { %v2490_v58 = vadd.f32 %v4206_v18, %v3710_v3 }
 0x674   :  { %v2481_v55 = vpop.f32.mrf.mxu1 }
 0x675   :  { %v5898_v31 = vadd.f32 %v3710_v3, %v2481_v55 }
 0x677   :  { %v4209_v21 = vpop.f32.mrf.mxu1 }
 0x678   :  { %v2503_v38 = vadd.f32 %v4209_v21, %v3710_v3 }
 0x679   :  { %v2494_v43 = vpop.f32.mrf.mxu1 }
 0x67a   :  { %v2495_v42 = vadd.f32 %v3710_v3, %v2494_v43 }
 0x67b   :  { %v4210_v8 = vpop.f32.mrf.mxu1 }
 0x67c   :  { %v2506_v0 = vadd.f32 %v4210_v8, %v3710_v3 }
 0x67d   :  { %v2497_v5 = vpop.f32.mrf.mxu1 }
 0x67e   :  { %v2498_v14 = vadd.f32 %v3710_v3, %v2497_v5 }
 0x680   :  { %v4213_v32 = vpop.f32.mrf.mxu1 }
 0x681   :  { %v2519_v17 = vadd.f32 %v4213_v32, %v3710_v3 }
 0x682   :  { %v2510_v60 = vpop.f32.mrf.mxu1 }
 0x683   :  { %2555 = vadd.xlane.f32.xlu0 %v2519_v17  ;;  %v2511_v9 = vadd.f32 %v3710_v3, %v2510_v60 }
 0x684   :  { %v4214_v51 = vpop.f32.mrf.mxu1 }
 0x685   :  { %v2522_v26 = vadd.f32 %v4214_v51, %v3710_v3 }
 0x686   :  { %v2513_v20 = vpop.f32.mrf.mxu1 }
 0x687   :  { %2557 = vadd.xlane.f32.xlu1 %v2522_v26  ;;  %2551 = vadd.xlane.f32.xlu0 %v2511_v9  ;;  %v2514_v22 = vadd.f32 %v3710_v3, %v2513_v20 }
 0x68b   :  { %2553 = vadd.xlane.f32.xlu1 %v2514_v22  ;;  %2547 = vadd.xlane.f32.xlu0 %v2503_v38 }
 0x68f   :  { %2549 = vadd.xlane.f32.xlu1 %v2506_v0  ;;  %2543 = vadd.xlane.f32.xlu0 %v2495_v42 }
 0x693   :  { %2545 = vadd.xlane.f32.xlu1 %v2498_v14  ;;  %2539 = vadd.xlane.f32.xlu0 %v2487_v47 }
 0x697   :  { %2541 = vadd.xlane.f32.xlu1 %v2490_v58  ;;  %2535 = vadd.xlane.f32.xlu0 %v2479_v30 }
 0x69b   :  { %2537 = vadd.xlane.f32.xlu1 %v5898_v31  ;;  %2531 = vadd.xlane.f32.xlu0 %v5896_v11 }
 0x69f   :  { %2533 = vadd.xlane.f32.xlu1 %v5904_v35  ;;  %2527 = vadd.xlane.f32.xlu0 %v5902_v37 }
 0x6a3   :  { %2529 = vadd.xlane.f32.xlu1 %v5908_v29 }
 0x70c   :  { %v2556_v10 = vpop.xlane.xlu0 %2555 }
 0x70d   :  { %v2573_v34 = vmul.f32 0.0078125, %v2556_v10 }
 0x70f   :  { %v5911_v45 = vsub.f32 %v2519_v17, %v2573_v34 }
 0x710   :  { %v2558_v62 = vpop.xlane.xlu1 %2557  ;;  %v2552_v61 = vpop.xlane.xlu0 %2551 }
 0x711   :  { %v2574_v46 = vmul.f32 0.0078125, %v2558_v62  ;;  %v2571_v56 = vmul.f32 0.0078125, %v2552_v61  ;;  %v2605_v44 = vmul.f32 %v5911_v45, %v5911_v45 }
 0x713   :  { %v5915_v12 = vsub.f32 %v2522_v26, %v2574_v46  ;;  %v5917_v49 = vsub.f32 %v2511_v9, %v2571_v56  ;;  %2635 = vadd.xlane.f32.xlu0 %v2605_v44  ;;  %v3668_v44 = vld [vmem:[%s6143_s8] ss:$0 sm:$0xff] }
 0x714   :  { %v2554_v15 = vpop.xlane.xlu1 %2553  ;;  %v2548_v39 = vpop.xlane.xlu0 %2547 }
 0x715   :  { %v2572_v50 = vmul.f32 0.0078125, %v2554_v15  ;;  %v2569_v7 = vmul.f32 0.0078125, %v2548_v39  ;;  %v2606_v52 = vmul.f32 %v5915_v12, %v5915_v12  ;;  %v2603_v41 = vmul.f32 %v5917_v49, %v5917_v49 }
 0x717   :  { %v5923_v40 = vsub.f32 %v2514_v22, %v2572_v50  ;;  %v5925_v63 = vsub.f32 %v2503_v38, %v2569_v7  ;;  %2637 = vadd.xlane.f32.xlu1 %v2606_v52  ;;  %2631 = vadd.xlane.f32.xlu0 %v2603_v41  ;;  %v4442_v7 = vld [vmem:[%s6144_s24 + $0x30] sm:$0xff]   ;;  %v4443_v52 = vld [vmem:[%s6144_s24 + $0x28] sm:$0xff]   ;;  %v4444_v41 = vld [vmem:[%s6144_s24 + $0x20] sm:$0xff]  }
 0x718   :  { %v2550_v48 = vpop.xlane.xlu1 %2549  ;;  %v2544_v24 = vpop.xlane.xlu0 %2543  ;;  %v4447_v50 = vld [vmem:[%s6144_s24 + $0x8] sm:$0xff]  }
 0x719   :  { %v2570_v36 = vmul.f32 0.0078125, %v2550_v48  ;;  %v2567_v54 = vmul.f32 0.0078125, %v2544_v24  ;;  %v2604_v57 = vmul.f32 %v5923_v40, %v5923_v40  ;;  %v2601_v28 = vmul.f32 %v5925_v63, %v5925_v63  ;;  %v4445_v48 = vld [vmem:[%s6144_s24 + $0x18] sm:$0xff]   ;;  %v4446_v24 = vld [vmem:[%s6144_s24 + $0x10] sm:$0xff]  }
 0x71b   :  { %v5931_v2 = vsub.f32 %v2506_v0, %v2570_v36  ;;  %v5933_v27 = vsub.f32 %v2495_v42, %v2567_v54  ;;  %2633 = vadd.xlane.f32.xlu1 %v2604_v57  ;;  %2627 = vadd.xlane.f32.xlu0 %v2601_v28 }
 0x71c   :  { %v2546_v19 = vpop.xlane.xlu1 %2545  ;;  %v2540_v53 = vpop.xlane.xlu0 %2539 }
 0x71d   :  { %v2568_v23 = vmul.f32 0.0078125, %v2546_v19  ;;  %v2565_v59 = vmul.f32 0.0078125, %v2540_v53  ;;  %v2602_v16 = vmul.f32 %v5931_v2, %v5931_v2  ;;  %v2599_v33 = vmul.f32 %v5933_v27, %v5933_v27 }
 0x71f   :  { %v5939_v4 = vsub.f32 %v2498_v14, %v2568_v23  ;;  %v5941_v1 = vsub.f32 %v2487_v47, %v2565_v59  ;;  %2629 = vadd.xlane.f32.xlu1 %v2602_v16  ;;  %2623 = vadd.xlane.f32.xlu0 %v2599_v33 }
 0x720   :  { %v2542_v18 = vpop.xlane.xlu1 %2541  ;;  %v2536_v55 = vpop.xlane.xlu0 %2535 }
 0x721   :  { %v2566_v21 = vmul.f32 0.0078125, %v2542_v18  ;;  %v2563_v43 = vmul.f32 0.0078125, %v2536_v55  ;;  %v2600_v8 = vmul.f32 %v5939_v4, %v5939_v4  ;;  %v2597_v5 = vmul.f32 %v5941_v1, %v5941_v1 }
 0x723   :  { %v5947_v3 = vsub.f32 %v2490_v58, %v2566_v21  ;;  %v5949_v32 = vsub.f32 %v2479_v30, %v2563_v43  ;;  %2625 = vadd.xlane.f32.xlu1 %v2600_v8  ;;  %2619 = vadd.xlane.f32.xlu0 %v2597_v5 }
 0x724   :  { %v2538_v17 = vpop.xlane.xlu1 %2537  ;;  %v2532_v60 = vpop.xlane.xlu0 %2531 }
 0x725   :  { %v2564_v51 = vmul.f32 0.0078125, %v2538_v17  ;;  %v2561_v9 = vmul.f32 0.0078125, %v2532_v60  ;;  %v2598_v26 = vmul.f32 %v5947_v3, %v5947_v3  ;;  %v2595_v20 = vmul.f32 %v5949_v32, %v5949_v32 }
 0x727   :  { %v5956_v38 = vsub.f32 %v5898_v31, %v2564_v51  ;;  %v5959_v22 = vsub.f32 %v5896_v11, %v2561_v9  ;;  %2621 = vadd.xlane.f32.xlu1 %v2598_v26  ;;  %2615 = vadd.xlane.f32.xlu0 %v2595_v20 }
 0x728   :  { %v2534_v42 = vpop.xlane.xlu1 %2533  ;;  %v2528_v0 = vpop.xlane.xlu0 %2527 }
 0x729   :  { %v2562_v47 = vmul.f32 0.0078125, %v2534_v42  ;;  %v2559_v14 = vmul.f32 0.0078125, %v2528_v0  ;;  %v2596_v30 = vmul.f32 %v5956_v38, %v5956_v38  ;;  %v2593_v58 = vmul.f32 %v5959_v22, %v5959_v22 }
 0x72b   :  { %v5966_v10 = vsub.f32 %v5904_v35, %v2562_v47  ;;  %v5969_v31 = vsub.f32 %v5902_v37, %v2559_v14  ;;  %2617 = vadd.xlane.f32.xlu1 %v2596_v30  ;;  %2611 = vadd.xlane.f32.xlu0 %v2593_v58  ;;  %v1232_v35 = vshrl.u32 %v1229_v25, 7  ;;  %v4441_v25 = vld [vmem:[%s6144_s24 + $0x38] sm:$0xff]   ;;  %v5994_v30 = vld [vmem:[%s6147_s30] ss:$0 sm:$0xff] }
 0x72c   :  { %v2530_v11 = vpop.xlane.xlu1 %2529  ;;  %4235 = vmatprep.subr.bf16.mxu1 %v4441_v25 }
 0x72d   :  { %v2560_v34 = vmul.f32 0.0078125, %v2530_v11  ;;  %v2594_v62 = vmul.f32 %v5966_v10, %v5966_v10  ;;  %v2591_v61 = vmul.f32 %v5969_v31, %v5969_v31  ;;  %v1233_v56 = vadd.s32 8, %v1232_v35  ;;  %4236 = vmatpush3.bf16.msra.mxu1 %v4441_v25 }
 0x72e   :  { %v1234_v15 = vadd.s32 16, %v1232_v35  ;;  %v1235_v39 = vadd.s32 24, %v1232_v35  ;;  %vm1449_vm1 = vcmp.eq.s32.totalorder %v1232_v35, %v3668_v44  ;;  %4237 = vmatprep.subr.bf16.mxu1 %v4442_v7 }
 0x72f   :  { %v5976_v46 = vsub.f32 %v5908_v29, %v2560_v34  ;;  %2613 = vadd.xlane.f32.xlu1 %v2594_v62  ;;  %2607 = vadd.xlane.f32.xlu0 %v2591_v61  ;;  %vm1450_vm8 = vcmp.eq.s32.totalorder %v1233_v56, %v3668_v44  ;;  %v4862_v29 = vmov 1.0|1.0  }
 0x730   :  { %vm3721_vm9 = vmpackc.low %vm1450_vm8, %vm1449_vm1  ;;  %vm1451_vm10 = vcmp.eq.s32.totalorder %v1234_v15, %v3668_v44  ;;  %vm1452_vm11 = vcmp.eq.s32.totalorder %v1235_v39, %v3668_v44 }
 0x731   :  { %v2592_v37 = vmul.f32 %v5976_v46, %v5976_v46  ;;  %4231 = vmatprep.mubr.msk.bf16.mxu0 %vm3721_vm9, %v4862_v29  ;;  %vm5983_vm12 = vmpackc.low %vm1452_vm11, %vm1451_vm10  ;;  %4238 = vmatpush3.bf16.msra.mxu1 %v4442_v7 }
 0x732   :  { %4239 = vmatprep.subr.bf16.mxu1 %v4443_v52 }
 0x733   :  { %2609 = vadd.xlane.f32.xlu1 %v2592_v37  ;;  %v5998_v37 = vld [vmem:[%s6148_s6] ss:$0 sm:$0xff] }
 0x735   :  { %4240 = vmatpush3.bf16.msra.mxu1 %v4443_v52 }
 0x736   :  { %4241 = vmatprep.subr.bf16.mxu1 %v4444_v41 }
 0x739   :  { %4242 = vmatpush3.bf16.msra.mxu1 %v4444_v41 }
 0x73a   :  { %4243 = vmatprep.subr.bf16.mxu1 %v4445_v48 }
 0x73d   :  { %4244 = vmatpush3.bf16.msra.mxu1 %v4445_v48 }
 0x73e   :  { %4245 = vmatprep.subr.bf16.mxu1 %v4446_v24 }
 0x741   :  { %4246 = vmatpush3.bf16.msra.mxu1 %v4446_v24 }
 0x742   :  { %4247 = vmatprep.subr.bf16.mxu1 %v4447_v50 }
 0x745   :  { %4248 = vmatpush3.bf16.msra.mxu1 %v4447_v50 }
 0x79c   :  { %v2636_v36 = vpop.xlane.xlu0 %2635 }
 0x79d   :  { %v2653_v54 = vmul.f32 0.0078125, %v2636_v36 }
 0x79f   :  { %v2669_v57 = vadd.f32 1e-05, %v2653_v54 }
 0x7a0   :  { %v2638_v28 = vpop.xlane.xlu1 %2637  ;;  %v2632_v19 = vpop.xlane.xlu0 %2631 }
 0x7a1   :  { %4681 = vrsqrt.f32 %v2669_v57  ;;  %v2654_v53 = vmul.f32 0.0078125, %v2638_v28  ;;  %v2651_v23 = vmul.f32 0.0078125, %v2632_v19 }
 0x7a3   :  { %v2670_v59 = vadd.f32 1e-05, %v2654_v53  ;;  %v2667_v16 = vadd.f32 1e-05, %v2651_v23 }
 0x7a4   :  { %v2634_v33 = vpop.xlane.xlu1 %2633  ;;  %v2628_v18 = vpop.xlane.xlu0 %2627 }
 0x7a5   :  { %4683 = vrsqrt.f32 %v2670_v59  ;;  %v2652_v55 = vmul.f32 0.0078125, %v2634_v33  ;;  %v2649_v21 = vmul.f32 0.0078125, %v2628_v18 }
 0x7a6   :  { %4685 = vrsqrt.f32 %v2667_v16 }
 0x7a7   :  { %v2668_v43 = vadd.f32 1e-05, %v2652_v55  ;;  %v2665_v8 = vadd.f32 1e-05, %v2649_v21 }
 0x7a8   :  { %v2630_v5 = vpop.xlane.xlu1 %2629  ;;  %v2624_v17 = vpop.xlane.xlu0 %2623 }
 0x7a9   :  { %4687 = vrsqrt.f32 %v2668_v43  ;;  %v2650_v60 = vmul.f32 0.0078125, %v2630_v5  ;;  %v2647_v51 = vmul.f32 0.0078125, %v2624_v17 }
 0x7aa   :  { %4689 = vrsqrt.f32 %v2665_v8 }
 0x7ab   :  { %v2666_v9 = vadd.f32 1e-05, %v2650_v60  ;;  %v2663_v26 = vadd.f32 1e-05, %v2647_v51 }
 0x7ac   :  { %v2626_v20 = vpop.xlane.xlu1 %2625  ;;  %v2620_v42 = vpop.xlane.xlu0 %2619 }
 0x7ad   :  { %4691 = vrsqrt.f32 %v2666_v9  ;;  %v2648_v0 = vmul.f32 0.0078125, %v2626_v20  ;;  %v2645_v47 = vmul.f32 0.0078125, %v2620_v42 }
 0x7ae   :  { %v4682_v14 = vpop.eup %4681  ;;  %4693 = vrsqrt.f32 %v2663_v26 }
 0x7af   :  { %v2664_v58 = vadd.f32 1e-05, %v2648_v0  ;;  %v2661_v11 = vadd.f32 1e-05, %v2645_v47  ;;  %v2701_v34 = vmul.f32 %v4682_v14, %v5911_v45 }
 0x7b0   :  { %v2622_v62 = vpop.xlane.xlu1 %2621  ;;  %v2616_v61 = vpop.xlane.xlu0 %2615 }
 0x7b1   :  { %4695 = vrsqrt.f32 %v2664_v58  ;;  %v2646_v35 = vmul.f32 0.0078125, %v2622_v62  ;;  %v2643_v56 = vmul.f32 0.0078125, %v2616_v61  ;;  %v2723_v44 = vmul.f32 %v5994_v30, %v2701_v34 }
 0x7b2   :  { %v4684_v15 = vpop.eup %4683  ;;  %4697 = vrsqrt.f32 %v2661_v11 }
 0x7b3   :  { %v4686_v39 = vpop.eup %4685  ;;  %v2662_v25 = vadd.f32 1e-05, %v2646_v35  ;;  %v2659_v7 = vadd.f32 1e-05, %v2643_v56  ;;  %v2702_v52 = vmul.f32 %v4684_v15, %v5915_v12  ;;  %v2745_v41 = vadd.f32 %v5998_v37, %v2723_v44 }
 0x7b4   :  { %v2618_v48 = vpop.xlane.xlu1 %2617  ;;  %v2612_v45 = vpop.xlane.xlu0 %2611  ;;  %v2699_v24 = vmul.f32 %v4686_v39, %v5917_v49 }
 0x7b5   :  { %4699 = vrsqrt.f32 %v2662_v25  ;;  %v2644_v36 = vmul.f32 0.0078125, %v2618_v48  ;;  %v2641_v54 = vmul.f32 0.0078125, %v2612_v45  ;;  %v2724_v57 = vmul.f32 %v5994_v30, %v2702_v52  ;;  %2761 = vst [vmem:[#allocation2 + $0x70] sm:$0xff] %v2745_v41 }
 0x7b6   :  { %v4688_v28 = vpop.eup %4687  ;;  %4701 = vrsqrt.f32 %v2659_v7  ;;  %v2721_v19 = vmul.f32 %v5994_v30, %v2699_v24 }
 0x7b7   :  { %v4690_v53 = vpop.eup %4689  ;;  %v2660_v23 = vadd.f32 1e-05, %v2644_v36  ;;  %v2657_v59 = vadd.f32 1e-05, %v2641_v54  ;;  %v2746_v12 = vadd.f32 %v5998_v37, %v2724_v57  ;;  %v2700_v16 = vmul.f32 %v4688_v28, %v5923_v40 }
 0x7b8   :  { %v2614_v33 = vpop.xlane.xlu1 %2613  ;;  %v2608_v18 = vpop.xlane.xlu0 %2607  ;;  %v2743_v49 = vadd.f32 %v5998_v37, %v2721_v19  ;;  %v2697_v55 = vmul.f32 %v4690_v53, %v5925_v63 }
 0x7b9   :  { %4703 = vrsqrt.f32 %v2660_v23  ;;  %v2642_v21 = vmul.f32 0.0078125, %v2614_v33  ;;  %v2639_v43 = vmul.f32 0.0078125, %v2608_v18  ;;  %2762 = vst [vmem:[#allocation2 + $0x78] sm:$0xff] %v2746_v12  ;;  %v2770_v8 = vpack.c.bf16 %v2746_v12, %v2745_v41 }
 0x7ba   :  { %v4692_v5 = vpop.eup %4691  ;;  %4705 = vrsqrt.f32 %v2657_v59  ;;  %v2722_v17 = vmul.f32 %v5994_v30, %v2700_v16  ;;  %2759 = vst [vmem:[#allocation2 + $0x60] sm:$0xff] %v2743_v49  ;;  %v2719_v60 = vmul.f32 %v5994_v30, %v2697_v55 }
 0x7bb   :  { %v4694_v51 = vpop.eup %4693  ;;  %v2658_v40 = vadd.f32 1e-05, %v2642_v21  ;;  %v2655_v9 = vadd.f32 1e-05, %v2639_v43  ;;  %4215 = vmatprep.subr.bf16.mxu0 %v2770_v8  ;;  %v2698_v26 = vmul.f32 %v4692_v5, %v5931_v2 }
 0x7bc   :  { %v2610_v20 = vpop.xlane.xlu1 %2609  ;;  %4216 = vmatpush3.bf16.msra.mxu0 %v2770_v8  ;;  %v2744_v63 = vadd.f32 %v5998_v37, %v2722_v17  ;;  %v2741_v42 = vadd.f32 %v5998_v37, %v2719_v60  ;;  %v2695_v0 = vmul.f32 %v4694_v51, %v5933_v27  ;;  %v4433_v51 = vld [vmem:[%s6149_s12 + $0x38] sm:$0xff]  }
 0x7bd   :  { %4707 = vrsqrt.f32 %v2658_v40  ;;  %v2640_v47 = vmul.f32 0.0078125, %v2610_v20  ;;  %v2720_v14 = vmul.f32 %v5994_v30, %v2698_v26  ;;  %v4437_v40 = vld [vmem:[%s6149_s12 + $0x18] sm:$0xff]   ;;  %v4448_v26 = vld [vmem:[%s6144_s24] sm:$0xff]  }
 0x7be   :  { %v4696_v58 = vpop.eup %4695  ;;  %4709 = vrsqrt.f32 %v2655_v9  ;;  %2760 = vst [vmem:[#allocation2 + $0x68] sm:$0xff] %v2744_v63  ;;  %v2769_v11 = vpack.c.bf16 %v2744_v63, %v2743_v49  ;;  %2757 = vst [vmem:[#allocation2 + $0x50] sm:$0xff] %v2741_v42  ;;  %v2717_v34 = vmul.f32 %v5994_v30, %v2695_v0  ;;  %v4438_v9 = vld [vmem:[%s6149_s12 + $0x10] sm:$0xff]   ;;  %4249 = vmatprep.subr.bf16.mxu1 %v4448_v26 }
 0x7bf   :  { %v4698_v2 = vpop.eup %4697  ;;  %v2656_v62 = vadd.f32 1e-05, %v2640_v47  ;;  %v2742_v61 = vadd.f32 %v5998_v37, %v2720_v14  ;;  %v2696_v35 = vmul.f32 %v4696_v58, %v5939_v4  ;;  %4250 = vmatpush3.bf16.msra.mxu1 %v4448_v26  ;;  %v4450_v58 = vld [vmem:[%s6150_s20 + $0x30] sm:$0xff]  }
 0x7c0   :  { %4217 = vmatprep.subr.bf16.mxu0 %v2769_v11  ;;  %v2739_v27 = vadd.f32 %v5998_v37, %v2717_v34  ;;  %v2693_v56 = vmul.f32 %v4698_v2, %v5941_v1  ;;  %v4452_v34 = vld [vmem:[%s6150_s20 + $0x20] sm:$0xff]   ;;  %v4453_v2 = vld [vmem:[%s6150_s20 + $0x18] sm:$0xff]  }
 0x7c1   :  { %4711 = vrsqrt.f32 %v2656_v62  ;;  %4218 = vmatpush3.bf16.msra.mxu0 %v2769_v11  ;;  %2758 = vst [vmem:[#allocation2 + $0x58] sm:$0xff] %v2742_v61  ;;  %v2768_v44 = vpack.c.bf16 %v2742_v61, %v2741_v42  ;;  %v2718_v15 = vmul.f32 %v5994_v30, %v2696_v35  ;;  %v4451_v11 = vld [vmem:[%s6150_s20 + $0x28] sm:$0xff]   ;;  %v4454_v62 = vld [vmem:[%s6150_s20 + $0x10] sm:$0xff]   ;;  %v4456_v35 = vld [vmem:[%s6150_s20] sm:$0xff]  }
 0x7c2   :  { %v4700_v39 = vpop.eup %4699  ;;  %2755 = vst [vmem:[#allocation2 + $0x40] sm:$0xff] %v2739_v27  ;;  %v2715_v25 = vmul.f32 %v5994_v30, %v2693_v56  ;;  %v4455_v61 = vld [vmem:[%s6150_s20 + $0x8] sm:$0xff]  }
 0x7c3   :  { %v4702_v7 = vpop.eup %4701  ;;  %4219 = vmatprep.subr.bf16.mxu0 %v2768_v44  ;;  %v2740_v52 = vadd.f32 %v5998_v37, %v2718_v15  ;;  %v2694_v4 = vmul.f32 %v4700_v39, %v5947_v3  ;;  %v3741_v15 = vld [vmem:[%s6151_s27] ss:$0 sm:$0xff] }
 0x7c4   :  { %v2737_v41 = vadd.f32 %v5998_v37, %v2715_v25  ;;  %v2691_v1 = vmul.f32 %v4702_v7, %v5949_v32 }
 0x7c5   :  { %4220 = vmatpush3.bf16.msra.mxu0 %v2768_v44  ;;  %2756 = vst [vmem:[#allocation2 + $0x48] sm:$0xff] %v2740_v52  ;;  %v2767_v48 = vpack.c.bf16 %v2740_v52, %v2739_v27  ;;  %v2716_v45 = vmul.f32 %v5994_v30, %v2694_v4 }
 0x7c6   :  { %v4704_v24 = vpop.eup %4703  ;;  %2753 = vst [vmem:[#allocation2 + $0x30] sm:$0xff] %v2737_v41  ;;  %v2713_v36 = vmul.f32 %v5994_v30, %v2691_v1 }
 0x7c7   :  { %v4706_v54 = vpop.eup %4705  ;;  %4221 = vmatprep.subr.bf16.mxu0 %v2767_v48  ;;  %v2738_v57 = vadd.f32 %v5998_v37, %v2716_v45  ;;  %v2692_v28 = vmul.f32 %v4704_v24, %v5956_v38 }
 0x7c8   :  { %v2735_v3 = vadd.f32 %v5998_v37, %v2713_v36  ;;  %v2689_v19 = vmul.f32 %v4706_v54, %v5959_v22 }
 0x7c9   :  { %4222 = vmatpush3.bf16.msra.mxu0 %v2767_v48  ;;  %2754 = vst [vmem:[#allocation2 + $0x38] sm:$0xff] %v2738_v57  ;;  %v2766_v32 = vpack.c.bf16 %v2738_v57, %v2737_v41  ;;  %v2714_v53 = vmul.f32 %v5994_v30, %v2692_v28 }
 0x7ca   :  { %v4708_v23 = vpop.eup %4707  ;;  %2751 = vst [vmem:[#allocation2 + $0x20] sm:$0xff] %v2735_v3  ;;  %v2711_v59 = vmul.f32 %v5994_v30, %v2689_v19 }
 0x7cb   :  { %v4710_v12 = vpop.eup %4709  ;;  %4223 = vmatprep.subr.bf16.mxu0 %v2766_v32  ;;  %v2736_v16 = vadd.f32 %v5998_v37, %v2714_v53  ;;  %v2690_v33 = vmul.f32 %v4708_v23, %v5966_v10 }
 0x7cc   :  { %v2733_v38 = vadd.f32 %v5998_v37, %v2711_v59  ;;  %v2687_v18 = vmul.f32 %v4710_v12, %v5969_v31 }
 0x7cd   :  { %4224 = vmatpush3.bf16.msra.mxu0 %v2766_v32  ;;  %2752 = vst [vmem:[#allocation2 + $0x28] sm:$0xff] %v2736_v16  ;;  %v2765_v22 = vpack.c.bf16 %v2736_v16, %v2735_v3  ;;  %v2712_v49 = vmul.f32 %v5994_v30, %v2690_v33 }
 0x7ce   :  { %v4712_v55 = vpop.eup %4711  ;;  %2749 = vst [vmem:[#allocation2 + $0x10] sm:$0xff] %v2733_v38  ;;  %v2709_v21 = vmul.f32 %v5994_v30, %v2687_v18 }
 0x7cf   :  { %4225 = vmatprep.subr.bf16.mxu0 %v2765_v22  ;;  %v2734_v43 = vadd.f32 %v5998_v37, %v2712_v49  ;;  %v2688_v8 = vmul.f32 %v4712_v55, %v5976_v46  ;;  %v4434_v46 = vld [vmem:[%s6149_s12 + $0x30] sm:$0xff]  }
 0x7d0   :  { %v2731_v10 = vadd.f32 %v5998_v37, %v2709_v21 }
 0x7d1   :  { %4226 = vmatpush3.bf16.msra.mxu0 %v2765_v22  ;;  %2750 = vst [vmem:[#allocation2 + $0x18] sm:$0xff] %v2734_v43  ;;  %v2764_v31 = vpack.c.bf16 %v2734_v43, %v2733_v38  ;;  %v2710_v5 = vmul.f32 %v5994_v30, %v2688_v8  ;;  %v4435_v30 = vld [vmem:[%s6149_s12 + $0x28] sm:$0xff]  }
 0x7d2   :  { %2747 = vst [vmem:[#allocation2] sm:$0xff] %v2731_v10 }
 0x7d3   :  { %4227 = vmatprep.subr.bf16.mxu0 %v2764_v31  ;;  %v2732_v17 = vadd.f32 %v5998_v37, %v2710_v5  ;;  %v4436_v37 = vld [vmem:[%s6149_s12 + $0x20] sm:$0xff]  }
 0x7d5   :  { %4228 = vmatpush3.bf16.msra.mxu0 %v2764_v31  ;;  %2748 = vst [vmem:[#allocation2 + $0x8] sm:$0xff] %v2732_v17  ;;  %v2763_v60 = vpack.c.bf16 %v2732_v17, %v2731_v10 }
 0x7d7   :  { %4229 = vmatprep.subr.bf16.mxu0 %v2763_v60 }
 0x7d9   :  { %4230 = vmatpush3.bf16.msra.mxu0 %v2763_v60 }
 0x7da   :  { %4255 = vmatprep.subr.bf16.mxu0 %v4433_v51 }
 0x7dc   :  { %4232 = vmatmul.mubr.msk.bf16.vlgmr.msra.gmra.mxu0 %vm5983_vm12, %v4862_v29  ;;  %v4439_v29 = vld [vmem:[%s6149_s12 + $0x8] sm:$0xff]  }
 0x7dd   :  { %4256 = vmatpush3.bf16.msra.mxu0 %v4433_v51  ;;  %4271 = vmatprep.mubr.bf16.mxu0 %v5450_v13  ;;  %v4440_v13 = vld [vmem:[%s6149_s12] sm:$0xff]  }
 0x7de   :  { %4257 = vmatprep.subr.bf16.mxu0 %v4434_v46 }
 0x7e1   :  { %4258 = vmatpush3.bf16.msra.mxu0 %v4434_v46 }
 0x7e2   :  { %4259 = vmatprep.subr.bf16.mxu0 %v4435_v30 }
 0x7e5   :  { %4260 = vmatpush3.bf16.msra.mxu0 %v4435_v30 }
 0x7e6   :  { %4261 = vmatprep.subr.bf16.mxu0 %v4436_v37 }
 0x7e9   :  { %4262 = vmatpush3.bf16.msra.mxu0 %v4436_v37 }
 0x7ea   :  { %4263 = vmatprep.subr.bf16.mxu0 %v4437_v40 }
 0x7ed   :  { %4264 = vmatpush3.bf16.msra.mxu0 %v4437_v40  ;;  %v3742_v40 = vld [vmem:[%s6152_s15] ss:$0 sm:$0xff] }
 0x7ee   :  { %4265 = vmatprep.subr.bf16.mxu0 %v4438_v9 }
 0x7f1   :  { %4266 = vmatpush3.bf16.msra.mxu0 %v4438_v9 }
 0x7f2   :  { %4267 = vmatprep.subr.bf16.mxu0 %v4439_v29 }
 0x7f5   :  { %4268 = vmatpush3.bf16.msra.mxu0 %v4439_v29 }
 0x7f6   :  { %4269 = vmatprep.subr.bf16.mxu0 %v4440_v13 }
 0x7f9   :  { %4270 = vmatpush3.bf16.msra.mxu0 %v4440_v13 }
 0x7fc   :  { %4272 = vmatmul.mubr.bf16.vlgmr.msra.gmra.mxu0 %v5442_v6  ;;  %v4449_v6 = vld [vmem:[%s6150_s20 + $0x38] sm:$0xff]  }
 0x7fd   :  { %4275 = vmatprep.subr.bf16.mxu1 %v4449_v6 }
 0x89c   :  { %v4233_v20 = vpop.f32.mrf.mxu0 }
 0x89e   :  { %v2805_v63 = vpop.f32.mrf.mxu0 }
 0x8a0   :  { %v4234_v42 = vpop.f32.mrf.mxu0 }
 0x8a1   :  { %v2853_v14 = vpack.c.bf16 %v4234_v42, %v4233_v20 }
 0x8a2   :  { %v2808_v0 = vpop.f32.mrf.mxu0 }
 0x8a3   :  { %v2852_v47 = vpack.c.bf16 %v2808_v0, %v2805_v63 }
 0x8a5   :  { %4251 = vmatprep.mubr.bf16.mxu1 %v2852_v47 }
 0x8a6   :  { %4252 = vmatmul.mubr.bf16.vlgmr.msra.gmra.mxu1 %v2853_v14 }
 0x8a7   :  { %4276 = vmatpush3.bf16.msra.mxu1 %v4449_v6 }
 0x8a8   :  { %4277 = vmatprep.subr.bf16.mxu1 %v4450_v58 }
 0x8ab   :  { %4278 = vmatpush3.bf16.msra.mxu1 %v4450_v58 }
 0x8ac   :  { %4279 = vmatprep.subr.bf16.mxu1 %v4451_v11 }
 0x8af   :  { %4280 = vmatpush3.bf16.msra.mxu1 %v4451_v11 }
 0x8b0   :  { %4281 = vmatprep.subr.bf16.mxu1 %v4452_v34 }
 0x8b3   :  { %4282 = vmatpush3.bf16.msra.mxu1 %v4452_v34 }
 0x8b4   :  { %4283 = vmatprep.subr.bf16.mxu1 %v4453_v2 }
 0x8b7   :  { %4284 = vmatpush3.bf16.msra.mxu1 %v4453_v2 }
 0x8b8   :  { %4285 = vmatprep.subr.bf16.mxu1 %v4454_v62 }
 0x8bb   :  { %4286 = vmatpush3.bf16.msra.mxu1 %v4454_v62 }
 0x8bc   :  { %4287 = vmatprep.subr.bf16.mxu1 %v4455_v61  ;;  %v4273_v27 = vpop.f32.mrf.mxu0 }
 0x8be   :  { %v3033_v56 = vpop.f32.mrf.mxu0 }
 0x8bf   :  { %4288 = vmatpush3.bf16.msra.mxu1 %v4455_v61 }
 0x8c0   :  { %4289 = vmatprep.subr.bf16.mxu1 %v4456_v35  ;;  %v4274_v25 = vpop.f32.mrf.mxu0 }
 0x8c2   :  { %v3036_v24 = vpop.f32.mrf.mxu0 }
 0x8c3   :  { %4290 = vmatpush3.bf16.msra.mxu1 %v4456_v35 }
 0x966   :  { %v4253_v44 = vpop.f32.mrf.mxu1 }
 0x967   :  { %v3042_v39 = vadd.f32 %v4273_v27, %v4253_v44 }
 0x968   :  { %v2936_v7 = vpop.f32.mrf.mxu1 }
 0x969   :  { %v3057_v52 = vadd.f32 %v3741_v15, %v3042_v39  ;;  %v3034_v4 = vadd.f32 %v3033_v56, %v2936_v7  ;;  %v4457_v39 = vld [vmem:[%s6153_s16 + $0x38] sm:$0xff]   ;;  %v4459_v7 = vld [vmem:[%s6153_s16 + $0x28] sm:$0xff]  }
 0x96a   :  { %v4254_v41 = vpop.f32.mrf.mxu1  ;;  %4295 = vmatprep.subr.bf16.mxu0 %v4457_v39 }
 0x96b   :  { %v3061_v1 = vsub.f32 0.0, %v3057_v52  ;;  %v3055_v48 = vadd.f32 %v3741_v15, %v3034_v4  ;;  %v3045_v45 = vadd.f32 %v4274_v25, %v4254_v41  ;;  %4296 = vmatpush3.bf16.msra.mxu0 %v4457_v39  ;;  %v4458_v25 = vld [vmem:[%s6153_s16 + $0x30] sm:$0xff]   ;;  %v4461_v4 = vld [vmem:[%s6153_s16 + $0x18] sm:$0xff]  }
 0x96c   :  { %v2939_v36 = vpop.f32.mrf.mxu1  ;;  %4297 = vmatprep.subr.bf16.mxu0 %v4458_v25  ;;  %v4462_v41 = vld [vmem:[%s6153_s16 + $0x10] sm:$0xff]  }
 0x96d   :  { %v3067_v54 = vmul.f32 1.442695, %v3061_v1  ;;  %v3059_v57 = vsub.f32 0.0, %v3055_v48  ;;  %v3058_v28 = vadd.f32 %v3741_v15, %v3045_v45  ;;  %v3037_v3 = vadd.f32 %v3036_v24, %v2939_v36  ;;  %v4463_v1 = vld [vmem:[%s6153_s16 + $0x8] sm:$0xff]  }
 0x96f   :  { %v3063_v19 = vmul.f32 1.442695, %v3059_v57  ;;  %v3062_v32 = vsub.f32 0.0, %v3058_v28  ;;  %v3056_v53 = vadd.f32 %v3741_v15, %v3037_v3  ;;  %4713 = vpow2.f32 %v3067_v54  ;;  %4298 = vmatpush3.bf16.msra.mxu0 %v4458_v25 }
 0x970   :  { %4299 = vmatprep.subr.bf16.mxu0 %v4459_v7 }
 0x971   :  { %4715 = vpow2.f32 %v3063_v19  ;;  %v3069_v23 = vmul.f32 1.442695, %v3062_v32  ;;  %v3060_v59 = vsub.f32 0.0, %v3056_v53 }
 0x973   :  { %4717 = vpow2.f32 %v3069_v23  ;;  %v3065_v12 = vmul.f32 1.442695, %v3060_v59  ;;  %4300 = vmatpush3.bf16.msra.mxu0 %v4459_v7 }
 0x975   :  { %4719 = vpow2.f32 %v3065_v12 }
 0x97c   :  { %v4714_v16 = vpop.eup %4713 }
 0x97d   :  { %v3073_v22 = vadd.f32 1.0, %v4714_v16  ;;  %v3751_v16 = vld [vmem:[%s6154_s18] ss:$0 sm:$0xff] }
 0x97e   :  { %v4716_v33 = vpop.eup %4715 }
 0x97f   :  { %v3071_v38 = vadd.f32 1.0, %v4716_v33 }
 0x980   :  { %v4718_v18 = vpop.eup %4717 }
 0x981   :  { %v3074_v49 = vadd.f32 1.0, %v4718_v18  ;;  %4721 = vrcp.f32 %v3071_v38 }
 0x982   :  { %v4720_v55 = vpop.eup %4719 }
 0x983   :  { %4723 = vrcp.f32 %v3074_v49  ;;  %v3072_v21 = vadd.f32 1.0, %v4720_v55 }
 0x984   :  { %4725 = vrcp.f32 %v3073_v22  ;;  %v3752_v22 = vld [vmem:[%s6155_s22] ss:$0 sm:$0xff] }
 0x985   :  { %4727 = vrcp.f32 %v3072_v21 }
 0x98e   :  { %v4722_v43 = vpop.eup %4721 }
 0x98f   :  { %v3079_v17 = vmul.f32 %v4722_v43, %v3055_v48  ;;  %v4464_v48 = vld [vmem:[%s6153_s16] sm:$0xff]  }
 0x990   :  { %v4724_v8 = vpop.eup %4723 }
 0x991   :  { %v4726_v10 = vpop.eup %4725  ;;  %v3082_v5 = vmul.f32 %v4724_v8, %v3058_v28 }
 0x992   :  { %v4728_v31 = vpop.eup %4727  ;;  %v3081_v51 = vmul.f32 %v4726_v10, %v3057_v52  ;;  %v4460_v52 = vld [vmem:[%s6153_s16 + $0x20] sm:$0xff]  }
 0x993   :  { %v3080_v60 = vmul.f32 %v4728_v31, %v3056_v53  ;;  %4301 = vmatprep.subr.bf16.mxu0 %v4460_v52 }
 0x994   :  { %v3100_v30 = vpack.c.bf16 %v3082_v5, %v3081_v51  ;;  %4302 = vmatpush3.bf16.msra.mxu0 %v4460_v52 }
 0x995   :  { %v3099_v46 = vpack.c.bf16 %v3080_v60, %v3079_v17  ;;  %4303 = vmatprep.subr.bf16.mxu0 %v4461_v4  ;;  %v4753_v60 = vld [vmem:[#allocation6] sm:$0xff] }
 0x997   :  { %4291 = vmatprep.mubr.bf16.mxu1 %v3099_v46  ;;  %v4754_v46 = vld [vmem:[#allocation6 + $0x8] sm:$0xff] }
 0x998   :  { %4292 = vmatmul.mubr.bf16.vlgmr.msra.gmra.mxu1 %v3100_v30  ;;  %4304 = vmatpush3.bf16.msra.mxu0 %v4461_v4 }
 0x999   :  { %4305 = vmatprep.subr.bf16.mxu0 %v4462_v41 }
 0x99c   :  { %4306 = vmatpush3.bf16.msra.mxu0 %v4462_v41 }
 0x99d   :  { %4307 = vmatprep.subr.bf16.mxu0 %v4463_v1 }
 0x9a0   :  { %4308 = vmatpush3.bf16.msra.mxu0 %v4463_v1 }
 0x9a1   :  { %4309 = vmatprep.subr.bf16.mxu0 %v4464_v48 }
 0x9a4   :  { %4310 = vmatpush3.bf16.msra.mxu0 %v4464_v48 }
 0xa58   :  { %v4293_v37 = vpop.f32.mrf.mxu1 }
 0xa59   :  { %v3199_v26 = vadd.f32 %v4293_v37, %v3742_v40 }
 0xa5a   :  { %v3190_v9 = vpop.f32.mrf.mxu1 }
 0xa5b   :  { %v3191_v29 = vadd.f32 %v3742_v40, %v3190_v9 }
 0xa5c   :  { %v4294_v13 = vpop.f32.mrf.mxu1 }
 0xa5d   :  { %3207 = vadd.xlane.f32.xlu0 %v3191_v29  ;;  %v3202_v63 = vadd.f32 %v4294_v13, %v3742_v40  ;;  %v4755_v13 = vld [vmem:[#allocation6 + $0x10] sm:$0xff] }
 0xa5e   :  { %v3193_v50 = vpop.f32.mrf.mxu1 }
 0xa5f   :  { %v3194_v20 = vadd.f32 %v3742_v40, %v3193_v50 }
 0xa61   :  { %3209 = vadd.xlane.f32.xlu1 %v3194_v20  ;;  %3211 = vadd.xlane.f32.xlu0 %v3199_v26 }
 0xa65   :  { %3213 = vadd.xlane.f32.xlu1 %v3202_v63 }
 0xae6   :  { %v3208_v42 = vpop.xlane.xlu0 %3207 }
 0xae7   :  { %v3215_v0 = vmul.f32 0.0078125, %v3208_v42  ;;  %v4465_v42 = vld [vmem:[%s6156_s23 + $0x38] sm:$0xff]  }
 0xae8   :  { %4315 = vmatprep.subr.bf16.mxu1 %v4465_v42 }
 0xae9   :  { %v3219_v47 = vsub.f32 %v3191_v29, %v3215_v0  ;;  %4316 = vmatpush3.bf16.msra.mxu1 %v4465_v42  ;;  %v4466_v0 = vld [vmem:[%s6156_s23 + $0x30] sm:$0xff]  }
 0xaea   :  { %v3210_v14 = vpop.xlane.xlu1 %3209  ;;  %v3212_v6 = vpop.xlane.xlu0 %3211  ;;  %4317 = vmatprep.subr.bf16.mxu1 %v4466_v0 }
 0xaeb   :  { %v3216_v58 = vmul.f32 0.0078125, %v3210_v14  ;;  %v3217_v11 = vmul.f32 0.0078125, %v3212_v6  ;;  %v3223_v34 = vmul.f32 %v3219_v47, %v3219_v47  ;;  %v4468_v14 = vld [vmem:[%s6156_s23 + $0x20] sm:$0xff]   ;;  %v4469_v6 = vld [vmem:[%s6156_s23 + $0x18] sm:$0xff]  }
 0xaed   :  { %v3220_v2 = vsub.f32 %v3194_v20, %v3216_v58  ;;  %v3221_v62 = vsub.f32 %v3199_v26, %v3217_v11  ;;  %3227 = vadd.xlane.f32.xlu0 %v3223_v34  ;;  %v4756_v26 = vld [vmem:[#allocation6 + $0x18] sm:$0xff]  ;;  %4318 = vmatpush3.bf16.msra.mxu1 %v4466_v0  ;;  %v4470_v58 = vld [vmem:[%s6156_s23 + $0x10] sm:$0xff]   ;;  %v4471_v11 = vld [vmem:[%s6156_s23 + $0x8] sm:$0xff]  }
 0xaee   :  { %v3214_v61 = vpop.xlane.xlu1 %3213  ;;  %v4472_v34 = vld [vmem:[%s6156_s23] sm:$0xff]  }
 0xaef   :  { %v3218_v35 = vmul.f32 0.0078125, %v3214_v61  ;;  %v3224_v27 = vmul.f32 %v3220_v2, %v3220_v2  ;;  %v3225_v56 = vmul.f32 %v3221_v62, %v3221_v62 }
 0xaf1   :  { %v3222_v44 = vsub.f32 %v3202_v63, %v3218_v35  ;;  %3229 = vadd.xlane.f32.xlu1 %v3224_v27  ;;  %3231 = vadd.xlane.f32.xlu0 %v3225_v56 }
 0xaf3   :  { %v3226_v15 = vmul.f32 %v3222_v44, %v3222_v44 }
 0xaf5   :  { %3233 = vadd.xlane.f32.xlu1 %v3226_v15 }
 0xb76   :  { %v3228_v45 = vpop.xlane.xlu0 %3227 }
 0xb77   :  { %v3235_v24 = vmul.f32 0.0078125, %v3228_v45 }
 0xb79   :  { %v3239_v36 = vadd.f32 1e-05, %v3235_v24 }
 0xb7a   :  { %v3230_v54 = vpop.xlane.xlu1 %3229  ;;  %v3232_v57 = vpop.xlane.xlu0 %3231 }
 0xb7b   :  { %4729 = vrsqrt.f32 %v3239_v36  ;;  %v3236_v28 = vmul.f32 0.0078125, %v3230_v54  ;;  %v3237_v3 = vmul.f32 0.0078125, %v3232_v57 }
 0xb7d   :  { %v3240_v19 = vadd.f32 1e-05, %v3236_v28  ;;  %v3241_v32 = vadd.f32 1e-05, %v3237_v3 }
 0xb7e   :  { %v3234_v53 = vpop.xlane.xlu1 %3233 }
 0xb7f   :  { %4731 = vrsqrt.f32 %v3240_v19  ;;  %v3238_v23 = vmul.f32 0.0078125, %v3234_v53 }
 0xb80   :  { %4733 = vrsqrt.f32 %v3241_v32 }
 0xb81   :  { %v3242_v59 = vadd.f32 1e-05, %v3238_v23 }
 0xb83   :  { %4735 = vrsqrt.f32 %v3242_v59 }
 0xb88   :  { %v4730_v12 = vpop.eup %4729 }
 0xb89   :  { %v3247_v33 = vmul.f32 %v4730_v12, %v3219_v47  ;;  %v4467_v47 = vld [vmem:[%s6156_s23 + $0x28] sm:$0xff]  }
 0xb8a   :  { %4319 = vmatprep.subr.bf16.mxu1 %v4467_v47 }
 0xb8b   :  { %v3257_v38 = vmul.f32 %v3751_v16, %v3247_v33  ;;  %4320 = vmatpush3.bf16.msra.mxu1 %v4467_v47 }
 0xb8c   :  { %v4732_v18 = vpop.eup %4731  ;;  %4321 = vmatprep.subr.bf16.mxu1 %v4468_v14 }
 0xb8d   :  { %v4734_v49 = vpop.eup %4733  ;;  %v3248_v55 = vmul.f32 %v4732_v18, %v3220_v2  ;;  %v3267_v8 = vadd.f32 %v3752_v22, %v3257_v38  ;;  %v3753_v2 = vld [vmem:[%s6157_s26] ss:$0 sm:$0xff] }
 0xb8e   :  { %v3249_v21 = vmul.f32 %v4734_v49, %v3221_v62 }
 0xb8f   :  { %v3258_v43 = vmul.f32 %v3751_v16, %v3248_v55  ;;  %v3271_v51 = vadd.f32 %v4753_v60, %v3267_v8  ;;  %4322 = vmatpush3.bf16.msra.mxu1 %v4468_v14 }
 0xb90   :  { %v4736_v10 = vpop.eup %4735  ;;  %v3259_v31 = vmul.f32 %v3751_v16, %v3249_v21  ;;  %4323 = vmatprep.subr.bf16.mxu1 %v4469_v6 }
 0xb91   :  { %v3250_v5 = vmul.f32 %v4736_v10, %v3222_v44  ;;  %v3268_v17 = vadd.f32 %v3752_v22, %v3258_v43 }
 0xb92   :  { %v3269_v40 = vadd.f32 %v3752_v22, %v3259_v31 }
 0xb93   :  { %v3272_v30 = vadd.f32 %v4754_v46, %v3268_v17  ;;  %v3260_v37 = vmul.f32 %v3751_v16, %v3250_v5  ;;  %4324 = vmatpush3.bf16.msra.mxu1 %v4469_v6 }
 0xb94   :  { %v3273_v50 = vadd.f32 %v4755_v13, %v3269_v40  ;;  %4325 = vmatprep.subr.bf16.mxu1 %v4470_v58 }
 0xb95   :  { %v3291_v9 = vpack.c.bf16 %v3272_v30, %v3271_v51  ;;  %v3270_v29 = vadd.f32 %v3752_v22, %v3260_v37 }
 0xb97   :  { %4311 = vmatprep.mubr.bf16.mxu0 %v3291_v9  ;;  %v3274_v20 = vadd.f32 %v4756_v26, %v3270_v29  ;;  %4326 = vmatpush3.bf16.msra.mxu1 %v4470_v58 }
 0xb98   :  { %4327 = vmatprep.subr.bf16.mxu1 %v4471_v11 }
 0xb99   :  { %v3292_v63 = vpack.c.bf16 %v3274_v20, %v3273_v50 }
 0xb9b   :  { %4312 = vmatmul.mubr.bf16.vlgmr.msra.gmra.mxu0 %v3292_v63  ;;  %4328 = vmatpush3.bf16.msra.mxu1 %v4471_v11 }
 0xb9c   :  { %4329 = vmatprep.subr.bf16.mxu1 %v4472_v34 }
 0xb9f   :  { %4330 = vmatpush3.bf16.msra.mxu1 %v4472_v34 }
 0xc5b   :  { %v4313_v62 = vpop.f32.mrf.mxu0 }
 0xc5c   :  { %v3391_v61 = vadd.f32 %v4313_v62, %v3753_v2 }
 0xc5d   :  { %v3382_v35 = vpop.f32.mrf.mxu0 }
 0xc5e   :  { %v3399_v27 = vsub.f32 0.0, %v3391_v61  ;;  %v3383_v56 = vadd.f32 %v3753_v2, %v3382_v35 }
 0xc5f   :  { %v4314_v44 = vpop.f32.mrf.mxu0 }
 0xc60   :  { %v3405_v15 = vmul.f32 1.442695, %v3399_v27  ;;  %v3397_v39 = vsub.f32 0.0, %v3383_v56  ;;  %v3394_v25 = vadd.f32 %v4314_v44, %v3753_v2 }
 0xc61   :  { %v3385_v7 = vpop.f32.mrf.mxu0 }
 0xc62   :  { %v3401_v52 = vmul.f32 1.442695, %v3397_v39  ;;  %v3400_v4 = vsub.f32 0.0, %v3394_v25  ;;  %v3386_v41 = vadd.f32 %v3753_v2, %v3385_v7  ;;  %4737 = vpow2.f32 %v3405_v15 }
 0xc64   :  { %4739 = vpow2.f32 %v3401_v52  ;;  %v3407_v1 = vmul.f32 1.442695, %v3400_v4  ;;  %v3398_v48 = vsub.f32 0.0, %v3386_v41 }
 0xc66   :  { %4741 = vpow2.f32 %v3407_v1  ;;  %v3403_v45 = vmul.f32 1.442695, %v3398_v48 }
 0xc68   :  { %4743 = vpow2.f32 %v3403_v45 }
 0xc6f   :  { %v4738_v24 = vpop.eup %4737 }
 0xc70   :  { %v3411_v28 = vadd.f32 1.0, %v4738_v24 }
 0xc71   :  { %v4740_v36 = vpop.eup %4739 }
 0xc72   :  { %v3409_v54 = vadd.f32 1.0, %v4740_v36 }
 0xc73   :  { %v4742_v57 = vpop.eup %4741 }
 0xc74   :  { %v3412_v3 = vadd.f32 1.0, %v4742_v57  ;;  %4745 = vrcp.f32 %v3409_v54 }
 0xc75   :  { %v4744_v19 = vpop.eup %4743 }
 0xc76   :  { %4747 = vrcp.f32 %v3412_v3  ;;  %v3410_v32 = vadd.f32 1.0, %v4744_v19 }
 0xc77   :  { %4749 = vrcp.f32 %v3411_v28 }
 0xc78   :  { %4751 = vrcp.f32 %v3410_v32 }
 0xc81   :  { %v4746_v53 = vpop.eup %4745 }
 0xc82   :  { %v3417_v33 = vmul.f32 %v4746_v53, %v3383_v56 }
 0xc83   :  { %v4748_v23 = vpop.eup %4747 }
 0xc84   :  { %v4750_v59 = vpop.eup %4749  ;;  %v3420_v16 = vmul.f32 %v4748_v23, %v3394_v25 }
 0xc85   :  { %v4752_v12 = vpop.eup %4751  ;;  %v3419_v18 = vmul.f32 %v4750_v59, %v3391_v61 }
 0xc86   :  { %v3418_v38 = vmul.f32 %v4752_v12, %v3386_v41 }
 0xc87   :  { %v3438_v49 = vpack.c.bf16 %v3420_v16, %v3419_v18 }
 0xc88   :  { %v3437_v22 = vpack.c.bf16 %v3418_v38, %v3417_v33 }
 0xc8a   :  { %4331 = vmatprep.mubr.bf16.mxu1 %v3437_v22 }
 0xc8b   :  { %4332 = vmatmul.mubr.bf16.vlgmr.msra.gmra.mxu1 %v3438_v49 }
 0xc8c   :  { %4768 = shalt.err (!%p4765_p4)
}
 0xc8d   :  { %s4864_s7 = smov 128   ;;  %s4865_s10 = smov 8   ;;  %v3762_v55 = vld [vmem:[%s5051_s19] ss:$0 sm:$0xff] }
 0xc8e   :  { %3558 = dma.vmem_to_hbm [thread:$0]  %s3553_s1, 2048, %s5056_s14, [#allocation3], %s4864_s7, %s4864_s7, %s4865_s10  }
 0xc8f   :  { %s4866_s11 = smov [#allocation4]   ;;  %s4867_s5 = smov [#allocation6]  }
 0xc90   :  { %s3564_s0 = sshll.u32 %s4866_s11, 4  ;;  %s3576_s9 = sshll.u32 %s4867_s5, 4  ;;  %s3565_s0 = int_to_ptr.vmem [resolvable:$true] %s3564_s0  ;;  %s3577_s9 = int_to_ptr.vmem [resolvable:$true] %s3576_s9 }
 0xc91   :  { %s4777_s14 = scalar_lea.vmem %s3565_s0, 512  ;;  %p4782_p6 = scmp.lt.s32.totalorder %s3565_s0, %s3565_s0 }
 0xc92   :  { %p4778_p5 = scmp.ne.s32.totalorder %s3565_s0, %s4777_s14  ;;  %p4783_p7 = scmp.lt.s32.totalorder %s4777_s14, %s4777_s14 }
 0xc94   :  { %p4784_p8 = por %p4783_p7, %p4782_p6 }
 0xc96   :  { %p4785_p9 = pnand %p4784_p8, %p4778_p5 }
 0xd4b   :  { %v4333_v21 = vpop.f32.mrf.mxu1 }
 0xd4c   :  { %v3537_v43 = vadd.f32 %v4333_v21, %v3762_v55 }
 0xd4d   :  { %v3528_v8 = vpop.f32.mrf.mxu1 }
 0xd4e   :  { %3545 = vst [vmem:[#allocation4 + $0x10] sm:$0xff] %v3537_v43  ;;  %v3529_v10 = vadd.f32 %v3762_v55, %v3528_v8 }
 0xd4f   :  { %v4334_v31 = vpop.f32.mrf.mxu1 }
 0xd50   :  { %3543 = vst [vmem:[#allocation4] sm:$0xff] %v3529_v10  ;;  %v3540_v5 = vadd.f32 %v4334_v31, %v3762_v55 }
 0xd51   :  { %v3531_v17 = vpop.f32.mrf.mxu1 }
 0xd52   :  { %3546 = vst [vmem:[#allocation4 + $0x18] sm:$0xff] %v3540_v5  ;;  %v3532_v60 = vadd.f32 %v3762_v55, %v3531_v17 }
 0xd54   :  { %3544 = vst [vmem:[#allocation4 + $0x8] sm:$0xff] %v3532_v60 }
 0xd55   :  { %4788 = shalt.err (!%p4785_p9)
}
 0xd56   :  { %3570 = dma.vmem_to_hbm [thread:$0]  %s3565_s0, 512, %s5061_s4, [#allocation5], %s4864_s7, %s4864_s7, %s4865_s10  }
 0xd57   :  { %s4797_s19 = scalar_lea.vmem %s3577_s9, 1024  ;;  %p4802_p11 = scmp.lt.s32.totalorder %s3577_s9, %s3577_s9 }
 0xd58   :  { %p4798_p10 = scmp.ne.s32.totalorder %s3577_s9, %s4797_s19  ;;  %p4803_p12 = scmp.lt.s32.totalorder %s4797_s19, %s4797_s19 }
 0xd5a   :  { %p4804_p13 = por %p4803_p12, %p4802_p11 }
 0xd5c   :  { %p4805_p0 = pnand %p4804_p13, %p4798_p10 }
 0xd5e   :  { %4808 = shalt.err (!%p4805_p0)
}
 0xd5f   :  { %3582 = dma.vmem_to_hbm [thread:$0]  %s3577_s9, 1024, %s5066_s21, [#allocation5], %s4864_s7, %s4864_s7, %s4865_s10  }
 0xd60   :  { %4817 = dma.done.wait [#allocation3], 2048  }
 0xd61   :  { %4818 = vsyncadd [#allocation3], 4294965248 }
 0xd62   :  { %4819 = dma.done.wait [#allocation5], 1536  }
 0xd63   :  { %4820 = vsyncadd [#allocation5], 4294965760 }
 0xd64   :  { %3592 = vsyncpa [#allocation3], 1 }
 0xd65   :  { %3593 = vsyncpa [#allocation5], 1 }

</bundles_post_ra>
